<compile_context>
chip_gen: v7x
topology: tpu7x:2x2x1
jax: 0.10.0
libtpu: 0.0.40
codegen_flags: <defaults>
</compile_context>

<pallas_src>
import jax
import jax.numpy as jnp
from jax import lax
from jax.experimental import pallas as pl
from jax.experimental.pallas import tpu as pltpu

_MIB = 1024 * 1024
_COL_BASE = 8          # sublane-aligned base column of the tap read window


def _round_up(v, m):
    return ((v + m - 1) // m) * m


def _padded_bytes(shape, itemsize):
    """Physical VMEM footprint: lane dim padded to 128, sublane dim to 8/16."""
    shape = tuple(int(d) for d in shape)
    if len(shape) < 2:
        shape = (1,) + shape
    lead = 1
    for d in shape[:-2]:
        lead *= d
    sub = 8 if itemsize >= 4 else 8 * (4 // itemsize)
    return lead * _round_up(shape[-2], sub) * _round_up(shape[-1], 128) * itemsize


def _vmem_estimate(tile_rows, W, Wp, C):
    """Per-grid-step VMEM estimate (double-buffered IO + scratch + live values)."""
    R1, R2 = tile_rows + 4, tile_rows + 2
    est = 0
    est += 2 * _padded_bytes((tile_rows, W, C), 4)        # x_cur block
    est += 4 * _padded_bytes((2, W, C), 4)                # top/bottom halo blocks
    est += 4 * _padded_bytes((C, 9 * C), 2)               # w1/w2 (double buffered)
    est += 4 * _padded_bytes((1, C), 4)                   # b1/b2
    est += 2 * _padded_bytes((tile_rows, W, C), 4)        # output block
    est += _padded_bytes((R1, Wp, C), 2)                  # xs staging (bf16)
    est += _padded_bytes((R2, Wp, C), 2)                  # ms staging (bf16)
    est += _padded_bytes((R1 * Wp, 9 * C), 4)             # tap matmul output z
    est += _padded_bytes((R1 * Wp, 3 * C), 4)             # one rolled dx slab
    est += 2 * _padded_bytes((R2, W, C), 4)               # tap accumulators
    return est


def _make_rcu_kernel(TH, W, C, Wp):
    """TH = output rows per tile.  Staging geometry:
       xs: (TH+4, Wp, C) bf16  relu(x) for x rows [r0-2, r0+TH+2), cols [0,W)
           at column 0, zero elsewhere (in-kernel padding, aligned stores).
       ms: (TH+2, Wp, C) bf16  relu(conv1+b1) for conv1 rows [r0-1, r0+TH+1)."""
    R1 = TH + 4
    R2 = TH + 2
    B = _COL_BASE

    def tap_accumulate(z2d, rows_in, rows_out):
        # z2d: (rows_in*Wp, 9C) f32 matmul output, taps packed dx-major,dy-minor.
        # dx handled by a small positive XLU roll to a common aligned column
        # window [B, B+W); dy handled by free leading-dim offsets.  The roll's
        # cross-row borrow only ever lands on zero-staged padding columns.
        acc = None
        for dx in range(3):
            zdx = z2d[:, dx * 3 * C:(dx + 1) * 3 * C]
            zr = pltpu.roll(zdx, shift=B + 1 - dx, axis=0)
            zr = zr.reshape(rows_in, Wp, 3 * C)
            for dy in range(3):
                v = zr[dy:dy + rows_out, B:B + W, dy * C:(dy + 1) * C]
                acc = v if acc is None else acc + v
        return acc

    def kernel(xc_ref, xt_ref, xb_ref, w1_ref, b1_ref, w2_ref, b2_ref,
               o_ref, xs_ref, ms_ref):
        r = pl.program_id(1)
        last = pl.num_programs(1) - 1
        relu = lambda a: jnp.maximum(a, 0.0)

        # ---- stage relu(x) with in-kernel zero padding; halo rows outside the
        # image are zero (relu(pad0(x)) == pad0(relu(x))).  Every element of the
        # scratch is rewritten each step, so the grid axes are megacore-safe.
        xs_ref[:, W:Wp, :] = jnp.zeros((R1, Wp - W, C), jnp.bfloat16)
        top = jnp.where(r > 0, relu(xt_ref[0]), 0.0).astype(jnp.bfloat16)
        bot = jnp.where(r < last, relu(xb_ref[0]), 0.0).astype(jnp.bfloat16)
        xs_ref[0:2, 0:W, :] = top
        xs_ref[2:TH + 2, 0:W, :] = relu(xc_ref[0]).astype(jnp.bfloat16)
        xs_ref[TH + 2:R1, 0:W, :] = bot

        # ---- conv1: one bf16 MXU matmul covering all 9 taps, f32 accumulation.
        a1 = xs_ref[...].reshape(R1 * Wp, C)
        z1 = jnp.dot(a1, w1_ref[...], preferred_element_type=jnp.float32)
        out1 = tap_accumulate(z1, R1, R2)
        y1 = relu(out1 + b1_ref[0]).astype(jnp.bfloat16)

        # ---- stage conv2 input (conv1 halo rows recomputed; only the image
        # boundary rows are conv2's zero padding).  Interior at column 0.
        ms_ref[:, W:Wp, :] = jnp.zeros((R2, Wp - W, C), jnp.bfloat16)
        ms_ref[:, 0:W, :] = y1

        @pl.when(r == 0)
        def _():
            ms_ref[0:1, :, :] = jnp.zeros((1, Wp, C), jnp.bfloat16)

        @pl.when(r == last)
        def _():
            ms_ref[R2 - 1:R2, :, :] = jnp.zeros((1, Wp, C), jnp.bfloat16)

        # ---- conv2 + bias + residual (bias/residual stay f32; residual comes
        # from the unpadded, aligned x block).
        a2 = ms_ref[...].reshape(R2 * Wp, C)
        z2 = jnp.dot(a2, w2_ref[...], preferred_element_type=jnp.float32)
        out2 = tap_accumulate(z2, R2, TH)
        o_ref[0] = (out2 + b2_ref[0] + xc_ref[0]).astype(o_ref.dtype)

    return kernel


def pack_rcu_params(w1, b1, w2, b2):
    """One-time (model-load) packing of the PyTorch OIHW conv weights.

    Packed layout: (Cin, 9*Cout) bf16 with taps ordered dx-major / dy-minor,
    i.e. packed[ci, (dx*3 + dy)*C + co] = w[co, ci, dy, dx]."""
    C = int(w1.shape[0])

    def pack(w):
        return jnp.transpose(jnp.asarray(w), (1, 3, 2, 0)).reshape(
            C, 9 * C).astype(jnp.bfloat16)

    return (pack(w1), jnp.asarray(b1, jnp.float32).reshape(1, C),
            pack(w2), jnp.asarray(b2, jnp.float32).reshape(1, C))


def _rcu_nhwc(x, w1k, b1k, w2k, b2k):
    """x: (N, H, W, C) f32; packed params from pack_rcu_params."""
    N, H, W, C = x.shape
    if H % 2 != 0:
        # TODO(synk): odd H needs a different halo blocking; not used here.
        raise NotImplementedError("H must be even")
    Wp = _round_up(W + 8, 16)   # >= W+2 zero cols, 16-aligned for bf16 staging

    # Capacity-aware scoped-VMEM limit (fix for v5e 16 MiB default / v7x 64 MiB
    # physical): always set it, never above capacity, and retile if needed.
    try:
        cap = int(getattr(pltpu.get_tpu_info(), "vmem_capacity_bytes",
                          64 * _MIB))
    except Exception:  # pragma: no cover - conservative fallback
        cap = 64 * _MIB
    budget = cap - 4 * _MIB

    # Row-tile size: prefer 8 rows (review-suggested 8-16; keeps the live f32
    # tap slab small, deep pipelining, and many parallel steps for 2 TCs); on
    # v5e keep matmul M = (TH+4)*Wp comfortably large.
    cands = [th for th in (8, 16, 4, 2) if th <= H and H % th == 0]
    TH = None
    for th in cands:
        if int(_vmem_estimate(th, W, Wp, C) * 1.5) <= budget:
            TH = th
            break
    if TH is None:
        # TODO(synk): sub-tile the W axis as well for extremely large W*C.
        TH = cands[-1] if cands else H
    est = _vmem_estimate(TH, W, Wp, C)
    vmem_limit = min(max(32 * _MIB, int(est * 1.5)), budget)

    HB = TH // 2  # halo blocks are 2 rows each
    num_row_tiles = H // TH

    # TODO(synk): weights/biases have constant index_maps (fetched once);
    # single-buffering them (pipeline_mode=pl.Buffered(1)) would free ~2.4 MB
    # at C=256 under the v7x budget.
    in_specs = [
        pl.BlockSpec((1, TH, W, C), lambda n, r: (n, r, 0, 0)),
        pl.BlockSpec((1, 2, W, C),
                     lambda n, r: (n, jnp.maximum(r * HB - 1, 0), 0, 0)),
        pl.BlockSpec((1, 2, W, C),
                     lambda n, r: (n, jnp.minimum(r * HB + HB, H // 2 - 1),
                                   0, 0)),
        pl.BlockSpec((C, 9 * C), lambda n, r: (0, 0)),
        pl.BlockSpec((1, C), lambda n, r: (0, 0)),
        pl.BlockSpec((C, 9 * C), lambda n, r: (0, 0)),
        pl.BlockSpec((1, C), lambda n, r: (0, 0)),
    ]

    # TODO(synk): for small C (< 128, e.g. the test config C=8) the lane axis
    # is mostly padding; a lane-dense presentation (fold W into lanes) would be
    # needed if the small-feature path matters.  Production GLPanoDepth uses
    # C >= 128 where this layout is lane-dense.
    out = pl.pallas_call(
        _make_rcu_kernel(TH, W, C, Wp),
        out_shape=jax.ShapeDtypeStruct((N, H, W, C), x.dtype),
        grid_spec=pltpu.PrefetchScalarGridSpec(
            num_scalar_prefetch=0,
            grid=(N, num_row_tiles),
            in_specs=in_specs,
            out_specs=pl.BlockSpec((1, TH, W, C), lambda n, r: (n, r, 0, 0)),
            scratch_shapes=[
                pltpu.VMEM((TH + 4, Wp, C), jnp.bfloat16),   # padded relu(x)
                pltpu.VMEM((TH + 2, Wp, C), jnp.bfloat16),   # padded conv1 out
            ],
        ),
        compiler_params=pltpu.CompilerParams(
            dimension_semantics=("parallel", "parallel"),
            vmem_limit_bytes=vmem_limit,
        ),
    )(x, x, x, w1k, b1k, w2k, b2k)
    return out


# Preferred entry point: NHWC activations end-to-end.
residual_conv_unit_nhwc = jax.jit(_rcu_nhwc)


@jax.jit
def residual_conv_unit(x_nchw, w1k, b1k, w2k, b2k):
    """NCHW convenience wrapper matching the PyTorch module interface."""
    # TODO(synk): in the full model keep activations NHWC end-to-end; these two
    # transposes are full-tensor HBM relayouts costing ~as much as the kernel.
    x = jnp.transpose(x_nchw, (0, 2, 3, 1))
    y = _rcu_nhwc(x, w1k, b1k, w2k, b2k)
    return jnp.transpose(y, (0, 3, 1, 2))


def _reference(x, w1, b1, w2, b2):
    """Pure-JAX f32 reference matching the PyTorch forward (bn=False, ReLU)."""
    dn = ('NCHW', 'OIHW', 'NCHW')
    out = jnp.maximum(x, 0.0)
    out = lax.conv_general_dilated(out, w1, (1, 1), ((1, 1), (1, 1)),
                                   dimension_numbers=dn)
    out = out + b1.reshape(1, -1, 1, 1)
    out = jnp.maximum(out, 0.0)
    out = lax.conv_general_dilated(out, w2, (1, 1), ((1, 1), (1, 1)),
                                   dimension_numbers=dn)
    out = out + b2.reshape(1, -1, 1, 1)
    return out + x


if __name__ == "__main__":
    # Small shapes consistent with the module: batch=2, features=8, 16x16.
    # (H=16 with 8-row tiles -> grid (2, 2); exercises the halo recompute.)
    N, C, H, W = 2, 8, 16, 16
    key = jax.random.PRNGKey(0)
    kx, kw1, kb1, kw2, kb2 = jax.random.split(key, 5)

    x = jax.random.normal(kx, (N, C, H, W), jnp.float32)
    # nn.Conv2d(features, features, 3, padding=1, bias=True) because bn=False.
    w1 = jax.random.normal(kw1, (C, C, 3, 3), jnp.float32) * 0.1
    b1 = jax.random.normal(kb1, (C,), jnp.float32) * 0.1
    w2 = jax.random.normal(kw2, (C, C, 3, 3), jnp.float32) * 0.1
    b2 = jax.random.normal(kb2, (C,), jnp.float32) * 0.1

    params = pack_rcu_params(w1, b1, w2, b2)   # once, at "model load"
    out = jax.block_until_ready(residual_conv_unit(x, *params))
    ref = _reference(x, w1, b1, w2, b2)

    assert out.shape == (N, C, H, W)
    # bf16 matmul operands (f32 accumulation) -> loosened tolerance vs f32 ref.
    max_err = float(jnp.max(jnp.abs(out - ref)))
    assert jnp.allclose(out, ref, atol=5e-2, rtol=5e-2), (
        f"mismatch vs reference, max abs err {max_err}")

    # TODO(synk): bn=True (BatchNorm2d) path and the groups>1 conv_merge path
    # are not implemented; the module is used with bn=False / groups=1 here.
    print("KERNEL_OK")
</pallas_src>

<mosaic_0001>
module attributes {stable_mosaic.version = 11 : i64} {
  func.func @kernel(%arg0: i32, %arg1: i32, %arg2: memref<1x8x16x8xf32, #tpu.memory_space<vmem>>, %arg3: memref<1x2x16x8xf32, #tpu.memory_space<vmem>>, %arg4: memref<1x2x16x8xf32, #tpu.memory_space<vmem>>, %arg5: memref<8x72xbf16, #tpu.memory_space<vmem>>, %arg6: memref<1x8xf32, #tpu.memory_space<vmem>>, %arg7: memref<8x72xbf16, #tpu.memory_space<vmem>>, %arg8: memref<1x8xf32, #tpu.memory_space<vmem>>, %arg9: memref<1x8x16x8xf32, #tpu.memory_space<vmem>>, %arg10: memref<12x32x8xbf16, #tpu.memory_space<vmem>>, %arg11: memref<10x32x8xbf16, #tpu.memory_space<vmem>>) attributes {dimension_semantics = [#tpu.dimension_semantics<parallel>, #tpu.dimension_semantics<parallel>], iteration_bounds = array<i64: 2, 2>, scalar_prefetch = 0 : i64, scratch_operands = 2 : i64, tpu.core_type = #tpu.core_type<tc>, window_params = [{transform_indices = @transform_0, window_bounds = array<i64: 1, 8, 16, 8>}, {transform_indices = @transform_1, window_bounds = array<i64: 1, 2, 16, 8>}, {transform_indices = @transform_2, window_bounds = array<i64: 1, 2, 16, 8>}, {pipeline_mode = #tpu.pipeline_mode<synchronous>, transform_indices = @transform_3, window_bounds = array<i64: 8, 72>}, {pipeline_mode = #tpu.pipeline_mode<synchronous>, transform_indices = @transform_4, window_bounds = array<i64: 1, 8>}, {pipeline_mode = #tpu.pipeline_mode<synchronous>, transform_indices = @transform_5, window_bounds = array<i64: 8, 72>}, {pipeline_mode = #tpu.pipeline_mode<synchronous>, transform_indices = @transform_6, window_bounds = array<i64: 1, 8>}, {transform_indices = @transform_7, window_bounds = array<i64: 1, 8, 16, 8>}]} {
    %cst = arith.constant 0.000000e+00 : bf16
    %0 = vector.broadcast %cst : bf16 to vector<12x16x8xbf16>
    %c0 = arith.constant 0 : index
    %c16 = arith.constant 16 : index
    %c0_0 = arith.constant 0 : index
    %1 = vector.load %arg10[%c0, %c16, %c0_0] : memref<12x32x8xbf16, #tpu.memory_space<vmem>>, vector<12x16x8xbf16>
    tpu.vector_store %arg10[%c0, %c16, %c0_0], %0 {strides = array<i32>} : memref<12x32x8xbf16, #tpu.memory_space<vmem>>, vector<12x16x8xbf16>,
    %c0_i32 = arith.constant 0 : i32
    %2 = arith.cmpi sgt, %arg1, %c0_i32 : i32
    %c0_1 = arith.constant 0 : index
    %c0_2 = arith.constant 0 : index
    %c0_3 = arith.constant 0 : index
    %c0_4 = arith.constant 0 : index
    %3 = vector.load %arg3[%c0_1, %c0_2, %c0_3, %c0_4] : memref<1x2x16x8xf32, #tpu.memory_space<vmem>>, vector<1x2x16x8xf32>
    %4 = vector.shape_cast %3 : vector<1x2x16x8xf32> to vector<2x16x8xf32>
    %cst_5 = arith.constant 0.000000e+00 : f32
    %5 = vector.broadcast %cst_5 : f32 to vector<2x16x8xf32>
    %6 = arith.maximumf %4, %5 : vector<2x16x8xf32>
    %cst_6 = arith.constant 0.000000e+00 : f32
    %7 = vector.broadcast %cst_6 : f32 to vector<2x16x8xf32>
    %8 = arith.select %2, %6, %7 : vector<2x16x8xf32>
    %9 = arith.truncf %8 : vector<2x16x8xf32> to vector<2x16x8xbf16>
    %c1_i32 = arith.constant 1 : i32
    %10 = arith.cmpi slt, %arg1, %c1_i32 : i32
    %c0_7 = arith.constant 0 : index
    %c0_8 = arith.constant 0 : index
    %c0_9 = arith.constant 0 : index
    %c0_10 = arith.constant 0 : index
    %11 = vector.load %arg4[%c0_7, %c0_8, %c0_9, %c0_10] : memref<1x2x16x8xf32, #tpu.memory_space<vmem>>, vector<1x2x16x8xf32>
    %12 = vector.shape_cast %11 : vector<1x2x16x8xf32> to vector<2x16x8xf32>
    %cst_11 = arith.constant 0.000000e+00 : f32
    %13 = vector.broadcast %cst_11 : f32 to vector<2x16x8xf32>
    %14 = arith.maximumf %12, %13 : vector<2x16x8xf32>
    %cst_12 = arith.constant 0.000000e+00 : f32
    %15 = vector.broadcast %cst_12 : f32 to vector<2x16x8xf32>
    %16 = arith.select %10, %14, %15 : vector<2x16x8xf32>
    %17 = arith.truncf %16 : vector<2x16x8xf32> to vector<2x16x8xbf16>
    %c0_13 = arith.constant 0 : index
    %c0_14 = arith.constant 0 : index
    %c0_15 = arith.constant 0 : index
    %18 = vector.load %arg10[%c0_13, %c0_14, %c0_15] : memref<12x32x8xbf16, #tpu.memory_space<vmem>>, vector<2x16x8xbf16>
    tpu.vector_store %arg10[%c0_13, %c0_14, %c0_15], %9 {strides = array<i32>} : memref<12x32x8xbf16, #tpu.memory_space<vmem>>, vector<2x16x8xbf16>,
    %c0_16 = arith.constant 0 : index
    %c0_17 = arith.constant 0 : index
    %c0_18 = arith.constant 0 : index
    %c0_19 = arith.constant 0 : index
    %19 = vector.load %arg2[%c0_16, %c0_17, %c0_18, %c0_19] : memref<1x8x16x8xf32, #tpu.memory_space<vmem>>, vector<1x8x16x8xf32>
    %20 = vector.shape_cast %19 : vector<1x8x16x8xf32> to vector<8x16x8xf32>
    %cst_20 = arith.constant 0.000000e+00 : f32
    %21 = vector.broadcast %cst_20 : f32 to vector<8x16x8xf32>
    %22 = arith.maximumf %20, %21 : vector<8x16x8xf32>
    %23 = arith.truncf %22 : vector<8x16x8xf32> to vector<8x16x8xbf16>
    %c2 = arith.constant 2 : index
    %c0_21 = arith.constant 0 : index
    %c0_22 = arith.constant 0 : index
    %24 = vector.load %arg10[%c2, %c0_21, %c0_22] : memref<12x32x8xbf16, #tpu.memory_space<vmem>>, vector<8x16x8xbf16>
    tpu.vector_store %arg10[%c2, %c0_21, %c0_22], %23 {strides = array<i32>} : memref<12x32x8xbf16, #tpu.memory_space<vmem>>, vector<8x16x8xbf16>,
    %c10 = arith.constant 10 : index
    %c0_23 = arith.constant 0 : index
    %c0_24 = arith.constant 0 : index
    %25 = vector.load %arg10[%c10, %c0_23, %c0_24] : memref<12x32x8xbf16, #tpu.memory_space<vmem>>, vector<2x16x8xbf16>
    tpu.vector_store %arg10[%c10, %c0_23, %c0_24], %17 {strides = array<i32>} : memref<12x32x8xbf16, #tpu.memory_space<vmem>>, vector<2x16x8xbf16>,
    %c0_25 = arith.constant 0 : index
    %c0_26 = arith.constant 0 : index
    %c0_27 = arith.constant 0 : index
    %26 = vector.load %arg10[%c0_25, %c0_26, %c0_27] : memref<12x32x8xbf16, #tpu.memory_space<vmem>>, vector<12x32x8xbf16>
    %27 = vector.shape_cast %26 : vector<12x32x8xbf16> to vector<384x8xbf16>
    %c0_28 = arith.constant 0 : index
    %c0_29 = arith.constant 0 : index
    %28 = vector.load %arg5[%c0_28, %c0_29] : memref<8x72xbf16, #tpu.memory_space<vmem>>, vector<8x72xbf16>
    %cst_30 = arith.constant dense<0.000000e+00> : vector<384x72xf32>
    %29 = tpu.matmul %27, %28, %cst_30 {dimension_numbers = #tpu.dot_dimension_numbers<[1], [0], [0], [1], [0, 0, 1, 1], [], []>} : vector<384x8xbf16>, vector<8x72xbf16>, vector<384x72xf32> -> vector<384x72xf32>
    %30 = vector.extract_strided_slice %29 {offsets = [0, 0], sizes = [384, 24], strides = [1, 1]} : vector<384x72xf32> to vector<384x24xf32>
    %c9_i32 = arith.constant 9 : i32
    %31 = tpu.dynamic_rotate %30 by %c9_i32 dim 0 : vector<384x24xf32>, i32 -> vector<384x24xf32>
    %32 = vector.shape_cast %31 : vector<384x24xf32> to vector<12x32x24xf32>
    %33 = vector.extract_strided_slice %32 {offsets = [0, 8, 0], sizes = [10, 16, 8], strides = [1, 1, 1]} : vector<12x32x24xf32> to vector<10x16x8xf32>
    %34 = vector.extract_strided_slice %32 {offsets = [1, 8, 8], sizes = [10, 16, 8], strides = [1, 1, 1]} : vector<12x32x24xf32> to vector<10x16x8xf32>
    %35 = arith.addf %33, %34 : vector<10x16x8xf32>
    %36 = vector.extract_strided_slice %32 {offsets = [2, 8, 16], sizes = [10, 16, 8], strides = [1, 1, 1]} : vector<12x32x24xf32> to vector<10x16x8xf32>
    %37 = arith.addf %35, %36 : vector<10x16x8xf32>
    %38 = vector.extract_strided_slice %29 {offsets = [0, 24], sizes = [384, 24], strides = [1, 1]} : vector<384x72xf32> to vector<384x24xf32>
    %c8_i32 = arith.constant 8 : i32
    %39 = tpu.dynamic_rotate %38 by %c8_i32 dim 0 : vector<384x24xf32>, i32 -> vector<384x24xf32>
    %40 = vector.shape_cast %39 : vector<384x24xf32> to vector<12x32x24xf32>
    %41 = vector.extract_strided_slice %40 {offsets = [0, 8, 0], sizes = [10, 16, 8], strides = [1, 1, 1]} : vector<12x32x24xf32> to vector<10x16x8xf32>
    %42 = arith.addf %37, %41 : vector<10x16x8xf32>
    %43 = vector.extract_strided_slice %40 {offsets = [1, 8, 8], sizes = [10, 16, 8], strides = [1, 1, 1]} : vector<12x32x24xf32> to vector<10x16x8xf32>
    %44 = arith.addf %42, %43 : vector<10x16x8xf32>
    %45 = vector.extract_strided_slice %40 {offsets = [2, 8, 16], sizes = [10, 16, 8], strides = [1, 1, 1]} : vector<12x32x24xf32> to vector<10x16x8xf32>
    %46 = arith.addf %44, %45 : vector<10x16x8xf32>
    %47 = vector.extract_strided_slice %29 {offsets = [0, 48], sizes = [384, 24], strides = [1, 1]} : vector<384x72xf32> to vector<384x24xf32>
    %c7_i32 = arith.constant 7 : i32
    %48 = tpu.dynamic_rotate %47 by %c7_i32 dim 0 : vector<384x24xf32>, i32 -> vector<384x24xf32>
    %49 = vector.shape_cast %48 : vector<384x24xf32> to vector<12x32x24xf32>
    %50 = vector.extract_strided_slice %49 {offsets = [0, 8, 0], sizes = [10, 16, 8], strides = [1, 1, 1]} : vector<12x32x24xf32> to vector<10x16x8xf32>
    %51 = arith.addf %46, %50 : vector<10x16x8xf32>
    %52 = vector.extract_strided_slice %49 {offsets = [1, 8, 8], sizes = [10, 16, 8], strides = [1, 1, 1]} : vector<12x32x24xf32> to vector<10x16x8xf32>
    %53 = arith.addf %51, %52 : vector<10x16x8xf32>
    %54 = vector.extract_strided_slice %49 {offsets = [2, 8, 16], sizes = [10, 16, 8], strides = [1, 1, 1]} : vector<12x32x24xf32> to vector<10x16x8xf32>
    %55 = arith.addf %53, %54 : vector<10x16x8xf32>
    %c0_31 = arith.constant 0 : index
    %c0_32 = arith.constant 0 : index
    %56 = vector.load %arg6[%c0_31, %c0_32] : memref<1x8xf32, #tpu.memory_space<vmem>>, vector<1x8xf32>
    %57 = vector.shape_cast %56 : vector<1x8xf32> to vector<8xf32>
    %58 = vector.shape_cast %57 : vector<8xf32> to vector<1x1x8xf32>
    %59 = vector.broadcast %58 : vector<1x1x8xf32> to vector<10x16x8xf32>
    %60 = arith.addf %55, %59 : vector<10x16x8xf32>
    %cst_33 = arith.constant 0.000000e+00 : f32
    %61 = vector.broadcast %cst_33 : f32 to vector<10x16x8xf32>
    %62 = arith.maximumf %60, %61 : vector<10x16x8xf32>
    %63 = arith.truncf %62 : vector<10x16x8xf32> to vector<10x16x8xbf16>
    %cst_34 = arith.constant 0.000000e+00 : bf16
    %64 = vector.broadcast %cst_34 : bf16 to vector<10x16x8xbf16>
    %c0_35 = arith.constant 0 : index
    %c16_36 = arith.constant 16 : index
    %c0_37 = arith.constant 0 : index
    %65 = vector.load %arg11[%c0_35, %c16_36, %c0_37] : memref<10x32x8xbf16, #tpu.memory_space<vmem>>, vector<10x16x8xbf16>
    tpu.vector_store %arg11[%c0_35, %c16_36, %c0_37], %64 {strides = array<i32>} : memref<10x32x8xbf16, #tpu.memory_space<vmem>>, vector<10x16x8xbf16>,
    %c0_38 = arith.constant 0 : index
    %c0_39 = arith.constant 0 : index
    %c0_40 = arith.constant 0 : index
    %66 = vector.load %arg11[%c0_38, %c0_39, %c0_40] : memref<10x32x8xbf16, #tpu.memory_space<vmem>>, vector<10x16x8xbf16>
    tpu.vector_store %arg11[%c0_38, %c0_39, %c0_40], %63 {strides = array<i32>} : memref<10x32x8xbf16, #tpu.memory_space<vmem>>, vector<10x16x8xbf16>,
    %c0_i32_41 = arith.constant 0 : i32
    %67 = arith.cmpi eq, %arg1, %c0_i32_41 : i32
    %68 = arith.extui %67 : i1 to i32
    %c0_i32_42 = arith.constant 0 : i32
    %69 = arith.cmpi ne, %68, %c0_i32_42 : i32
    scf.if %69 {
      %cst_64 = arith.constant 0.000000e+00 : bf16
      %114 = vector.broadcast %cst_64 : bf16 to vector<1x32x8xbf16>
      %c0_65 = arith.constant 0 : index
      %c0_66 = arith.constant 0 : index
      %c0_67 = arith.constant 0 : index
      %115 = vector.load %arg11[%c0_65, %c0_66, %c0_67] : memref<10x32x8xbf16, #tpu.memory_space<vmem>>, vector<1x32x8xbf16>
      tpu.vector_store %arg11[%c0_65, %c0_66, %c0_67], %114 {strides = array<i32>} : memref<10x32x8xbf16, #tpu.memory_space<vmem>>, vector<1x32x8xbf16>,
    } else {
    }
    %c1_i32_43 = arith.constant 1 : i32
    %70 = arith.cmpi eq, %arg1, %c1_i32_43 : i32
    %71 = arith.extui %70 : i1 to i32
    %c0_i32_44 = arith.constant 0 : i32
    %72 = arith.cmpi ne, %71, %c0_i32_44 : i32
    scf.if %72 {
      %cst_64 = arith.constant 0.000000e+00 : bf16
      %114 = vector.broadcast %cst_64 : bf16 to vector<1x32x8xbf16>
      %c9 = arith.constant 9 : index
      %c0_65 = arith.constant 0 : index
      %c0_66 = arith.constant 0 : index
      %115 = vector.load %arg11[%c9, %c0_65, %c0_66] : memref<10x32x8xbf16, #tpu.memory_space<vmem>>, vector<1x32x8xbf16>
      tpu.vector_store %arg11[%c9, %c0_65, %c0_66], %114 {strides = array<i32>} : memref<10x32x8xbf16, #tpu.memory_space<vmem>>, vector<1x32x8xbf16>,
    } else {
    }
    %c0_45 = arith.constant 0 : index
    %c0_46 = arith.constant 0 : index
    %c0_47 = arith.constant 0 : index
    %73 = vector.load %arg11[%c0_45, %c0_46, %c0_47] : memref<10x32x8xbf16, #tpu.memory_space<vmem>>, vector<10x32x8xbf16>
    %74 = vector.shape_cast %73 : vector<10x32x8xbf16> to vector<320x8xbf16>
    %c0_48 = arith.constant 0 : index
    %c0_49 = arith.constant 0 : index
    %75 = vector.load %arg7[%c0_48, %c0_49] : memref<8x72xbf16, #tpu.memory_space<vmem>>, vector<8x72xbf16>
    %cst_50 = arith.constant dense<0.000000e+00> : vector<320x72xf32>
    %76 = tpu.matmul %74, %75, %cst_50 {dimension_numbers = #tpu.dot_dimension_numbers<[1], [0], [0], [1], [0, 0, 1, 1], [], []>} : vector<320x8xbf16>, vector<8x72xbf16>, vector<320x72xf32> -> vector<320x72xf32>
    %77 = vector.extract_strided_slice %76 {offsets = [0, 0], sizes = [320, 24], strides = [1, 1]} : vector<320x72xf32> to vector<320x24xf32>
    %c9_i32_51 = arith.constant 9 : i32
    %78 = tpu.dynamic_rotate %77 by %c9_i32_51 dim 0 : vector<320x24xf32>, i32 -> vector<320x24xf32>
    %79 = vector.shape_cast %78 : vector<320x24xf32> to vector<10x32x24xf32>
    %80 = vector.extract_strided_slice %79 {offsets = [0, 8, 0], sizes = [8, 16, 8], strides = [1, 1, 1]} : vector<10x32x24xf32> to vector<8x16x8xf32>
    %81 = vector.extract_strided_slice %79 {offsets = [1, 8, 8], sizes = [8, 16, 8], strides = [1, 1, 1]} : vector<10x32x24xf32> to vector<8x16x8xf32>
    %82 = arith.addf %80, %81 : vector<8x16x8xf32>
    %83 = vector.extract_strided_slice %79 {offsets = [2, 8, 16], sizes = [8, 16, 8], strides = [1, 1, 1]} : vector<10x32x24xf32> to vector<8x16x8xf32>
    %84 = arith.addf %82, %83 : vector<8x16x8xf32>
    %85 = vector.extract_strided_slice %76 {offsets = [0, 24], sizes = [320, 24], strides = [1, 1]} : vector<320x72xf32> to vector<320x24xf32>
    %c8_i32_52 = arith.constant 8 : i32
    %86 = tpu.dynamic_rotate %85 by %c8_i32_52 dim 0 : vector<320x24xf32>, i32 -> vector<320x24xf32>
    %87 = vector.shape_cast %86 : vector<320x24xf32> to vector<10x32x24xf32>
    %88 = vector.extract_strided_slice %87 {offsets = [0, 8, 0], sizes = [8, 16, 8], strides = [1, 1, 1]} : vector<10x32x24xf32> to vector<8x16x8xf32>
    %89 = arith.addf %84, %88 : vector<8x16x8xf32>
    %90 = vector.extract_strided_slice %87 {offsets = [1, 8, 8], sizes = [8, 16, 8], strides = [1, 1, 1]} : vector<10x32x24xf32> to vector<8x16x8xf32>
    %91 = arith.addf %89, %90 : vector<8x16x8xf32>
    %92 = vector.extract_strided_slice %87 {offsets = [2, 8, 16], sizes = [8, 16, 8], strides = [1, 1, 1]} : vector<10x32x24xf32> to vector<8x16x8xf32>
    %93 = arith.addf %91, %92 : vector<8x16x8xf32>
    %94 = vector.extract_strided_slice %76 {offsets = [0, 48], sizes = [320, 24], strides = [1, 1]} : vector<320x72xf32> to vector<320x24xf32>
    %c7_i32_53 = arith.constant 7 : i32
    %95 = tpu.dynamic_rotate %94 by %c7_i32_53 dim 0 : vector<320x24xf32>, i32 -> vector<320x24xf32>
    %96 = vector.shape_cast %95 : vector<320x24xf32> to vector<10x32x24xf32>
    %97 = vector.extract_strided_slice %96 {offsets = [0, 8, 0], sizes = [8, 16, 8], strides = [1, 1, 1]} : vector<10x32x24xf32> to vector<8x16x8xf32>
    %98 = arith.addf %93, %97 : vector<8x16x8xf32>
    %99 = vector.extract_strided_slice %96 {offsets = [1, 8, 8], sizes = [8, 16, 8], strides = [1, 1, 1]} : vector<10x32x24xf32> to vector<8x16x8xf32>
    %100 = arith.addf %98, %99 : vector<8x16x8xf32>
    %101 = vector.extract_strided_slice %96 {offsets = [2, 8, 16], sizes = [8, 16, 8], strides = [1, 1, 1]} : vector<10x32x24xf32> to vector<8x16x8xf32>
    %102 = arith.addf %100, %101 : vector<8x16x8xf32>
    %c0_54 = arith.constant 0 : index
    %c0_55 = arith.constant 0 : index
    %103 = vector.load %arg8[%c0_54, %c0_55] : memref<1x8xf32, #tpu.memory_space<vmem>>, vector<1x8xf32>
    %104 = vector.shape_cast %103 : vector<1x8xf32> to vector<8xf32>
    %105 = vector.shape_cast %104 : vector<8xf32> to vector<1x1x8xf32>
    %106 = vector.broadcast %105 : vector<1x1x8xf32> to vector<8x16x8xf32>
    %107 = arith.addf %102, %106 : vector<8x16x8xf32>
    %c0_56 = arith.constant 0 : index
    %c0_57 = arith.constant 0 : index
    %c0_58 = arith.constant 0 : index
    %c0_59 = arith.constant 0 : index
    %108 = vector.load %arg2[%c0_56, %c0_57, %c0_58, %c0_59] : memref<1x8x16x8xf32, #tpu.memory_space<vmem>>, vector<1x8x16x8xf32>
    %109 = vector.shape_cast %108 : vector<1x8x16x8xf32> to vector<8x16x8xf32>
    %110 = arith.addf %107, %109 : vector<8x16x8xf32>
    %c0_60 = arith.constant 0 : index
    %c0_61 = arith.constant 0 : index
    %c0_62 = arith.constant 0 : index
    %c0_63 = arith.constant 0 : index
    %111 = vector.load %arg9[%c0_60, %c0_61, %c0_62, %c0_63] : memref<1x8x16x8xf32, #tpu.memory_space<vmem>>, vector<1x8x16x8xf32>
    %112 = vector.shape_cast %111 : vector<1x8x16x8xf32> to vector<8x16x8xf32>
    %113 = vector.shape_cast %110 : vector<8x16x8xf32> to vector<1x8x16x8xf32>
    tpu.vector_store %arg9[%c0_60, %c0_61, %c0_62, %c0_63], %113 {strides = array<i32>} : memref<1x8x16x8xf32, #tpu.memory_space<vmem>>, vector<1x8x16x8xf32>,
    return
  }
  func.func @transform_0(%arg0: i32, %arg1: i32) -> (i32, i32, i32, i32) {
    %c0_i32 = arith.constant 0 : i32
    %c0_i32_0 = arith.constant 0 : i32
    %c0_i32_1 = arith.constant 0 : i32
    return %arg0, %arg1, %c0_i32, %c0_i32_0 : i32, i32, i32, i32
  }
  func.func @transform_1(%arg0: i32, %arg1: i32) -> (i32, i32, i32, i32) {
    %c4_i32 = arith.constant 4 : i32
    %0 = arith.muli %arg1, %c4_i32 : i32
    %c1_i32 = arith.constant 1 : i32
    %1 = arith.subi %0, %c1_i32 : i32
    %c0_i32 = arith.constant 0 : i32
    %2 = arith.maxsi %1, %c0_i32 : i32
    %c0_i32_0 = arith.constant 0 : i32
    %c0_i32_1 = arith.constant 0 : i32
    %c0_i32_2 = arith.constant 0 : i32
    return %arg0, %2, %c0_i32_0, %c0_i32_1 : i32, i32, i32, i32
  }
  func.func @transform_2(%arg0: i32, %arg1: i32) -> (i32, i32, i32, i32) {
    %c4_i32 = arith.constant 4 : i32
    %0 = arith.muli %arg1, %c4_i32 : i32
    %c4_i32_0 = arith.constant 4 : i32
    %1 = arith.addi %0, %c4_i32_0 : i32
    %c7_i32 = arith.constant 7 : i32
    %2 = arith.minsi %1, %c7_i32 : i32
    %c0_i32 = arith.constant 0 : i32
    %c0_i32_1 = arith.constant 0 : i32
    %c0_i32_2 = arith.constant 0 : i32
    return %arg0, %2, %c0_i32, %c0_i32_1 : i32, i32, i32, i32
  }
  func.func @transform_3(%arg0: i32, %arg1: i32) -> (i32, i32) {
    %c0_i32 = arith.constant 0 : i32
    %c0_i32_0 = arith.constant 0 : i32
    %c0_i32_1 = arith.constant 0 : i32
    return %c0_i32, %c0_i32_0 : i32, i32
  }
  func.func @transform_4(%arg0: i32, %arg1: i32) -> (i32, i32) {
    %c0_i32 = arith.constant 0 : i32
    %c0_i32_0 = arith.constant 0 : i32
    %c0_i32_1 = arith.constant 0 : i32
    return %c0_i32, %c0_i32_0 : i32, i32
  }
  func.func @transform_5(%arg0: i32, %arg1: i32) -> (i32, i32) {
    %c0_i32 = arith.constant 0 : i32
    %c0_i32_0 = arith.constant 0 : i32
    %c0_i32_1 = arith.constant 0 : i32
    return %c0_i32, %c0_i32_0 : i32, i32
  }
  func.func @transform_6(%arg0: i32, %arg1: i32) -> (i32, i32) {
    %c0_i32 = arith.constant 0 : i32
    %c0_i32_0 = arith.constant 0 : i32
    %c0_i32_1 = arith.constant 0 : i32
    return %c0_i32, %c0_i32_0 : i32, i32
  }
  func.func @transform_7(%arg0: i32, %arg1: i32) -> (i32, i32, i32, i32) {
    %c0_i32 = arith.constant 0 : i32
    %c0_i32_0 = arith.constant 0 : i32
    %c0_i32_1 = arith.constant 0 : i32
    return %arg0, %arg1, %c0_i32, %c0_i32_0 : i32, i32, i32, i32
  }
}

</mosaic_0001>

<bundles_post_ra>
// kernel: residual_conv_unit.1
= control target key start
LH: loop header
LB: loop body
LE: loop exit
PB: predicated region body
PF: predicated region fallthrough
CT: control target
= control target key end

     0   :  { %s3451_s24 = smov 0   ;;  %s3453_s25 = smov 0   ;;  %s5289_s0 = inlined_call_operand.vmem [shape: f32[2,16,16,8], index: 0, kind: input, shape index: {}, may-alias: {0,1,2}]   ;;  %s5290_s1 = inlined_call_operand.vmem [shape: f32[2,16,16,8], index: 1, kind: input, shape index: {}, may-alias: {0,1,2}]   ;;  %s5291_s2 = inlined_call_operand.vmem [shape: f32[2,16,16,8], index: 2, kind: input, shape index: {}, may-alias: {0,1,2}]   ;;  %s5292_s3 = inlined_call_operand.vmem [shape: bf16[8,72], index: 3, kind: input, shape index: {}]   ;;  %s5293_s4 = inlined_call_operand.vmem [shape: f32[1,8], index: 4, kind: input, shape index: {}]   ;;  %s5294_s5 = inlined_call_operand.vmem [shape: bf16[8,72], index: 5, kind: input, shape index: {}]   ;;  %s5295_s6 = inlined_call_operand.vmem [shape: f32[1,8], index: 6, kind: input, shape index: {}]   ;;  %s5296_s7 = inlined_call_operand.vmem [shape: f32[2,16,16,8], index: 7, kind: output, shape index: {}]  }
   0x1   :  { %s3455_s26 = smov 0   ;;  %s3457_s27 = smov 0  }
   0x2   :  { %s3459_s28 = smov 0  }
   0x3 LB: > { %s26_s29 = sadd.s32 1, %s3394_s26  ;;  %s29_s30 = sadd.s32 1, %s3398_s27  ;;  %s3402_s28 = sphi %s3459_s28, %s17_s28   ;;  %s3398_s27 = sphi %s3457_s27, %s5507_s27   ;;  %s3394_s26 = sphi %s3455_s26, %s5506_s26   ;;  %s3390_s25 = sphi %s3453_s25, %s5505_s25   ;;  %s3386_s24 = sphi %s3451_s24, %s5504_s24  }
   0x4   : > { %p27_p0 = scmp.ge.s32.totalorder %s26_s29, 2  ;;  %p3104_p1 = scmp.ge.s32.totalorder %s3402_s28, 1 }
   0x5   : > { %p327_p2 = scmp.lt.s32.totalorder %s3402_s28, 5 }
   0x6   : > { %s5509_s29 = smov (%p27_p0, %s26_s29), 0  ;;  %s5511_s30 = smov (!%p27_p0, %s29_s30), %s3398_s27 }
   0x7   : > { %p328_p3 = pnand %p3104_p1, %p327_p2  ;;  %p31_p4 = scmp.ge.s32.totalorder %s5511_s30, 2 }
   0x9   : > { %s5513_s30 = smov (%p31_p4, %s5511_s30), 0  ;;  %331 = sbr.rel (%p328_p3) target bundleno = 1383 (0x567), region = 48 }
  0x10   : > { %v585_v0 = vld [vmem:[%s5292_s3] sm:$0xf]  ;;  %vm658_vm0 = vcmask 1043456   ;;  %s3105_s10 = sshll.u32 %s3386_s24, 3  ;;  %p398_p5 = scmp.lt.s32.totalorder %s3390_s25, 1  ;;  %vm458_vm1 = vcmask 64512  }
  0x11   : > { %3314 = vmatprep.subr.msk.bf16.mxu0 %vm658_vm0, %v585_v0  ;;  %3315 = vmatprep.subr.msk.bf16.mxu1 %vm658_vm0, %v585_v0  ;;  %v660_v1 = vsel %vm658_vm0, %v585_v0, 0  ;;  %p3492_p6 = scmp.lt.s32.totalorder %s3105_s10, 15  ;;  %s3109_s12 = sshll.u32 %s3386_s24, 2  ;;  %v3404_v2 = vmov 0  }
  0x12   : > { %3221 = vmatpush3.bf16.msra.mxu0 %v660_v1  ;;  %3313 = vmatpush3.bf16.msra.mxu1 %v660_v1  ;;  %s5515_s25 = smov (!%p398_p5, %s3390_s25), 1  ;;  %459 = vst.msk [vmem:[#allocation2 + $0x8] sm:$0xff] %vm458_vm1, %v3404_v2  ;;  %1844 = vst.msk [vmem:[#allocation3 + $0x8] sm:$0xff] %vm458_vm1, %v3404_v2  ;;  %s3110_s14 = sadd.s32 4294967295, %s3109_s12 }
  0x13   : > { %1845 = vst.msk [vmem:[#allocation3 + $0x18] sm:$0xff] %vm458_vm1, %v3404_v2  ;;  %1846 = vst.msk [vmem:[#allocation3 + $0x28] sm:$0xff] %vm458_vm1, %v3404_v2  ;;  %s5517_s10 = smov (!%p3492_p6, %s3105_s10), 15  ;;  %s3523_s13 = sshll.u32 %s5515_s25, 5 }
  0x14   : > { %1847 = vst.msk [vmem:[#allocation3 + $0x38] sm:$0xff] %vm458_vm1, %v3404_v2  ;;  %1848 = vst.msk [vmem:[#allocation3 + $0x48] sm:$0xff] %vm458_vm1, %v3404_v2  ;;  %s3106_s15 = sshll.u32 %s5517_s10, 1  ;;  %p410_p7 = scmp.gt.s32.totalorder %s3110_s14, 0 }
  0x15   : > { %1849 = vst.msk [vmem:[#allocation3 + $0x58] sm:$0xff] %vm458_vm1, %v3404_v2  ;;  %1850 = vst.msk [vmem:[#allocation3 + $0x68] sm:$0xff] %vm458_vm1, %v3404_v2  ;;  %s404_s16 = sadd.s32 %s3523_s13, %s3106_s15  ;;  %p471_p8 = scmp.gt.s32.totalorder %s3386_s24, 0 }
  0x16   : > { %1851 = vst.msk [vmem:[#allocation3 + $0x78] sm:$0xff] %vm458_vm1, %v3404_v2  ;;  %1852 = vst.msk [vmem:[#allocation3 + $0x88] sm:$0xff] %vm458_vm1, %v3404_v2  ;;  %s3108_s17 = sshll.u32 %s404_s16, 3  ;;  %s428_s18 = sadd.s32 4, %s3109_s12 }
  0x17   : > { %1853 = vst.msk [vmem:[#allocation3 + $0x98] sm:$0xff] %vm458_vm1, %v3404_v2  ;;  %460 = vst.msk [vmem:[#allocation2 + $0x18] sm:$0xff] %vm458_vm1, %v3404_v2  ;;  %s3534_s21 = scalar_lea.vmem %s5289_s0, %s3108_s17  ;;  %s3539_s25 = scalar_lea.vmem %s5296_s7, %s3108_s17 }
  0x18   : > { %461 = vst.msk [vmem:[#allocation2 + $0x28] sm:$0xff] %vm458_vm1, %v3404_v2  ;;  %462 = vst.msk [vmem:[#allocation2 + $0x38] sm:$0xff] %vm458_vm1, %v3404_v2  ;;  %s5519_s14 = smov (!%p410_p7, %s3110_s14), 0  ;;  %v509_v3 = vld [vmem:[%s3534_s21] sm:$0xff]  ;;  %v510_v4 = vld [vmem:[%s3534_s21 + $0x8] sm:$0xff]  ;;  %p429_p9 = scmp.lt.s32.totalorder %s428_s18, 7 }
  0x19   : > { %463 = vst.msk [vmem:[#allocation2 + $0x48] sm:$0xff] %vm458_vm1, %v3404_v2  ;;  %464 = vst.msk [vmem:[#allocation2 + $0x58] sm:$0xff] %vm458_vm1, %v3404_v2  ;;  %s3541_s8 = scalar_select %p471_p8, 1, 0  ;;  %v525_v5 = vmax.f32 %v509_v3, 0.0  ;;  %v526_v6 = vmax.f32 %v510_v4, 0.0 }
  0x1a   : > { %465 = vst.msk [vmem:[#allocation2 + $0x68] sm:$0xff] %vm458_vm1, %v3404_v2  ;;  %466 = vst.msk [vmem:[#allocation2 + $0x78] sm:$0xff] %vm458_vm1, %v3404_v2  ;;  %s3111_s9 = sshll.u32 %s5519_s14, 1  ;;  %v511_v7 = vld [vmem:[%s3534_s21 + $0x10] sm:$0xff]  ;;  %v512_v8 = vld [vmem:[%s3534_s21 + $0x18] sm:$0xff]  ;;  %s5521_s18 = smov (!%p429_p9, %s428_s18), 7 }
  0x1b   : > { %467 = vst.msk [vmem:[#allocation2 + $0x88] sm:$0xff] %vm458_vm1, %v3404_v2  ;;  %468 = vst.msk [vmem:[#allocation2 + $0x98] sm:$0xff] %vm458_vm1, %v3404_v2  ;;  %p415_p10 = scmp.lt.s32.totalorder %s3111_s9, 15  ;;  %v527_v9 = vmax.f32 %v511_v7, 0.0  ;;  %v528_v10 = vmax.f32 %v512_v8, 0.0  ;;  %v513_v11 = vld [vmem:[%s3534_s21 + $0x20] sm:$0xff]  ;;  %v541_v12 = vpack.c.bf16 %v526_v6, %v525_v5  ;;  %v481_v29 = vstv %s3541_s8 }
  0x1c   : > { %469 = vst.msk [vmem:[#allocation2 + $0xa8] sm:$0xff] %vm458_vm1, %v3404_v2  ;;  %470 = vst.msk [vmem:[#allocation2 + $0xb8] sm:$0xff] %vm458_vm1, %v3404_v2  ;;  %v514_v13 = vld [vmem:[%s3534_s21 + $0x28] sm:$0xff]  ;;  %v529_v14 = vmax.f32 %v513_v11, 0.0  ;;  %v515_v15 = vld [vmem:[%s3534_s21 + $0x30] sm:$0xff]  ;;  %s3116_s10 = sshll.u32 %s5521_s18, 1 }
  0x1d   : > { %s5523_s9 = smov (!%p415_p10, %s3111_s9), 15  ;;  %v542_v16 = vpack.c.bf16 %v528_v10, %v527_v9  ;;  %v530_v17 = vmax.f32 %v514_v13, 0.0  ;;  %v516_v18 = vld [vmem:[%s3534_s21 + $0x38] sm:$0xff]  ;;  %v531_v19 = vmax.f32 %v515_v15, 0.0  ;;  %v517_v20 = vld [vmem:[%s3534_s21 + $0x40] sm:$0xff]  ;;  %550 = vst.msk [vmem:[#allocation2 + $0x20] sm:$0xff] %vm458_vm1, %v541_v12 }
  0x1e   : > { %v532_v21 = vmax.f32 %v516_v18, 0.0  ;;  %v518_v22 = vld [vmem:[%s3534_s21 + $0x48] sm:$0xff]  ;;  %v533_v23 = vmax.f32 %v517_v20, 0.0  ;;  %v519_v24 = vld [vmem:[%s3534_s21 + $0x50] sm:$0xff]  ;;  %s3112_s11 = sshll.u32 %s5523_s9, 1  ;;  %p3560_p11 = scmp.lt.s32.totalorder %s3116_s10, 15 }
  0x1f   : > { %551 = vst.msk [vmem:[#allocation2 + $0x30] sm:$0xff] %vm458_vm1, %v542_v16  ;;  %v543_v25 = vpack.c.bf16 %v530_v17, %v529_v14  ;;  %v534_v26 = vmax.f32 %v518_v22, 0.0  ;;  %v520_v27 = vld [vmem:[%s3534_s21 + $0x58] sm:$0xff]  ;;  %v535_v28 = vmax.f32 %v519_v24, 0.0  ;;  %s419_s14 = sadd.s32 %s3112_s11, %s3523_s13  ;;  %p489_p12 = scmp.lt.s32.totalorder %s3386_s24, 1  ;;  %v521_v32 = vld [vmem:[%s3534_s21 + $0x60] sm:$0xff] }
  0x20   : > { %v544_v30 = vpack.c.bf16 %v532_v21, %v531_v19  ;;  %v536_v31 = vmax.f32 %v520_v27, 0.0  ;;  %v522_v33 = vld [vmem:[%s3534_s21 + $0x68] sm:$0xff]  ;;  %s3114_s15 = sshll.u32 %s419_s14, 3  ;;  %v537_v35 = vmax.f32 %v521_v32, 0.0  ;;  %v523_v37 = vld [vmem:[%s3534_s21 + $0x70] sm:$0xff]  ;;  %v524_v38 = vld [vmem:[%s3534_s21 + $0x78] sm:$0xff] }
  0x21   : > { %552 = vst.msk [vmem:[#allocation2 + $0x40] sm:$0xff] %vm458_vm1, %v543_v25  ;;  %v545_v34 = vpack.c.bf16 %v534_v26, %v533_v23  ;;  %v538_v36 = vmax.f32 %v522_v33, 0.0  ;;  %s421_s19 = scalar_lea.vmem %s5290_s1, %s3114_s15  ;;  %v539_v40 = vmax.f32 %v523_v37, 0.0  ;;  %v540_v41 = vmax.f32 %v524_v38, 0.0  ;;  %s5525_s10 = smov (!%p3560_p11, %s3116_s10), 15  ;;  %v562_v10 = vld [vmem:[#allocation2 + $0x8] sm:$0xff] }
  0x22   : > { %553 = vst.msk [vmem:[#allocation2 + $0x50] sm:$0xff] %vm458_vm1, %v544_v30  ;;  %v546_v39 = vpack.c.bf16 %v536_v31, %v535_v28  ;;  %v472_v42 = vld [vmem:[%s421_s19] sm:$0xff]  ;;  %v473_v43 = vld [vmem:[%s421_s19 + $0x8] sm:$0xff]  ;;  %vm3578_vm2 = vcmp.eq.s32.totalorder %v481_v29, 1  ;;  %v474_v45 = vld [vmem:[%s421_s19 + $0x10] sm:$0xff]  ;;  %s3117_s22 = sshll.u32 %s5525_s10, 1 }
  0x23   : > { %554 = vst.msk [vmem:[#allocation2 + $0x60] sm:$0xff] %vm458_vm1, %v545_v34  ;;  %v547_v46 = vpack.c.bf16 %v538_v36, %v537_v35  ;;  %v476_v47 = vmax.f32 %v472_v42, 0.0  ;;  %v477_v48 = vmax.f32 %v473_v43, 0.0  ;;  %s498_s20 = scalar_select %p489_p12, 1, 0  ;;  %v475_v49 = vld [vmem:[%s421_s19 + $0x18] sm:$0xff]  ;;  %v548_v51 = vpack.c.bf16 %v540_v41, %v539_v40 }
  0x24   : > { %v478_v50 = vmax.f32 %v474_v45, 0.0  ;;  %555 = vst.msk [vmem:[#allocation2 + $0x70] sm:$0xff] %vm458_vm1, %v546_v39  ;;  %v479_v52 = vmax.f32 %v475_v49, 0.0  ;;  %s438_s18 = sadd.s32 %s3117_s22, %s3523_s13  ;;  %v584_v13 = vld [vmem:[#allocation2 + $0xb8] sm:$0xff]  ;;  %v565_v16 = vld [vmem:[#allocation2 + $0x20] sm:$0xff]  ;;  %v566_v17 = vld [vmem:[#allocation2 + $0x28] sm:$0xff]  ;;  %v923_v34 = vlaneseq }
  0x25   : > { %556 = vst.msk [vmem:[#allocation2 + $0x80] sm:$0xff] %vm458_vm1, %v547_v46  ;;  %v483_v53 = vsel %vm3578_vm2, %v476_v47, 0.0  ;;  %v484_v54 = vsel %vm3578_vm2, %v477_v48, 0.0  ;;  %v499_v55 = vstv %s498_s20  ;;  %557 = vst.msk [vmem:[#allocation2 + $0x90] sm:$0xff] %vm458_vm1, %v548_v51  ;;  %s3119_s23 = sshll.u32 %s438_s18, 3  ;;  %v564_v15 = vld [vmem:[#allocation2 + $0x18] sm:$0xff] }
  0x26   : > { %v485_v56 = vsel %vm3578_vm2, %v478_v50, 0.0  ;;  %v487_v57 = vpack.c.bf16 %v484_v54, %v483_v53  ;;  %v486_v58 = vsel %vm3578_vm2, %v479_v52, 0.0  ;;  %s440_s10 = scalar_lea.vmem %s5291_s2, %s3119_s23  ;;  %vm500_vm3 = vcmp.eq.s32.totalorder %v499_v55, 1  ;;  %v567_v18 = vld [vmem:[#allocation2 + $0x30] sm:$0xff]  ;;  %v568_v19 = vld [vmem:[#allocation2 + $0x38] sm:$0xff]  ;;  %v570_v21 = vld [vmem:[#allocation2 + $0x48] sm:$0xff] }
  0x27   : > { %v488_v59 = vpack.c.bf16 %v486_v58, %v485_v56  ;;  %v492_v60 = vld [vmem:[%s440_s10 + $0x10] sm:$0xff]  ;;  %v493_v61 = vld [vmem:[%s440_s10 + $0x18] sm:$0xff]  ;;  %v490_v0 = vld [vmem:[%s440_s10] sm:$0xff]  ;;  %v3632_v35 = vshrl.u32 %v923_v34, 7  ;;  %s3405_s13 = smov 80   ;;  %s3406_s11 = smov 104  }
  0x28   : > { %507 = vst.msk [vmem:[#allocation2] sm:$0xff] %vm458_vm1, %v487_v57  ;;  %v496_v62 = vmax.f32 %v492_v60, 0.0  ;;  %v497_v63 = vmax.f32 %v493_v61, 0.0  ;;  %v491_v1 = vld [vmem:[%s440_s10 + $0x8] sm:$0xff]  ;;  %v494_v2 = vmax.f32 %v490_v0, 0.0  ;;  %v569_v20 = vld [vmem:[#allocation2 + $0x40] sm:$0xff] }
  0x29   : > { %508 = vst.msk [vmem:[#allocation2 + $0x10] sm:$0xff] %vm458_vm1, %v488_v59  ;;  %v495_v3 = vmax.f32 %v491_v1, 0.0  ;;  %v571_v22 = vld [vmem:[#allocation2 + $0x50] sm:$0xff]  ;;  %v572_v23 = vld [vmem:[#allocation2 + $0x58] sm:$0xff]  ;;  %v574_v25 = vld [vmem:[#allocation2 + $0x68] sm:$0xff]  ;;  %vm925_vm4 = vcmp.lt.s32.totalorder %v3632_v35, 1 }
  0x2a   : > { %v503_v4 = vsel %vm500_vm3, %v496_v62, 0.0  ;;  %v504_v5 = vsel %vm500_vm3, %v497_v63, 0.0  ;;  %v501_v7 = vsel %vm500_vm3, %v494_v2, 0.0  ;;  %v573_v24 = vld [vmem:[#allocation2 + $0x60] sm:$0xff]  ;;  %v576_v27 = vld [vmem:[#allocation2 + $0x78] sm:$0xff]  ;;  %v578_v29 = vld [vmem:[#allocation2 + $0x88] sm:$0xff] }
  0x2b   : > { %v506_v6 = vpack.c.bf16 %v504_v5, %v503_v4  ;;  %v502_v8 = vsel %vm500_vm3, %v495_v3, 0.0  ;;  %v575_v26 = vld [vmem:[#allocation2 + $0x70] sm:$0xff]  ;;  %v580_v31 = vld [vmem:[#allocation2 + $0x98] sm:$0xff]  ;;  %v582_v33 = vld [vmem:[#allocation2 + $0xa8] sm:$0xff]  ;;  %s3407_s12 = smov 112   ;;  %s3408_s14 = smov 120  }
  0x2c   : > { %v505_v9 = vpack.c.bf16 %v502_v8, %v501_v7  ;;  %v577_v28 = vld [vmem:[#allocation2 + $0x80] sm:$0xff]  ;;  %v579_v30 = vld [vmem:[#allocation2 + $0x90] sm:$0xff]  ;;  %vm1560_vm5 = vcmp.lt.s32.totalorder %v3632_v35, 7  ;;  %p3149_p13 = scmp.ne.s32.totalorder %s3386_s24, 0 }
  0x2d   : > { %560 = vst.msk [vmem:[#allocation2 + $0xb0] sm:$0xff] %vm458_vm1, %v506_v6 }
  0x2e   : > { %559 = vst.msk [vmem:[#allocation2 + $0xa0] sm:$0xff] %vm458_vm1, %v505_v9 }
  0x2f   : > { %v561_v11 = vld [vmem:[#allocation2] sm:$0xff] }
  0x30   : > { %3222 = vmatprep.mubr.msk.bf16.mxu0 %vm458_vm1, %v561_v11  ;;  %v563_v12 = vld [vmem:[#allocation2 + $0x10] sm:$0xff] }
  0x31   : > { %3223 = vmatmul.mubr.msk.bf16.vlgmr.msra.gmra.mrb[0].mxu0 %vm458_vm1, %v562_v10 }
  0x32   : > { %3226 = vmatprep.mubr.msk.bf16.mxu0 %vm458_vm1, %v563_v12 }
  0x34   : > { %v583_v14 = vld [vmem:[#allocation2 + $0xb0] sm:$0xff] }
  0x35   : > { %3266 = vmatprep.mubr.msk.bf16.mxu1 %vm458_vm1, %v583_v14  ;;  %v581_v32 = vld [vmem:[#allocation2 + $0xa0] sm:$0xff] }
  0x36   : > { %3267 = vmatmul.mubr.msk.bf16.vlgmr.msra.gmra.mrb[0].mxu1 %vm458_vm1, %v584_v13 }
  0x39   : > { %3227 = vmatmul.mubr.msk.bf16.gmra.mrb[4].mxu0 %vm458_vm1, %v564_v15 }
  0x3a   : > { %3230 = vmatprep.mubr.msk.bf16.mxu0 %vm458_vm1, %v565_v16 }
  0x41   : > { %3231 = vmatmul.mubr.msk.bf16.gmra.mrb[8].mxu0 %vm458_vm1, %v566_v17 }
  0x42   : > { %3234 = vmatprep.mubr.msk.bf16.mxu0 %vm458_vm1, %v567_v18 }
  0x49   : > { %3235 = vmatmul.mubr.msk.bf16.gmra.mrb[12].mxu0 %vm458_vm1, %v568_v19 }
  0x4a   : > { %3238 = vmatprep.mubr.msk.bf16.mxu0 %vm458_vm1, %v569_v20 }
  0x51   : > { %3239 = vmatmul.mubr.msk.bf16.gmra.mrb[16].mxu0 %vm458_vm1, %v570_v21 }
  0x52   : > { %3242 = vmatprep.mubr.msk.bf16.mxu0 %vm458_vm1, %v571_v22 }
  0x59   : > { %3243 = vmatmul.mubr.msk.bf16.gmra.mrb[20].mxu0 %vm458_vm1, %v572_v23 }
  0x5a   : > { %3246 = vmatprep.mubr.msk.bf16.mxu0 %vm458_vm1, %v573_v24 }
  0x61   : > { %3247 = vmatmul.mubr.msk.bf16.gmra.mrb[24].mxu0 %vm458_vm1, %v574_v25 }
  0x62   : > { %3250 = vmatprep.mubr.msk.bf16.mxu0 %vm458_vm1, %v575_v26 }
  0x69   : > { %3251 = vmatmul.mubr.msk.bf16.gmra.mrb[28].mxu0 %vm458_vm1, %v576_v27 }
  0x6a   : > { %3254 = vmatprep.mubr.msk.bf16.mxu0 %vm458_vm1, %v577_v28 }
  0x71   : > { %3255 = vmatmul.mubr.msk.bf16.gmra.mrb[32].mxu0 %vm458_vm1, %v578_v29 }
  0x72   : > { %3258 = vmatprep.mubr.msk.bf16.mxu0 %vm458_vm1, %v579_v30 }
  0x79   : > { %3259 = vmatmul.mubr.msk.bf16.gmra.mrb[36].mxu0 %vm458_vm1, %v580_v31 }
  0x7a   : > { %3262 = vmatprep.mubr.msk.bf16.mxu0 %vm458_vm1, %v581_v32 }
  0x81   : > { %3263 = vmatmul.mubr.msk.bf16.gmra.mrb[40].mxu0 %vm458_vm1, %v582_v33 }
 0x104   : > { %v3224_v36 = vpop.f32.mrb[0].mxu0 }
 0x105   : > { %1420 = vrot.lane.b32.xlu0 %v3224_v36, %s3405_s13  ;;  %v696_v37 = vpop.f32.mrb[1].mxu0 }
 0x106   : > { %v3225_v38 = vpop.f32.mrb[2].mxu0  ;;  %v887_v40 = vrot.slane %v696_v37, 7 }
 0x107   : > { %v699_v39 = vpop.f32.mrb[3].mxu0  ;;  %v889_v50 = vrot.slane %v3225_v38, 7 }
 0x108   : > { %v888_v41 = vrot.slane %v699_v39, 7 }
 0x109   : > { %1156 = vrot.lane.b32.xlu0 %v696_v37, %s3406_s11  ;;  %v3268_v42 = vpop.f32.mrb[0].mxu1 }
 0x10a   : > { %v3639_v43 = vsel %vm925_vm4, %v887_v40, %v888_v41  ;;  %1486 = vrot.lane.b32.xlu1 %v3268_v42, %s3405_s13  ;;  %v3642_v44 = vpop.f32.mrb[1].mxu1 }
 0x10b   : > { %v3269_v45 = vpop.f32.mrb[2].mxu1  ;;  %v5297_v4 = vrot.slane %v3642_v44, 7 }
 0x10c   : > { %v3228_v46 = vpop.f32.mrb[4].mxu0  ;;  %v922_v47 = vrot.slane %v3269_v45, 7  ;;  %v875_v48 = vpop.f32.mrb[3].mxu1 }
 0x10d   : > { %1200 = vrot.lane.b32.xlu0 %v3642_v44, %s3406_s11  ;;  %v712_v49 = vpop.f32.mrb[5].mxu0  ;;  %v921_v2 = vrot.slane %v875_v48, 7 }
 0x10e   : > { %v890_v51 = vrot.slane %v712_v49, 7  ;;  %v3229_v52 = vpop.f32.mrb[6].mxu0  ;;  %1482 = vrot.lane.b32.xlu1 %v3642_v44, %s3405_s13  ;;  %v3650_v54 = vsel %vm925_vm4, %v922_v47, %v887_v40 }
 0x10f   : > { %v715_v53 = vpop.f32.mrb[7].mxu0  ;;  %v892_v58 = vrot.slane %v3229_v52, 7  ;;  %v926_v8 = vsel %vm925_vm4, %v5297_v4, %v921_v2 }
 0x110   : > { %v891_v55 = vrot.slane %v715_v53, 7  ;;  %v3654_v56 = vsel %vm925_vm4, %v889_v50, %v890_v51 }
 0x111   : > { %1416 = vrot.lane.b32.xlu0 %v696_v37, %s3405_s13 }
 0x112   : > { %v3659_v57 = vsel %vm925_vm4, %v890_v51, %v891_v55  ;;  %1158 = vrot.lane.b32.xlu1 %v699_v39, %s3406_s11 }
 0x114   : > { %v3232_v59 = vpop.f32.mrb[8].mxu0 }
 0x115   : > { %1484 = vrot.lane.b32.xlu0 %v875_v48, %s3405_s13  ;;  %v728_v60 = vpop.f32.mrb[9].mxu0 }
 0x116   : > { %v893_v61 = vrot.slane %v728_v60, 7  ;;  %v3233_v62 = vpop.f32.mrb[10].mxu0  ;;  %1202 = vrot.lane.b32.xlu1 %v875_v48, %s3406_s11 }
 0x117   : > { %v731_v63 = vpop.f32.mrb[11].mxu0  ;;  %v895_v5 = vrot.slane %v3233_v62, 7 }
 0x118   : > { %v894_v0 = vrot.slane %v731_v63, 7  ;;  %v3666_v1 = vsel %vm925_vm4, %v892_v58, %v893_v61 }
 0x119   : > { %1160 = vrot.lane.b32.xlu0 %v712_v49, %s3406_s11 }
 0x11a   : > { %v3671_v3 = vsel %vm925_vm4, %v893_v61, %v894_v0  ;;  %1418 = vrot.lane.b32.xlu1 %v699_v39, %s3405_s13 }
 0x11c   : > { %v3675_v6 = vpop.f32.mrb[12].mxu0 }
 0x11d   : > { %1424 = vrot.lane.b32.xlu0 %v715_v53, %s3405_s13  ;;  %v3678_v7 = vpop.f32.mrb[13].mxu0 }
 0x11e   : > { %v896_v9 = vrot.slane %v3678_v7, 7  ;;  %v3237_v10 = vpop.f32.mrb[14].mxu0  ;;  %1090 = vrot.lane.b32.xlu1 %v926_v8, %s3407_s12 }
 0x11f   : > { %v3686_v11 = vpop.f32.mrb[15].mxu0  ;;  %v898_v15 = vrot.slane %v3237_v10, 7 }
 0x120   : > { %v897_v12 = vrot.slane %v3686_v11, 7  ;;  %v3691_v13 = vsel %vm925_vm4, %v895_v5, %v896_v9 }
 0x121   : > { %5349 = vst [vmem:[#allocation4_spill] sm:$0xff] %v3691_v13  ;;  %970 = vrot.lane.b32.xlu0 %v3654_v56, %s3408_s14 }
 0x122   : > { %v3697_v14 = vsel %vm925_vm4, %v896_v9, %v897_v12  ;;  %1426 = vrot.lane.b32.xlu1 %v3228_v46, %s3405_s13 }
 0x123   : > { %5350 = vst [vmem:[#allocation5_spill] sm:$0xff] %v3697_v14 }
 0x124   : > { %v3240_v16 = vpop.f32.mrb[16].mxu0 }
 0x125   : > { %972 = vrot.lane.b32.xlu0 %v3659_v57, %s3408_s14  ;;  %v3702_v17 = vpop.f32.mrb[17].mxu0 }
 0x126   : > { %v899_v18 = vrot.slane %v3702_v17, 7  ;;  %v3241_v19 = vpop.f32.mrb[18].mxu0  ;;  %1422 = vrot.lane.b32.xlu1 %v712_v49, %s3405_s13 }
 0x127   : > { %v3706_v20 = vpop.f32.mrb[19].mxu0  ;;  %v901_v24 = vrot.slane %v3241_v19, 7 }
 0x128   : > { %v900_v21 = vrot.slane %v3706_v20, 7  ;;  %v3711_v22 = vsel %vm925_vm4, %v898_v15, %v899_v18 }
 0x129   : > { %5351 = vst [vmem:[#allocation6_spill] sm:$0xff] %v3711_v22  ;;  %1432 = vrot.lane.b32.xlu0 %v3232_v59, %s3405_s13 }
 0x12a   : > { %v3716_v23 = vsel %vm925_vm4, %v899_v18, %v900_v21  ;;  %1162 = vrot.lane.b32.xlu1 %v715_v53, %s3406_s11 }
 0x12b   : > { %5352 = vst [vmem:[#allocation7_spill] sm:$0xff] %v3716_v23 }
 0x12c   : > { %v3719_v25 = vpop.f32.mrb[20].mxu0 }
 0x12d   : > { %1164 = vrot.lane.b32.xlu0 %v728_v60, %s3406_s11  ;;  %v3722_v26 = vpop.f32.mrb[21].mxu0 }
 0x12e   : > { %v902_v27 = vrot.slane %v3722_v26, 7  ;;  %v3245_v28 = vpop.f32.mrb[22].mxu0  ;;  %1166 = vrot.lane.b32.xlu1 %v731_v63, %s3406_s11 }
 0x12f   : > { %v3726_v29 = vpop.f32.mrb[23].mxu0  ;;  %v904_v33 = vrot.slane %v3245_v28, 7 }
 0x130   : > { %v903_v30 = vrot.slane %v3726_v29, 7  ;;  %v3731_v31 = vsel %vm925_vm4, %v901_v24, %v902_v27 }
 0x131   : > { %5353 = vst [vmem:[#allocation8_spill] sm:$0xff] %v3731_v31  ;;  %1428 = vrot.lane.b32.xlu0 %v728_v60, %s3405_s13 }
 0x132   : > { %v3736_v32 = vsel %vm925_vm4, %v902_v27, %v903_v30  ;;  %1430 = vrot.lane.b32.xlu1 %v731_v63, %s3405_s13 }
 0x133   : > { %5354 = vst [vmem:[#allocation9_spill] sm:$0xff] %v3736_v32 }
 0x134   : > { %v3739_v34 = vpop.f32.mrb[24].mxu0 }
 0x135   : > { %1052 = vrot.lane.b32.xlu0 %v3666_v1, %s3407_s12  ;;  %v3743_v36 = vpop.f32.mrb[25].mxu0 }
 0x136   : > { %v905_v37 = vrot.slane %v3743_v36, 7  ;;  %v3249_v38 = vpop.f32.mrb[26].mxu0  ;;  %974 = vrot.lane.b32.xlu1 %v3666_v1, %s3408_s14 }
 0x137   : > { %v3748_v39 = vpop.f32.mrb[27].mxu0  ;;  %v907_v45 = vrot.slane %v3249_v38, 7 }
 0x138   : > { %v906_v40 = vrot.slane %v3748_v39, 7  ;;  %v3753_v41 = vsel %vm925_vm4, %v904_v33, %v905_v37 }
 0x139   : > { %5355 = vst [vmem:[#allocation10_spill] sm:$0xff] %v3753_v41  ;;  %1168 = vrot.lane.b32.xlu0 %v3678_v7, %s3406_s11 }
 0x13a   : > { %v3759_v42 = vsel %vm925_vm4, %v905_v37, %v906_v40  ;;  %976 = vrot.lane.b32.xlu1 %v3671_v3, %s3408_s14 }
 0x13b   : > { %5356 = vst [vmem:[#allocation11_spill] sm:$0xff] %v3759_v42 }
 0x13c   : > { %v3763_v46 = vpop.f32.mrb[28].mxu0 }
 0x13d   : > { %1436 = vrot.lane.b32.xlu0 %v3686_v11, %s3405_s13  ;;  %v3767_v47 = vpop.f32.mrb[29].mxu0 }
 0x13e   : > { %v908_v48 = vrot.slane %v3767_v47, 7  ;;  %v3253_v49 = vpop.f32.mrb[30].mxu0  ;;  %1054 = vrot.lane.b32.xlu1 %v3671_v3, %s3407_s12 }
 0x13f   : > { %v3772_v50 = vpop.f32.mrb[31].mxu0  ;;  %v910_v55 = vrot.slane %v3253_v49, 7 }
 0x140   : > { %v909_v51 = vrot.slane %v3772_v50, 7  ;;  %v3777_v52 = vsel %vm925_vm4, %v907_v45, %v908_v48 }
 0x141   : > { %5357 = vst [vmem:[#allocation12_spill] sm:$0xff] %v3777_v52  ;;  %978 = vrot.lane.b32.xlu0 %v3691_v13, %s3408_s14 }
 0x142   : > { %v3783_v53 = vsel %vm925_vm4, %v908_v48, %v909_v51  ;;  %1438 = vrot.lane.b32.xlu1 %v3675_v6, %s3405_s13 }
 0x143   : > { %5358 = vst [vmem:[#allocation13_spill] sm:$0xff] %v3783_v53 }
 0x144   : > { %v3787_v58 = vpop.f32.mrb[32].mxu0 }
 0x145   : > { %1056 = vrot.lane.b32.xlu0 %v3691_v13, %s3407_s12  ;;  %v3791_v59 = vpop.f32.mrb[33].mxu0 }
 0x146   : > { %v911_v60 = vrot.slane %v3791_v59, 7  ;;  %v3257_v61 = vpop.f32.mrb[34].mxu0  ;;  %1434 = vrot.lane.b32.xlu1 %v3678_v7, %s3405_s13 }
 0x147   : > { %v3796_v62 = vpop.f32.mrb[35].mxu0  ;;  %v913_v5 = vrot.slane %v3257_v61, 7 }
 0x148   : > { %v912_v63 = vrot.slane %v3796_v62, 7  ;;  %v3801_v0 = vsel %vm925_vm4, %v910_v55, %v911_v60 }
 0x149   : > { %1444 = vrot.lane.b32.xlu0 %v3240_v16, %s3405_s13 }
 0x14a   : > { %v3806_v2 = vsel %vm925_vm4, %v911_v60, %v912_v63  ;;  %1170 = vrot.lane.b32.xlu1 %v3686_v11, %s3406_s11 }
 0x14c   : > { %v3810_v6 = vpop.f32.mrb[36].mxu0 }
 0x14d   : > { %1172 = vrot.lane.b32.xlu0 %v3702_v17, %s3406_s11  ;;  %v3814_v7 = vpop.f32.mrb[37].mxu0 }
 0x14e   : > { %v914_v8 = vrot.slane %v3814_v7, 7  ;;  %v3261_v9 = vpop.f32.mrb[38].mxu0  ;;  %980 = vrot.lane.b32.xlu1 %v3697_v14, %s3408_s14 }
 0x14f   : > { %v3819_v10 = vpop.f32.mrb[39].mxu0  ;;  %v916_v16 = vrot.slane %v3261_v9, 7 }
 0x150   : > { %v915_v12 = vrot.slane %v3819_v10, 7  ;;  %v3824_v11 = vsel %vm925_vm4, %v913_v5, %v914_v8 }
 0x151   : > { %1440 = vrot.lane.b32.xlu0 %v3702_v17, %s3405_s13 }
 0x152   : > { %v3830_v15 = vsel %vm925_vm4, %v914_v8, %v915_v12  ;;  %1058 = vrot.lane.b32.xlu1 %v3697_v14, %s3407_s12 }
 0x154   : > { %v3834_v18 = vpop.f32.mrb[40].mxu0 }
 0x155   : > { %982 = vrot.lane.b32.xlu0 %v3711_v22, %s3408_s14  ;;  %v3838_v19 = vpop.f32.mrb[41].mxu0 }
 0x156   : > { %v917_v21 = vrot.slane %v3838_v19, 7  ;;  %v3841_v24 = vpop.f32.mrb[42].mxu0  ;;  %1174 = vrot.lane.b32.xlu1 %v3706_v20, %s3406_s11 }
 0x157   : > { %v3845_v17 = vpop.f32.mrb[43].mxu0 }
 0x158   : > { %v918_v27 = vrot.slane %v3845_v17, 7  ;;  %v3850_v28 = vsel %vm925_vm4, %v916_v16, %v917_v21 }
 0x159   : > { %1060 = vrot.lane.b32.xlu0 %v3711_v22, %s3407_s12 }
 0x15a   : > { %v3856_v30 = vsel %vm925_vm4, %v917_v21, %v918_v27  ;;  %1442 = vrot.lane.b32.xlu1 %v3706_v20, %s3405_s13 }
 0x15d   : > { %1176 = vrot.lane.b32.xlu0 %v3722_v26, %s3406_s11 }
 0x15e   : > { %984 = vrot.lane.b32.xlu1 %v3716_v23, %s3408_s14 }
 0x161   : > { %1448 = vrot.lane.b32.xlu0 %v3726_v29, %s3405_s13 }
 0x162   : > { %1062 = vrot.lane.b32.xlu1 %v3716_v23, %s3407_s12 }
 0x165   : > { %986 = vrot.lane.b32.xlu0 %v3731_v31, %s3408_s14 }
 0x166   : > { %1450 = vrot.lane.b32.xlu1 %v3719_v25, %s3405_s13 }
 0x169   : > { %1064 = vrot.lane.b32.xlu0 %v3731_v31, %s3407_s12 }
 0x16a   : > { %1446 = vrot.lane.b32.xlu1 %v3722_v26, %s3405_s13 }
 0x16d   : > { %1456 = vrot.lane.b32.xlu0 %v3739_v34, %s3405_s13 }
 0x16e   : > { %1178 = vrot.lane.b32.xlu1 %v3726_v29, %s3406_s11 }
 0x171   : > { %1180 = vrot.lane.b32.xlu0 %v3743_v36, %s3406_s11 }
 0x172   : > { %988 = vrot.lane.b32.xlu1 %v3736_v32, %s3408_s14 }
 0x175   : > { %1452 = vrot.lane.b32.xlu0 %v3743_v36, %s3405_s13 }
 0x176   : > { %1066 = vrot.lane.b32.xlu1 %v3736_v32, %s3407_s12 }
 0x177   : > { %v3888_v20 = vpop.permute.xlu0 %1420 }
 0x179   : > { %990 = vrot.lane.b32.xlu0 %v3753_v41, %s3408_s14 }
 0x17a   : > { %1182 = vrot.lane.b32.xlu1 %v3748_v39, %s3406_s11 }
 0x17b   : > { %v3894_v25 = vpop.permute.xlu0 %1156 }
 0x17c   : > { %v3896_v26 = vpop.permute.xlu1 %1486 }
 0x17d   : > { %1068 = vrot.lane.b32.xlu0 %v3753_v41, %s3407_s12  ;;  %v5363_v41 = vrot.slane %v3642_v44, 7 }
 0x17e   : > { %1454 = vrot.lane.b32.xlu1 %v3748_v39, %s3405_s13 }
 0x17f   : > { %v3902_v29 = vpop.permute.xlu0 %1200 }
 0x180   : > { %v3904_v33 = vpop.permute.xlu1 %1482 }
 0x181   : > { %1184 = vrot.lane.b32.xlu0 %v3767_v47, %s3406_s11 }
 0x182   : > { %992 = vrot.lane.b32.xlu1 %v3759_v42, %s3408_s14 }
 0x183   : > { %v3910_v34 = vpop.permute.xlu0 %1416 }
 0x184   : > { %v3912_v36 = vpop.permute.xlu1 %1158 }
 0x185   : > { %1460 = vrot.lane.b32.xlu0 %v3772_v50, %s3405_s13 }
 0x186   : > { %1070 = vrot.lane.b32.xlu1 %v3759_v42, %s3407_s12 }
 0x187   : > { %v3918_v37 = vpop.permute.xlu0 %1484 }
 0x188   : > { %v3920_v38 = vpop.permute.xlu1 %1202 }
 0x189   : > { %994 = vrot.lane.b32.xlu0 %v3777_v52, %s3408_s14 }
 0x18a   : > { %1462 = vrot.lane.b32.xlu1 %v3763_v46, %s3405_s13 }
 0x18b   : > { %v3926_v39 = vpop.permute.xlu0 %1160 }
 0x18c   : > { %v3928_v40 = vpop.permute.xlu1 %1418 }
 0x18d   : > { %1072 = vrot.lane.b32.xlu0 %v3777_v52, %s3407_s12  ;;  %v919_v52 = vrot.slane %v3841_v24, 7 }
 0x18e   : > { %1458 = vrot.lane.b32.xlu1 %v3767_v47, %s3405_s13 }
 0x18f   : > { %v3934_v45 = vpop.permute.xlu0 %1424  ;;  %v927_v32 = vsel %vm925_vm4, %v919_v52, %v5363_v41 }
 0x190   : > { %v3936_v48 = vpop.permute.xlu1 %1090 }
 0x191   : > { %1468 = vrot.lane.b32.xlu0 %v3787_v58, %s3405_s13 }
 0x192   : > { %1186 = vrot.lane.b32.xlu1 %v3772_v50, %s3406_s11 }
 0x193   : > { %v3942_v46 = vpop.permute.xlu0 %970 }
 0x194   : > { %v3944_v49 = vpop.permute.xlu1 %1426 }
 0x195   : > { %1188 = vrot.lane.b32.xlu0 %v3791_v59, %s3406_s11 }
 0x196   : > { %996 = vrot.lane.b32.xlu1 %v3783_v53, %s3408_s14 }
 0x197   : > { %v3950_v47 = vpop.permute.xlu0 %972 }
 0x198   : > { %v3952_v51 = vpop.permute.xlu1 %1422 }
 0x199   : > { %1464 = vrot.lane.b32.xlu0 %v3791_v59, %s3405_s13  ;;  %v1527_v41 = vrot.slane %v3952_v51, 1  ;;  %v1529_v51 = vrot.slane %v3944_v49, 1 }
 0x19a   : > { %1074 = vrot.lane.b32.xlu1 %v3783_v53, %s3407_s12 }
 0x19b   : > { %v3958_v50 = vpop.permute.xlu0 %1432 }
 0x19c   : > { %v3960_v55 = vpop.permute.xlu1 %1162 }
 0x19d   : > { %998 = vrot.lane.b32.xlu0 %v3801_v0, %s3408_s14 }
 0x19e   : > { %1190 = vrot.lane.b32.xlu1 %v3796_v62, %s3406_s11 }
 0x19f   : > { %v3966_v58 = vpop.permute.xlu0 %1164 }
 0x1a0   : > { %v3968_v60 = vpop.permute.xlu1 %1166 }
 0x1a1   : > { %1076 = vrot.lane.b32.xlu0 %v3801_v0, %s3407_s12 }
 0x1a2   : > { %1466 = vrot.lane.b32.xlu1 %v3796_v62, %s3405_s13 }
 0x1a3   : > { %v3974_v59 = vpop.permute.xlu0 %1428 }
 0x1a4   : > { %v3976_v61 = vpop.permute.xlu1 %1430  ;;  %v1530_v49 = vrot.slane %v3974_v59, 1 }
 0x1a5   : > { %1192 = vrot.lane.b32.xlu0 %v3814_v7, %s3406_s11 }
 0x1a6   : > { %1000 = vrot.lane.b32.xlu1 %v3806_v2, %s3408_s14 }
 0x1a7   : > { %v3982_v63 = vpop.permute.xlu0 %1052 }
 0x1a8   : > { %v3984_v5 = vpop.permute.xlu1 %974 }
 0x1a9   : > { %1472 = vrot.lane.b32.xlu0 %v3819_v10, %s3405_s13 }
 0x1aa   : > { %1078 = vrot.lane.b32.xlu1 %v3806_v2, %s3407_s12 }
 0x1ab   : > { %v3990_v62 = vpop.permute.xlu0 %1168 }
 0x1ac   : > { %5359 = vst [vmem:[#allocation14_spill] sm:$0xff] %v3990_v62  ;;  %v3992_v8 = vpop.permute.xlu1 %976 }
 0x1ad   : > { %1002 = vrot.lane.b32.xlu0 %v3824_v11, %s3408_s14 }
 0x1ae   : > { %1474 = vrot.lane.b32.xlu1 %v3810_v6, %s3405_s13 }
 0x1af   : > { %v3998_v9 = vpop.permute.xlu0 %1436 }
 0x1b0   : > { %v4000_v12 = vpop.permute.xlu1 %1054 }
 0x1b1   : > { %1080 = vrot.lane.b32.xlu0 %v3824_v11, %s3407_s12 }
 0x1b2   : > { %1470 = vrot.lane.b32.xlu1 %v3814_v7, %s3405_s13 }
 0x1b3   : > { %v4006_v16 = vpop.permute.xlu0 %978 }
 0x1b4   : > { %v4008_v21 = vpop.permute.xlu1 %1438 }
 0x1b5   : > { %1480 = vrot.lane.b32.xlu0 %v3834_v18, %s3405_s13 }
 0x1b6   : > { %1194 = vrot.lane.b32.xlu1 %v3819_v10, %s3406_s11 }
 0x1b7   : > { %v4014_v6 = vpop.permute.xlu0 %1056 }
 0x1b8   : > { %v4016_v27 = vpop.permute.xlu1 %1434 }
 0x1b9   : > { %1196 = vrot.lane.b32.xlu0 %v3838_v19, %s3406_s11 }
 0x1ba   : > { %1004 = vrot.lane.b32.xlu1 %v3830_v15, %s3408_s14 }
 0x1bb   : > { %v4022_v7 = vpop.permute.xlu0 %1444 }
 0x1bc   : > { %v4024_v4 = vpop.permute.xlu1 %1170 }
 0x1bd   : > { %5360 = vst [vmem:[#allocation15_spill] sm:$0xff] %v4024_v4  ;;  %1476 = vrot.lane.b32.xlu0 %v3838_v19, %s3405_s13 }
 0x1be   : > { %1082 = vrot.lane.b32.xlu1 %v3830_v15, %s3407_s12 }
 0x1bf   : > { %v4030_v10 = vpop.permute.xlu0 %1172 }
 0x1c0   : > { %5361 = vst [vmem:[#allocation16_spill] sm:$0xff] %v4030_v10  ;;  %v4032_v18 = vpop.permute.xlu1 %980 }
 0x1c1   : > { %1006 = vrot.lane.b32.xlu0 %v3850_v28, %s3408_s14 }
 0x1c2   : > { %1198 = vrot.lane.b32.xlu1 %v3845_v17, %s3406_s11 }
 0x1c3   : > { %v4038_v53 = vpop.permute.xlu0 %1440 }
 0x1c4   : > { %v4041_v42 = vpop.permute.xlu1 %1058 }
 0x1c5   : > { %1084 = vrot.lane.b32.xlu0 %v3850_v28, %s3407_s12 }
 0x1c6   : > { %1478 = vrot.lane.b32.xlu1 %v3845_v17, %s3405_s13 }
 0x1c7   : > { %v4047_v19 = vpop.permute.xlu0 %982 }
 0x1c8   : > { %5362 = vst [vmem:[#allocation17_spill] sm:$0xff] %v4047_v19  ;;  %v4053_v31 = vpop.permute.xlu1 %1174 }
 0x1c9   : > { %5364 = vst [vmem:[#allocation18_spill] sm:$0xff] %v4053_v31  ;;  %1088 = vrot.lane.b32.xlu0 %v927_v32, %s3407_s12  ;;  %v1528_v32 = vrot.slane %v3934_v45, 1 }
 0x1ca   : > { %1008 = vrot.lane.b32.xlu1 %v3856_v30, %s3408_s14 }
 0x1cb   : > { %v4058_v24 = vpop.permute.xlu0 %1060 }
 0x1cc   : > { %v4060_v28 = vpop.permute.xlu1 %1442 }
 0x1cd   : > { %1360 = vrot.lane.b32.xlu0 %v3902_v29, %s3407_s12 }
 0x1ce   : > { %1086 = vrot.lane.b32.xlu1 %v3856_v30, %s3407_s12  ;;  %v4081_v30 = vsel %vm1560_vm5, %v1527_v41, %v1528_v32  ;;  %v4098_v41 = vsel %vm1560_vm5, %v1528_v32, %v1529_v51 }
 0x1cf   : > { %v4066_v44 = vpop.permute.xlu0 %1176 }
 0x1d0   : > { %5365 = vst [vmem:[#allocation19_spill] sm:$0xff] %v4066_v44  ;;  %v4069_v52 = vpop.permute.xlu1 %984 }
 0x1d1   : > { %5366 = vst [vmem:[#allocation20_spill] sm:$0xff] %v4069_v52  ;;  %1244 = vrot.lane.b32.xlu0 %v3926_v39, %s3408_s14 }
 0x1d2   : > { %1362 = vrot.lane.b32.xlu1 %v3920_v38, %s3407_s12 }
 0x1d3   : > { %v4076_v17 = vpop.permute.xlu0 %1448 }
 0x1d4   : > { %v4083_v29 = vpop.permute.xlu1 %1062 }
 0x1d5   : > { %1625 = vrot.lane.b32.xlu0 %v4081_v30, %s3408_s14 }
 0x1d6   : > { %1246 = vrot.lane.b32.xlu1 %v3960_v55, %s3408_s14 }
 0x1d7   : > { %v4090_v45 = vpop.permute.xlu0 %986 }
 0x1d8   : > { %5367 = vst [vmem:[#allocation21_spill] sm:$0xff] %v4090_v45  ;;  %v4092_v38 = vpop.permute.xlu1 %1450  ;;  %v1531_v45 = vrot.slane %v3976_v61, 1  ;;  %v1532_v61 = vrot.slane %v3958_v50, 1 }
 0x1d9   : > { %1248 = vrot.lane.b32.xlu0 %v3966_v58, %s3408_s14 }
 0x1da   : > { %1627 = vrot.lane.b32.xlu1 %v4098_v41, %s3408_s14  ;;  %v4116_v32 = vsel %vm1560_vm5, %v1530_v49, %v1531_v45  ;;  %v4133_v49 = vsel %vm1560_vm5, %v1531_v45, %v1532_v61  ;;  %v1534_v45 = vrot.slane %v3998_v9, 1 }
 0x1db   : > { %v4102_v23 = vpop.permute.xlu0 %1064  ;;  %5369 = vst [vmem:[#allocation23_spill] sm:$0xff] %v4116_v32  ;;  %5373 = vst [vmem:[#allocation27_spill] sm:$0xff] %v4133_v49 }
 0x1dc   : > { %5368 = vst [vmem:[#allocation22_spill] sm:$0xff] %v4102_v23  ;;  %v4105_v22 = vpop.permute.xlu1 %1446 }
 0x1dd   : > { %1324 = vrot.lane.b32.xlu0 %v3966_v58, %s3407_s12 }
 0x1de   : > { %1250 = vrot.lane.b32.xlu1 %v3968_v60, %s3408_s14 }
 0x1df   : > { %v4112_v52 = vpop.permute.xlu0 %1456 }
 0x1e0   : > { %v4118_v51 = vpop.permute.xlu1 %1178 }
 0x1e1   : > { %5370 = vst [vmem:[#allocation24_spill] sm:$0xff] %v4118_v51  ;;  %1629 = vrot.lane.b32.xlu0 %v4116_v32, %s3408_s14 }
 0x1e2   : > { %1326 = vrot.lane.b32.xlu1 %v3968_v60, %s3407_s12 }
 0x1e3   : > { %v4124_v59 = vpop.permute.xlu0 %1180 }
 0x1e4   : > { %5371 = vst [vmem:[#allocation25_spill] sm:$0xff] %v4124_v59  ;;  %v4127_v14 = vpop.permute.xlu1 %988 }
 0x1e5   : > { %5372 = vst [vmem:[#allocation26_spill] sm:$0xff] %v4127_v14  ;;  %1707 = vrot.lane.b32.xlu0 %v4116_v32, %s3407_s12  ;;  %v1533_v14 = vrot.slane %v4016_v27, 1  ;;  %v1535_v27 = vrot.slane %v4008_v21, 1 }
 0x1e6   : > { %1631 = vrot.lane.b32.xlu1 %v4133_v49, %s3408_s14 }
 0x1e7   : > { %v4137_v23 = vpop.permute.xlu0 %1452 }
 0x1e8   : > { %v4139_v19 = vpop.permute.xlu1 %1066 }
 0x1e9   : > { %5374 = vst [vmem:[#allocation28_spill] sm:$0xff] %v4139_v19  ;;  %1252 = vrot.lane.b32.xlu0 %v3990_v62, %s3408_s14  ;;  %v4159_v19 = vsel %vm1560_vm5, %v1533_v14, %v1534_v45  ;;  %v4176_v14 = vsel %vm1560_vm5, %v1534_v45, %v1535_v27  ;;  %v1536_v45 = vrot.slane %v4038_v53, 1  ;;  %v1538_v53 = vrot.slane %v4022_v7, 1 }
 0x1ea   : > { %1709 = vrot.lane.b32.xlu1 %v4133_v49, %s3407_s12  ;;  %5378 = vst [vmem:[#allocation32_spill] sm:$0xff] %v4159_v19  ;;  %5381 = vst [vmem:[#allocation35_spill] sm:$0xff] %v4176_v14 }
 0x1eb   : > { %v4145_v50 = vpop.permute.xlu0 %990 }
 0x1ec   : > { %5375 = vst [vmem:[#allocation29_spill] sm:$0xff] %v4145_v50  ;;  %v4148_v13 = vpop.permute.xlu1 %1182 }
 0x1ed   : > { %5376 = vst [vmem:[#allocation30_spill] sm:$0xff] %v4148_v13  ;;  %1328 = vrot.lane.b32.xlu0 %v3990_v62, %s3407_s12 }
 0x1ee   : > { %1254 = vrot.lane.b32.xlu1 %v4024_v4, %s3408_s14 }
 0x1ef   : > { %v4155_v61 = vpop.permute.xlu0 %1068 }
 0x1f0   : > { %5377 = vst [vmem:[#allocation31_spill] sm:$0xff] %v4155_v61  ;;  %v4161_v49 = vpop.permute.xlu1 %1454 }
 0x1f1   : > { %1633 = vrot.lane.b32.xlu0 %v4159_v19, %s3408_s14 }
 0x1f2   : > { %1330 = vrot.lane.b32.xlu1 %v4024_v4, %s3407_s12 }
 0x1f3   : > { %v4168_v9 = vpop.permute.xlu0 %1184 }
 0x1f4   : > { %5379 = vst [vmem:[#allocation33_spill] sm:$0xff] %v4168_v9  ;;  %v4170_v50 = vpop.permute.xlu1 %992 }
 0x1f5   : > { %5380 = vst [vmem:[#allocation34_spill] sm:$0xff] %v4170_v50  ;;  %1711 = vrot.lane.b32.xlu0 %v4159_v19, %s3407_s12  ;;  %v1537_v19 = vrot.slane %v4060_v28, 1 }
 0x1f6   : > { %1635 = vrot.lane.b32.xlu1 %v4176_v14, %s3408_s14 }
 0x1f7   : > { %v4180_v61 = vpop.permute.xlu0 %1460 }
 0x1f8   : > { %v4182_v21 = vpop.permute.xlu1 %1070 }
 0x1f9   : > { %5382 = vst [vmem:[#allocation36_spill] sm:$0xff] %v4182_v21  ;;  %1256 = vrot.lane.b32.xlu0 %v4030_v10, %s3408_s14  ;;  %v4202_v21 = vsel %vm1560_vm5, %v1536_v45, %v1537_v19  ;;  %v4219_v45 = vsel %vm1560_vm5, %v1537_v19, %v1538_v53  ;;  %v1540_v19 = vrot.slane %v4076_v17, 1 }
 0x1fa   : > { %1713 = vrot.lane.b32.xlu1 %v4176_v14, %s3407_s12  ;;  %5385 = vst [vmem:[#allocation39_spill] sm:$0xff] %v4202_v21  ;;  %5387 = vst [vmem:[#allocation41_spill] sm:$0xff] %v4219_v45 }
 0x1fb   : > { %v4188_v50 = vpop.permute.xlu0 %994 }
 0x1fc   : > { %5383 = vst [vmem:[#allocation37_spill] sm:$0xff] %v4188_v50  ;;  %v4191_v4 = vpop.permute.xlu1 %1462 }
 0x1fd   : > { %1332 = vrot.lane.b32.xlu0 %v4030_v10, %s3407_s12 }
 0x1fe   : > { %1258 = vrot.lane.b32.xlu1 %v4053_v31, %s3408_s14 }
 0x1ff   : > { %v4198_v27 = vpop.permute.xlu0 %1072 }
 0x200   : > { %5384 = vst [vmem:[#allocation38_spill] sm:$0xff] %v4198_v27  ;;  %v4204_v14 = vpop.permute.xlu1 %1458 }
 0x201   : > { %1637 = vrot.lane.b32.xlu0 %v4202_v21, %s3408_s14 }
 0x202   : > { %1334 = vrot.lane.b32.xlu1 %v4053_v31, %s3407_s12 }
 0x203   : > { %v4210_v28 = vpop.permute.xlu0 %1468 }
 0x204   : > { %v4213_v50 = vpop.permute.xlu1 %1186 }
 0x205   : > { %5386 = vst [vmem:[#allocation40_spill] sm:$0xff] %v4213_v50  ;;  %1715 = vrot.lane.b32.xlu0 %v4202_v21, %s3407_s12  ;;  %v1539_v21 = vrot.slane %v4105_v22, 1  ;;  %v1541_v22 = vrot.slane %v4092_v38, 1 }
 0x206   : > { %1639 = vrot.lane.b32.xlu1 %v4219_v45, %s3408_s14 }
 0x207   : > { %v4223_v27 = vpop.permute.xlu0 %1188 }
 0x208   : > { %v4225_v10 = vpop.permute.xlu1 %996 }
 0x209   : > { %5388 = vst [vmem:[#allocation42_spill] sm:$0xff] %v4225_v10  ;;  %1260 = vrot.lane.b32.xlu0 %v4066_v44, %s3408_s14  ;;  %v4245_v10 = vsel %vm1560_vm5, %v1539_v21, %v1540_v19  ;;  %v4262_v21 = vsel %vm1560_vm5, %v1540_v19, %v1541_v22  ;;  %v1542_v19 = vrot.slane %v4137_v23, 1  ;;  %v1544_v23 = vrot.slane %v4112_v52, 1 }
 0x20a   : > { %1717 = vrot.lane.b32.xlu1 %v4219_v45, %s3407_s12  ;;  %5391 = vst [vmem:[#allocation45_spill] sm:$0xff] %v4245_v10  ;;  %5393 = vst [vmem:[#allocation47_spill] sm:$0xff] %v4262_v21 }
 0x20b   : > { %v4231_v7 = vpop.permute.xlu0 %1464 }
 0x20c   : > { %v4234_v31 = vpop.permute.xlu1 %1074 }
 0x20d   : > { %5389 = vst [vmem:[#allocation43_spill] sm:$0xff] %v4234_v31  ;;  %1336 = vrot.lane.b32.xlu0 %v4066_v44, %s3407_s12 }
 0x20e   : > { %1262 = vrot.lane.b32.xlu1 %v4118_v51, %s3408_s14 }
 0x20f   : > { %v4241_v53 = vpop.permute.xlu0 %998 }
 0x210   : > { %5390 = vst [vmem:[#allocation44_spill] sm:$0xff] %v4241_v53  ;;  %v4247_v45 = vpop.permute.xlu1 %1190 }
 0x211   : > { %1641 = vrot.lane.b32.xlu0 %v4245_v10, %s3408_s14 }
 0x212   : > { %1338 = vrot.lane.b32.xlu1 %v4118_v51, %s3407_s12 }
 0x213   : > { %v4254_v17 = vpop.permute.xlu0 %1076 }
 0x214   : > { %5392 = vst [vmem:[#allocation46_spill] sm:$0xff] %v4254_v17  ;;  %v4256_v31 = vpop.permute.xlu1 %1466 }
 0x215   : > { %1719 = vrot.lane.b32.xlu0 %v4245_v10, %s3407_s12  ;;  %v1543_v10 = vrot.slane %v4161_v49, 1 }
 0x216   : > { %1643 = vrot.lane.b32.xlu1 %v4262_v21, %s3408_s14 }
 0x217   : > { %v4266_v53 = vpop.permute.xlu0 %1192 }
 0x218   : > { %v4268_v38 = vpop.permute.xlu1 %1000 }
 0x219   : > { %5394 = vst [vmem:[#allocation48_spill] sm:$0xff] %v4268_v38  ;;  %1264 = vrot.lane.b32.xlu0 %v4124_v59, %s3408_s14  ;;  %v4286_v38 = vsel %vm1560_vm5, %v1542_v19, %v1543_v10  ;;  %v4303_v19 = vsel %vm1560_vm5, %v1543_v10, %v1544_v23  ;;  %v1546_v10 = vrot.slane %v4180_v61, 1 }
 0x21a   : > { %1721 = vrot.lane.b32.xlu1 %v4262_v21, %s3407_s12  ;;  %5396 = vst [vmem:[#allocation50_spill] sm:$0xff] %v4286_v38  ;;  %5398 = vst [vmem:[#allocation52_spill] sm:$0xff] %v4303_v19 }
 0x21b   : > { %v4274_v17 = vpop.permute.xlu0 %1472 }
 0x21c   : > { %v4277_v51 = vpop.permute.xlu1 %1078 }
 0x21d   : > { %5395 = vst [vmem:[#allocation49_spill] sm:$0xff] %v4277_v51  ;;  %1340 = vrot.lane.b32.xlu0 %v4124_v59, %s3407_s12 }
 0x21e   : > { %1266 = vrot.lane.b32.xlu1 %v4148_v13, %s3408_s14 }
 0x21f   : > { %v1003_v22 = vpop.permute.xlu0 %1002 }
 0x220   : > { %v4288_v21 = vpop.permute.xlu1 %1474  ;;  %v1046_v62 = vadd.f32 %v1003_v22, %v3801_v0  ;;  %v1549_v22 = vrot.slane %v4256_v31, 1 }
 0x221   : > { %1645 = vrot.lane.b32.xlu0 %v4286_v38, %s3408_s14 }
 0x222   : > { %1342 = vrot.lane.b32.xlu1 %v4148_v13, %s3407_s12 }
 0x223   : > { %v4294_v49 = vpop.permute.xlu0 %1080 }
 0x224   : > { %5397 = vst [vmem:[#allocation51_spill] sm:$0xff] %v4294_v49  ;;  %v4297_v51 = vpop.permute.xlu1 %1470  ;;  %v1545_v49 = vrot.slane %v4204_v14, 1  ;;  %v1547_v14 = vrot.slane %v4191_v4, 1 }
 0x225   : > { %1723 = vrot.lane.b32.xlu0 %v4286_v38, %s3407_s12 }
 0x226   : > { %1647 = vrot.lane.b32.xlu1 %v4303_v19, %s3408_s14  ;;  %v4327_v13 = vsel %vm1560_vm5, %v1545_v49, %v1546_v10  ;;  %v4343_v49 = vsel %vm1560_vm5, %v1546_v10, %v1547_v14 }
 0x227   : > { %v4307_v59 = vpop.permute.xlu0 %1480 }
 0x228   : > { %v4309_v44 = vpop.permute.xlu1 %1194 }
 0x229   : > { %1268 = vrot.lane.b32.xlu0 %v4168_v9, %s3408_s14 }
 0x22a   : > { %1725 = vrot.lane.b32.xlu1 %v4303_v19, %s3407_s12 }
 0x22b   : > { %v4315_v52 = vpop.permute.xlu0 %1196 }
 0x22c   : > { %v1005_v38 = vpop.permute.xlu1 %1004 }
 0x22d   : > { %1344 = vrot.lane.b32.xlu0 %v4168_v9, %s3407_s12 }
 0x22e   : > { %1270 = vrot.lane.b32.xlu1 %v4213_v50, %s3408_s14 }
 0x22f   : > { %v4323_v23 = vpop.permute.xlu0 %1476 }
 0x230   : > { %v4329_v19 = vpop.permute.xlu1 %1082 }
 0x231   : > { %5399 = vst [vmem:[#allocation53_spill] sm:$0xff] %v4329_v19  ;;  %1649 = vrot.lane.b32.xlu0 %v4327_v13, %s3408_s14 }
 0x232   : > { %1346 = vrot.lane.b32.xlu1 %v4213_v50, %s3407_s12 }
 0x233   : > { %v1007_v61 = vpop.permute.xlu0 %1006 }
 0x234   : > { %v4336_v9 = vpop.permute.xlu1 %1198  ;;  %v1048_v50 = vadd.f32 %v1007_v61, %v3824_v11  ;;  %v1047_v61 = vadd.f32 %v1005_v38, %v3806_v2  ;;  %v1550_v2 = vrot.slane %v4210_v28, 1  ;;  %v1030_v38 = vadd.f32 %v3942_v46, %v3650_v54 }
 0x235   : > { %1727 = vrot.lane.b32.xlu0 %v4327_v13, %s3407_s12  ;;  %v1031_v54 = vadd.f32 %v3950_v47, %v3639_v43  ;;  %v1551_v46 = vrot.slane %v4297_v51, 1 }
 0x236   : > { %1651 = vrot.lane.b32.xlu1 %v4343_v49, %s3408_s14 }
 0x237   : > { %v1085_v19 = vpop.permute.xlu0 %1084 }
 0x238   : > { %v4347_v4 = vadd.f32 %v1085_v19, %v1046_v62  ;;  %v4349_v32 = vpop.permute.xlu1 %1478  ;;  %v1548_v62 = vrot.slane %v4231_v7, 1 }
 0x239   : > { %1272 = vrot.lane.b32.xlu0 %v4223_v27, %s3408_s14 }
 0x23a   : > { %5400 = vst [vmem:[#allocation54_spill] sm:$0xff] %v4347_v4  ;;  %1729 = vrot.lane.b32.xlu1 %v4343_v49, %s3407_s12  ;;  %v4371_v31 = vsel %vm1560_vm5, %v1548_v62, %v1549_v22  ;;  %v1112_v62 = vadd.f32 %v3982_v63, %v1030_v38  ;;  %v1113_v63 = vadd.f32 %v4000_v12, %v1031_v54  ;;  %v1553_v12 = vrot.slane %v4288_v21, 1 }
 0x23b   : > { %v1089_v0 = vpop.permute.xlu0 %1088  ;;  %v1526_v54 = vrot.slane %v3888_v20, 1 }
 0x23c   : > { %v4357_v10 = vadd.f32 %v1089_v0, %v1048_v50  ;;  %v1009_v14 = vpop.permute.xlu1 %1008 }
 0x23d   : > { %1348 = vrot.lane.b32.xlu0 %v4223_v27, %s3407_s12  ;;  %v1049_v19 = vadd.f32 %v1009_v14, %v3830_v15  ;;  %v4391_v14 = vsel %vm1560_vm5, %v1549_v22, %v1550_v2  ;;  %v1224_v22 = vadd.f32 %v3894_v25, %v1112_v62  ;;  %v1552_v2 = vrot.slane %v4274_v17, 1 }
 0x23e   : > { %1274 = vrot.lane.b32.xlu1 %v4247_v45, %s3408_s14 }
 0x23f   : > { %v4365_v11 = vpop.permute.xlu0 %1360  ;;  %v1131_v4 = vadd.f32 %v3936_v48, %v1049_v19  ;;  %v4414_v25 = vsel %vm1560_vm5, %v1551_v46, %v1552_v2  ;;  %v4431_v21 = vsel %vm1560_vm5, %v1552_v2, %v1553_v12 }
 0x240   : > { %v1087_v50 = vpop.permute.xlu1 %1086 }
 0x241   : > { %1653 = vrot.lane.b32.xlu0 %v4371_v31, %s3408_s14  ;;  %v4375_v7 = vadd.f32 %v1087_v50, %v1047_v61  ;;  %v4378_v15 = vadd.f32 %v4309_v44, %v1131_v4  ;;  %v1525_v61 = vrot.slane %v3928_v40, 1 }
 0x242   : > { %1350 = vrot.lane.b32.xlu1 %v4247_v45, %s3407_s12 }
 0x243   : > { %v1245_v0 = vpop.permute.xlu0 %1244 }
 0x244   : > { %v4383_v48 = vpop.permute.xlu1 %1362  ;;  %v1304_v38 = vadd.f32 %v1245_v0, %v1224_v22 }
 0x245   : > { %5401 = vst [vmem:[#allocation55_spill] sm:$0xff] %v4383_v48  ;;  %1731 = vrot.lane.b32.xlu0 %v4371_v31, %s3407_s12  ;;  %v1524_v48 = vrot.slane %v3910_v34, 1  ;;  %v1225_v34 = vadd.f32 %v3912_v36, %v1113_v63 }
 0x246   : > { %1655 = vrot.lane.b32.xlu1 %v4391_v14, %s3408_s14 }
 0x247   : > { %v1626_v4 = vpop.permute.xlu0 %1625  ;;  %v1584_v51 = vsel %vm1560_vm5, %v1524_v48, %v1525_v61  ;;  %v1032_v48 = vadd.f32 %v3984_v5, %v3654_v56  ;;  %v4441_v56 = vld [vmem:[%s5293_s4] ss:$0 sm:$0xff]  ;;  %v1033_v5 = vadd.f32 %v3992_v8, %v3659_v57 }
 0x248   : > { %v1247_v19 = vpop.permute.xlu1 %1246 }
 0x249   : > { %1276 = vrot.lane.b32.xlu0 %v4266_v53, %s3408_s14  ;;  %v1305_v62 = vadd.f32 %v1247_v19, %v1225_v34  ;;  %v1114_v19 = vadd.f32 %v4014_v6, %v1032_v48  ;;  %v1555_v6 = vrot.slane %v4349_v32, 1  ;;  %v1115_v12 = vadd.f32 %v4041_v42, %v1033_v5 }
 0x24a   : > { %1733 = vrot.lane.b32.xlu1 %v4391_v14, %s3407_s12  ;;  %v1554_v34 = vrot.slane %v4323_v23, 1  ;;  %v1556_v48 = vrot.slane %v4307_v59, 1 }
 0x24b   : > { %v1249_v28 = vpop.permute.xlu0 %1248  ;;  %v1227_v42 = vadd.f32 %v3960_v55, %v1115_v12  ;;  %v1034_v55 = vadd.f32 %v4006_v16, %v3666_v1  ;;  %v1559_v1 = vrot.slane %v3896_v26, 1 }
 0x24c   : > { %v1628_v50 = vpop.permute.xlu1 %1627 }
 0x24d   : > { %1352 = vrot.lane.b32.xlu0 %v4266_v53, %s3407_s12  ;;  %v1116_v59 = vadd.f32 %v4058_v24, %v1034_v55  ;;  %v5407_v55 = vld [vmem:[#allocation5_spill] sm:$0xff] }
 0x24e   : > { %1278 = vrot.lane.b32.xlu1 %v4309_v44, %s3408_s14 }
 0x24f   : > { %v1325_v43 = vpop.permute.xlu0 %1324  ;;  %v1228_v5 = vadd.f32 %v3966_v58, %v1116_v59 }
 0x250   : > { %v1384_v47 = vadd.f32 %v1325_v43, %v1304_v38  ;;  %v1251_v40 = vpop.permute.xlu1 %1250 }
 0x251   : > { %1657 = vrot.lane.b32.xlu0 %v4414_v25, %s3408_s14 }
 0x252   : > { %v1585_v17 = vadd.f32 %v1584_v51, %v1384_v47  ;;  %1354 = vrot.lane.b32.xlu1 %v4309_v44, %s3407_s12  ;;  %v1583_v44 = vsel %vm1560_vm5, %v1525_v61, %v1526_v54  ;;  %v1226_v61 = vadd.f32 %v3926_v39, %v1114_v19 }
 0x253   : > { %v1630_v0 = vpop.permute.xlu0 %1629 }
 0x254   : > { %v1327_v46 = vpop.permute.xlu1 %1326  ;;  %v1685_v36 = vadd.f32 %v1626_v4, %v1585_v17  ;;  %v1306_v57 = vadd.f32 %v1249_v28, %v1226_v61 }
 0x255   : > { %1735 = vrot.lane.b32.xlu0 %v4414_v25, %s3407_s12  ;;  %v1385_v22 = vadd.f32 %v1327_v46, %v1305_v62  ;;  %v1558_v46 = vrot.slane %v3918_v37, 1 }
 0x256   : > { %1659 = vrot.lane.b32.xlu1 %v4431_v21, %s3408_s14 }
 0x257   : > { %v1708_v20 = vpop.permute.xlu0 %1707  ;;  %v1586_v63 = vadd.f32 %v1583_v44, %v1385_v22  ;;  %v1307_v22 = vadd.f32 %v1251_v40, %v1227_v42  ;;  %v1557_v44 = vrot.slane %v3904_v33, 1 }
 0x258   : > { %v1767_v38 = vadd.f32 %v1708_v20, %v1685_v36  ;;  %v1632_v43 = vpop.permute.xlu1 %1631 }
 0x259   : > { %1280 = vrot.lane.b32.xlu0 %v4315_v52, %s3408_s14  ;;  %v1686_v47 = vadd.f32 %v1628_v50, %v1586_v63  ;;  %v1564_v50 = vsel %vm1560_vm5, %v1554_v34, %v1555_v6  ;;  %v1562_v63 = vsel %vm1560_vm5, %v1557_v44, %v1558_v46 }
 0x25a   : > { %1737 = vrot.lane.b32.xlu1 %v4431_v21, %s3407_s12  ;;  %v1794_v2 = vadd.f32 %v4441_v56, %v1767_v38 }
 0x25b   : > { %v1253_v4 = vpop.permute.xlu0 %1252 }
 0x25c   : > { %v1710_v51 = vpop.permute.xlu1 %1709  ;;  %v1814_v32 = vmax.f32 %v1794_v2, 0.0  ;;  %v1308_v2 = vadd.f32 %v1253_v4, %v1228_v5 }
 0x25d   : > { %1356 = vrot.lane.b32.xlu0 %v4315_v52, %s3407_s12  ;;  %v1768_v8 = vadd.f32 %v1710_v51, %v1686_v47  ;;  %v1561_v51 = vsel %vm1560_vm5, %v1558_v46, %v1559_v1  ;;  %v5405_v46 = vld [vmem:[#allocation22_spill] sm:$0xff] }
 0x25e   : > { %1282 = vrot.lane.b32.xlu1 %v4336_v9, %s3408_s14 }
 0x25f   : > { %v1329_v17 = vpop.permute.xlu0 %1328  ;;  %v1795_v39 = vadd.f32 %v4441_v56, %v1768_v8 }
 0x260   : > { %v1386_v62 = vadd.f32 %v1329_v17, %v1306_v57  ;;  %v1255_v54 = vpop.permute.xlu1 %1254 }
 0x261   : > { %1661 = vrot.lane.b32.xlu0 %v1564_v50, %s3408_s14  ;;  %v1815_v52 = vmax.f32 %v1795_v39, 0.0  ;;  %v5403_v39 = vld [vmem:[#allocation4_spill] sm:$0xff] }
 0x262   : > { %v1587_v23 = vadd.f32 %v4081_v30, %v1386_v62  ;;  %1358 = vrot.lane.b32.xlu1 %v4336_v9, %s3407_s12  ;;  %v1563_v9 = vsel %vm1560_vm5, %v1555_v6, %v1556_v48  ;;  %v5404_v62 = vld [vmem:[#allocation17_spill] sm:$0xff] }
 0x263   : > { %v1634_v28 = vpop.permute.xlu0 %1633  ;;  %v1834_v36 = vpack.c.bf16 %v1815_v52, %v1814_v32 }
 0x264   : > { %v1331_v20 = vpop.permute.xlu1 %1330  ;;  %v1687_v19 = vadd.f32 %v1630_v0, %v1587_v23  ;;  %v1035_v0 = vadd.f32 %v4032_v18, %v3671_v3 }
 0x265   : > { %1739 = vrot.lane.b32.xlu0 %v1564_v50, %s3407_s12  ;;  %1854 = vst.msk [vmem:[#allocation3] sm:$0xff] %vm458_vm1, %v1834_v36  ;;  %v1387_v30 = vadd.f32 %v1331_v20, %v1307_v22  ;;  %v1036_v50 = vadd.f32 %v5404_v62, %v5403_v39  ;;  %v5406_v22 = vld [vmem:[#allocation27_spill] sm:$0xff] }
 0x266   : > { %1663 = vrot.lane.b32.xlu1 %v1563_v9, %s3408_s14  ;;  %v1117_v61 = vadd.f32 %v4083_v29, %v1035_v0  ;;  %v5416_v39 = vld [vmem:[#allocation35_spill] sm:$0xff] }
 0x267   : > { %v1712_v37 = vpop.permute.xlu0 %1711  ;;  %v1588_v33 = vadd.f32 %v4098_v41, %v1387_v30  ;;  %v1118_v48 = vadd.f32 %v5405_v46, %v1036_v50  ;;  %v5408_v30 = vld [vmem:[#allocation20_spill] sm:$0xff]  ;;  %v5418_v46 = vld [vmem:[#allocation26_spill] sm:$0xff] }
 0x268   : > { %v1769_v40 = vadd.f32 %v1712_v37, %v1687_v19  ;;  %v1636_v38 = vpop.permute.xlu1 %1635  ;;  %v1229_v58 = vadd.f32 %v3968_v60, %v1117_v61  ;;  %v5411_v61 = vld [vmem:[#allocation15_spill] sm:$0xff] }
 0x269   : > { %1743 = vrot.lane.b32.xlu0 %v1562_v63, %s3407_s12  ;;  %v1688_v41 = vadd.f32 %v1632_v43, %v1588_v33  ;;  %v5402_v43 = vld [vmem:[#allocation23_spill] sm:$0xff] }
 0x26a   : > { %1741 = vrot.lane.b32.xlu1 %v1563_v9, %s3407_s12  ;;  %v1796_v24 = vadd.f32 %v4441_v56, %v1769_v40  ;;  %v1309_v29 = vadd.f32 %v1255_v54, %v1229_v58  ;;  %v1037_v54 = vadd.f32 %v5408_v30, %v5407_v55  ;;  %v5409_v9 = vld [vmem:[#allocation14_spill] sm:$0xff]  ;;  %v5410_v40 = vld [vmem:[#allocation28_spill] sm:$0xff] }
 0x26b   : > { %v1257_v16 = vpop.permute.xlu0 %1256  ;;  %v1230_v19 = vadd.f32 %v5409_v9, %v1118_v48  ;;  %v5413_v58 = vld [vmem:[#allocation6_spill] sm:$0xff]  ;;  %v5419_v48 = vld [vmem:[#allocation16_spill] sm:$0xff] }
 0x26c   : > { %v1714_v6 = vpop.permute.xlu1 %1713  ;;  %v1816_v12 = vmax.f32 %v1796_v24, 0.0  ;;  %v1119_v63 = vadd.f32 %v5410_v40, %v1037_v54  ;;  %v5420_v30 = vld [vmem:[#allocation36_spill] sm:$0xff] }
 0x26d   : > { %v1770_v47 = vadd.f32 %v1714_v6, %v1688_v41 }
 0x26e   : > { %1745 = vrot.lane.b32.xlu1 %v1561_v51, %s3407_s12  ;;  %v5412_v51 = vld [vmem:[#allocation32_spill] sm:$0xff] }
 0x26f   : > { %v1333_v26 = vpop.permute.xlu0 %1332  ;;  %v1797_v34 = vadd.f32 %v4441_v56, %v1770_v47 }
 0x270   : > { %v1388_v3 = vadd.f32 %v1333_v26, %v1308_v2  ;;  %v1259_v18 = vpop.permute.xlu1 %1258  ;;  %v1231_v2 = vadd.f32 %v5411_v61, %v1119_v63  ;;  %v5421_v63 = vld [vmem:[#allocation18_spill] sm:$0xff] }
 0x271   : > { %v1817_v57 = vmax.f32 %v1797_v34, 0.0 }
 0x272   : > { %v1589_v8 = vadd.f32 %v5402_v43, %v1388_v3  ;;  %v1311_v34 = vadd.f32 %v1259_v18, %v1231_v2  ;;  %v5423_v2 = vld [vmem:[#allocation8_spill] sm:$0xff] }
 0x273   : > { %v1638_v17 = vpop.permute.xlu0 %1637  ;;  %v1835_v4 = vpack.c.bf16 %v1817_v57, %v1816_v12  ;;  %v5414_v57 = vld [vmem:[#allocation21_spill] sm:$0xff] }
 0x274   : > { %v1335_v32 = vpop.permute.xlu1 %1334  ;;  %v1689_v52 = vadd.f32 %v1634_v28, %v1589_v8  ;;  %v1310_v28 = vadd.f32 %v1257_v16, %v1230_v19  ;;  %v1038_v43 = vadd.f32 %v5414_v57, %v5413_v58  ;;  %v5426_v58 = vld [vmem:[#allocation41_spill] sm:$0xff] }
 0x275   : > { %1855 = vst.msk [vmem:[#allocation3 + $0x10] sm:$0xff] %vm458_vm1, %v1835_v4  ;;  %v1389_v42 = vadd.f32 %v1335_v32, %v1309_v29  ;;  %v5415_v4 = vld [vmem:[#allocation31_spill] sm:$0xff] }
 0x276   : > { %v1120_v32 = vadd.f32 %v5415_v4, %v1038_v43  ;;  %v5428_v4 = vld [vmem:[#allocation34_spill] sm:$0xff] }
 0x277   : > { %v1716_v23 = vpop.permute.xlu0 %1715  ;;  %v1590_v36 = vadd.f32 %v5406_v22, %v1389_v42 }
 0x278   : > { %v1771_v60 = vadd.f32 %v1716_v23, %v1689_v52  ;;  %v1640_v44 = vpop.permute.xlu1 %1639  ;;  %v5417_v23 = vld [vmem:[#allocation7_spill] sm:$0xff]  ;;  %v1232_v22 = vadd.f32 %v5419_v48, %v1120_v32 }
 0x279   : > { %v1690_v59 = vadd.f32 %v1636_v38, %v1590_v36  ;;  %v1039_v18 = vadd.f32 %v5418_v46, %v5417_v23  ;;  %v5429_v32 = vld [vmem:[#allocation19_spill] sm:$0xff] }
 0x27a   : > { %v1798_v37 = vadd.f32 %v4441_v56, %v1771_v60  ;;  %v5430_v46 = vld [vmem:[#allocation43_spill] sm:$0xff] }
 0x27b   : > { %v1261_v20 = vpop.permute.xlu0 %1260  ;;  %v1121_v54 = vadd.f32 %v5420_v30, %v1039_v18 }
 0x27c   : > { %v1718_v33 = vpop.permute.xlu1 %1717  ;;  %v1818_v5 = vmax.f32 %v1798_v37, 0.0 }
 0x27d   : > { %v1772_v1 = vadd.f32 %v1718_v33, %v1690_v59 }
 0x27f   : > { %v1337_v0 = vpop.permute.xlu0 %1336  ;;  %v1799_v24 = vadd.f32 %v4441_v56, %v1772_v1 }
 0x280   : > { %v1390_v41 = vadd.f32 %v1337_v0, %v1310_v28  ;;  %v1263_v6 = vpop.permute.xlu1 %1262  ;;  %v1233_v28 = vadd.f32 %v5421_v63, %v1121_v54  ;;  %v5422_v0 = vld [vmem:[#allocation39_spill] sm:$0xff]  ;;  %v5431_v54 = vld [vmem:[#allocation24_spill] sm:$0xff] }
 0x281   : > { %v1819_v47 = vmax.f32 %v1799_v24, 0.0 }
 0x282   : > { %v1591_v26 = vadd.f32 %v5412_v51, %v1390_v41  ;;  %v1313_v41 = vadd.f32 %v1263_v6, %v1233_v28  ;;  %v5433_v28 = vld [vmem:[#allocation10_spill] sm:$0xff] }
 0x283   : > { %v1642_v12 = vpop.permute.xlu0 %1641  ;;  %v1836_v3 = vpack.c.bf16 %v1819_v47, %v1818_v5  ;;  %v5424_v47 = vld [vmem:[#allocation29_spill] sm:$0xff] }
 0x284   : > { %v1339_v38 = vpop.permute.xlu1 %1338  ;;  %v1691_v8 = vadd.f32 %v1638_v17, %v1591_v26  ;;  %v1312_v17 = vadd.f32 %v1261_v20, %v1232_v22  ;;  %v1040_v51 = vadd.f32 %v5424_v47, %v5423_v2  ;;  %v5436_v2 = vld [vmem:[#allocation47_spill] sm:$0xff] }
 0x285   : > { %1856 = vst.msk [vmem:[#allocation3 + $0x20] sm:$0xff] %vm458_vm1, %v1836_v3  ;;  %v1391_v16 = vadd.f32 %v1339_v38, %v1311_v34  ;;  %v5425_v3 = vld [vmem:[#allocation38_spill] sm:$0xff] }
 0x286   : > { %v1122_v38 = vadd.f32 %v5425_v3, %v1040_v51  ;;  %v5438_v3 = vld [vmem:[#allocation42_spill] sm:$0xff] }
 0x287   : > { %v1720_v29 = vpop.permute.xlu0 %1719  ;;  %v1592_v62 = vadd.f32 %v5416_v39, %v1391_v16 }
 0x288   : > { %v1773_v50 = vadd.f32 %v1720_v29, %v1691_v8  ;;  %v1644_v42 = vpop.permute.xlu1 %1643  ;;  %v5427_v29 = vld [vmem:[#allocation9_spill] sm:$0xff]  ;;  %v1234_v39 = vadd.f32 %v5429_v32, %v1122_v38 }
 0x289   : > { %v1692_v60 = vadd.f32 %v1640_v44, %v1592_v62  ;;  %v1041_v6 = vadd.f32 %v5428_v4, %v5427_v29  ;;  %v5439_v38 = vld [vmem:[#allocation25_spill] sm:$0xff] }
 0x28a   : > { %v1800_v36 = vadd.f32 %v4441_v56, %v1773_v50  ;;  %v5440_v4 = vld [vmem:[#allocation49_spill] sm:$0xff] }
 0x28b   : > { %v1265_v52 = vpop.permute.xlu0 %1264  ;;  %v1123_v18 = vadd.f32 %v5430_v46, %v1041_v6 }
 0x28c   : > { %v1722_v55 = vpop.permute.xlu1 %1721  ;;  %v1820_v37 = vmax.f32 %v1800_v36, 0.0 }
 0x28d   : > { %v1774_v9 = vadd.f32 %v1722_v55, %v1692_v60 }
 0x28f   : > { %v1341_v19 = vpop.permute.xlu0 %1340  ;;  %v1801_v59 = vadd.f32 %v4441_v56, %v1774_v9 }
 0x290   : > { %v1392_v33 = vadd.f32 %v1341_v19, %v1312_v17  ;;  %v1267_v40 = vpop.permute.xlu1 %1266  ;;  %v1235_v17 = vadd.f32 %v5431_v54, %v1123_v18  ;;  %v5432_v19 = vld [vmem:[#allocation45_spill] sm:$0xff]  ;;  %v5441_v18 = vld [vmem:[#allocation30_spill] sm:$0xff] }
 0x291   : > { %v1821_v1 = vmax.f32 %v1801_v59, 0.0 }
 0x292   : > { %v1593_v5 = vadd.f32 %v5422_v0, %v1392_v33  ;;  %v1315_v33 = vadd.f32 %v1267_v40, %v1235_v17  ;;  %v5443_v17 = vld [vmem:[#allocation12_spill] sm:$0xff] }
 0x293   : > { %v1646_v24 = vpop.permute.xlu0 %1645  ;;  %v1837_v61 = vpack.c.bf16 %v1821_v1, %v1820_v37  ;;  %v5434_v1 = vld [vmem:[#allocation37_spill] sm:$0xff] }
 0x294   : > { %v1343_v44 = vpop.permute.xlu1 %1342  ;;  %v1693_v26 = vadd.f32 %v1642_v12, %v1593_v5  ;;  %v1314_v12 = vadd.f32 %v1265_v52, %v1234_v39  ;;  %v1042_v0 = vadd.f32 %v5434_v1, %v5433_v28  ;;  %v5446_v28 = vld [vmem:[#allocation52_spill] sm:$0xff] }
 0x295   : > { %1857 = vst.msk [vmem:[#allocation3 + $0x30] sm:$0xff] %vm458_vm1, %v1837_v61  ;;  %v1393_v20 = vadd.f32 %v1343_v44, %v1313_v41  ;;  %v5435_v61 = vld [vmem:[#allocation46_spill] sm:$0xff] }
 0x296   : > { %v1124_v44 = vadd.f32 %v5435_v61, %v1042_v0  ;;  %v5448_v61 = vld [vmem:[#allocation48_spill] sm:$0xff] }
 0x297   : > { %v1724_v34 = vpop.permute.xlu0 %1723  ;;  %v1594_v57 = vadd.f32 %v5426_v58, %v1393_v20 }
 0x298   : > { %v1775_v43 = vadd.f32 %v1724_v34, %v1693_v26  ;;  %v1648_v16 = vpop.permute.xlu1 %1647  ;;  %v5437_v34 = vld [vmem:[#allocation11_spill] sm:$0xff]  ;;  %v1236_v58 = vadd.f32 %v5439_v38, %v1124_v44  ;;  %v5449_v44 = vld [vmem:[#allocation33_spill] sm:$0xff] }
 0x299   : > { %v1694_v50 = vadd.f32 %v1644_v42, %v1594_v57  ;;  %v1043_v40 = vadd.f32 %v5438_v3, %v5437_v34  ;;  %v5450_v3 = vld [vmem:[#allocation53_spill] sm:$0xff] }
 0x29a   : > { %v1802_v62 = vadd.f32 %v4441_v56, %v1775_v43 }
 0x29b   : > { %v1269_v8 = vpop.permute.xlu0 %1268  ;;  %v1125_v6 = vadd.f32 %v5440_v4, %v1043_v40 }
 0x29c   : > { %v1726_v23 = vpop.permute.xlu1 %1725  ;;  %v1822_v36 = vmax.f32 %v1802_v62, 0.0 }
 0x29d   : > { %v1776_v48 = vadd.f32 %v1726_v23, %v1694_v50 }
 0x29f   : > { %v1345_v22 = vpop.permute.xlu0 %1344  ;;  %v1803_v60 = vadd.f32 %v4441_v56, %v1776_v48 }
 0x2a0   : > { %v1394_v55 = vadd.f32 %v1345_v22, %v1314_v12  ;;  %v1271_v30 = vpop.permute.xlu1 %1270  ;;  %v1237_v12 = vadd.f32 %v5441_v18, %v1125_v6  ;;  %v5442_v22 = vld [vmem:[#allocation50_spill] sm:$0xff]  ;;  %v5451_v6 = vld [vmem:[#allocation40_spill] sm:$0xff] }
 0x2a1   : > { %v1823_v9 = vmax.f32 %v1803_v60, 0.0 }
 0x2a2   : > { %v1595_v37 = vadd.f32 %v5432_v19, %v1394_v55  ;;  %v1317_v55 = vadd.f32 %v1271_v30, %v1237_v12 }
 0x2a3   : > { %v1650_v59 = vpop.permute.xlu0 %1649  ;;  %v1838_v63 = vpack.c.bf16 %v1823_v9, %v1822_v36  ;;  %v5444_v9 = vld [vmem:[#allocation44_spill] sm:$0xff] }
 0x2a4   : > { %v1347_v42 = vpop.permute.xlu1 %1346  ;;  %v1695_v5 = vadd.f32 %v1646_v24, %v1595_v37  ;;  %v1316_v24 = vadd.f32 %v1269_v8, %v1236_v58  ;;  %v1044_v19 = vadd.f32 %v5444_v9, %v5443_v17 }
 0x2a5   : > { %1858 = vst.msk [vmem:[#allocation3 + $0x40] sm:$0xff] %vm458_vm1, %v1838_v63  ;;  %v1395_v52 = vadd.f32 %v1347_v42, %v1315_v33  ;;  %v5445_v63 = vld [vmem:[#allocation51_spill] sm:$0xff] }
 0x2a6   : > { %v1126_v42 = vadd.f32 %v5445_v63, %v1044_v19 }
 0x2a7   : > { %v1728_v41 = vpop.permute.xlu0 %1727  ;;  %v1596_v47 = vadd.f32 %v5436_v2, %v1395_v52 }
 0x2a8   : > { %v1777_v51 = vadd.f32 %v1728_v41, %v1695_v5  ;;  %v1652_v20 = vpop.permute.xlu1 %1651  ;;  %v5447_v41 = vld [vmem:[#allocation13_spill] sm:$0xff]  ;;  %v1238_v2 = vadd.f32 %v5449_v44, %v1126_v42 }
 0x2a9   : > { %v1696_v43 = vadd.f32 %v1648_v16, %v1596_v47  ;;  %v1045_v30 = vadd.f32 %v5448_v61, %v5447_v41 }
 0x2aa   : > { %v1804_v57 = vadd.f32 %v4441_v56, %v1777_v51 }
 0x2ab   : > { %v1273_v26 = vpop.permute.xlu0 %1272  ;;  %v1127_v40 = vadd.f32 %v5450_v3, %v1045_v30 }
 0x2ac   : > { %v1730_v29 = vpop.permute.xlu1 %1729  ;;  %v1824_v62 = vmax.f32 %v1804_v57, 0.0 }
 0x2ad   : > { %v1778_v32 = vadd.f32 %v1730_v29, %v1696_v43 }
 0x2af   : > { %v1349_v39 = vpop.permute.xlu0 %1348  ;;  %v1805_v50 = vadd.f32 %v4441_v56, %v1778_v32 }
 0x2b0   : > { %v1396_v23 = vadd.f32 %v1349_v39, %v1316_v24  ;;  %v1275_v46 = vpop.permute.xlu1 %1274  ;;  %v1239_v24 = vadd.f32 %v5451_v6, %v1127_v40 }
 0x2b1   : > { %v1825_v48 = vmax.f32 %v1805_v50, 0.0 }
 0x2b2   : > { %v1597_v36 = vadd.f32 %v5442_v22, %v1396_v23  ;;  %v1319_v50 = vadd.f32 %v1275_v46, %v1239_v24 }
 0x2b3   : > { %v1654_v60 = vpop.permute.xlu0 %1653  ;;  %v1839_v54 = vpack.c.bf16 %v1825_v48, %v1824_v62 }
 0x2b4   : > { %v1351_v16 = vpop.permute.xlu1 %1350  ;;  %v1697_v37 = vadd.f32 %v1650_v59, %v1597_v36  ;;  %v1318_v59 = vadd.f32 %v1273_v26, %v1238_v2 }
 0x2b5   : > { %1859 = vst.msk [vmem:[#allocation3 + $0x50] sm:$0xff] %vm458_vm1, %v1839_v54  ;;  %v1397_v8 = vadd.f32 %v1351_v16, %v1317_v55  ;;  %v5452_v54 = vld [vmem:[#allocation54_spill] sm:$0xff] }
 0x2b6   : > { %v1240_v16 = vadd.f32 %v4223_v27, %v5452_v54 }
 0x2b7   : > { %v1732_v33 = vpop.permute.xlu0 %1731  ;;  %v1598_v1 = vadd.f32 %v5446_v28, %v1397_v8  ;;  %v1242_v8 = vadd.f32 %v4266_v53, %v4357_v10  ;;  %v1241_v28 = vadd.f32 %v4247_v45, %v4375_v7 }
 0x2b8   : > { %v1779_v0 = vadd.f32 %v1732_v33, %v1697_v37  ;;  %v1656_v52 = vpop.permute.xlu1 %1655 }
 0x2b9   : > { %v1698_v51 = vadd.f32 %v1652_v20, %v1598_v1 }
 0x2ba   : > { %v1806_v47 = vadd.f32 %v4441_v56, %v1779_v0 }
 0x2bb   : > { %v1277_v5 = vpop.permute.xlu0 %1276 }
 0x2bc   : > { %v1734_v34 = vpop.permute.xlu1 %1733  ;;  %v1826_v57 = vmax.f32 %v1806_v47, 0.0  ;;  %v1320_v46 = vadd.f32 %v1277_v5, %v1240_v16 }
 0x2bd   : > { %v1780_v38 = vadd.f32 %v1734_v34, %v1698_v51 }
 0x2bf   : > { %v1353_v58 = vpop.permute.xlu0 %1352  ;;  %v1807_v43 = vadd.f32 %v4441_v56, %v1780_v38 }
 0x2c0   : > { %v1398_v29 = vadd.f32 %v1353_v58, %v1318_v59  ;;  %v1279_v4 = vpop.permute.xlu1 %1278 }
 0x2c1   : > { %v1827_v32 = vmax.f32 %v1807_v43, 0.0 }
 0x2c2   : > { %v1599_v39 = vadd.f32 %v4327_v13, %v1398_v29 }
 0x2c3   : > { %v1658_v62 = vpop.permute.xlu0 %1657  ;;  %v1840_v23 = vpack.c.bf16 %v1827_v32, %v1826_v57 }
 0x2c4   : > { %v1355_v20 = vpop.permute.xlu1 %1354  ;;  %v1699_v26 = vadd.f32 %v1654_v60, %v1599_v39 }
 0x2c5   : > { %1860 = vst.msk [vmem:[#allocation3 + $0x60] sm:$0xff] %vm458_vm1, %v1840_v23  ;;  %v1399_v18 = vadd.f32 %v1355_v20, %v1319_v50 }
 0x2c7   : > { %v1736_v12 = vpop.permute.xlu0 %1735  ;;  %v1600_v48 = vadd.f32 %v4343_v49, %v1399_v18 }
 0x2c8   : > { %v1781_v22 = vadd.f32 %v1736_v12, %v1699_v26  ;;  %v1660_v36 = vpop.permute.xlu1 %1659 }
 0x2c9   : > { %v1700_v13 = vadd.f32 %v1656_v52, %v1600_v48  ;;  %v1321_v52 = vadd.f32 %v1279_v4, %v1241_v28 }
 0x2ca   : > { %v1808_v17 = vadd.f32 %v4441_v56, %v1781_v22 }
 0x2cb   : > { %v1281_v55 = vpop.permute.xlu0 %1280 }
 0x2cc   : > { %v1738_v9 = vpop.permute.xlu1 %1737  ;;  %v1828_v60 = vmax.f32 %v1808_v17, 0.0  ;;  %v1322_v49 = vadd.f32 %v1281_v55, %v1242_v8 }
 0x2cd   : > { %v1782_v19 = vadd.f32 %v1738_v9, %v1700_v13 }
 0x2ce   : > { %v1402_v41 = vadd.f32 %v4365_v11, %v1322_v49 }
 0x2cf   : > { %v1357_v37 = vpop.permute.xlu0 %1356  ;;  %v1809_v33 = vadd.f32 %v4441_v56, %v1782_v19 }
 0x2d0   : > { %v1400_v63 = vadd.f32 %v1357_v37, %v1320_v46  ;;  %v1283_v42 = vpop.permute.xlu1 %1282  ;;  %v1603_v45 = vadd.f32 %v4414_v25, %v1402_v41 }
 0x2d1   : > { %v1829_v27 = vmax.f32 %v1809_v33, 0.0  ;;  %v1323_v53 = vadd.f32 %v1283_v42, %v4378_v15 }
 0x2d2   : > { %v1601_v1 = vadd.f32 %v4371_v31, %v1400_v63  ;;  %v5453_v31 = vld [vmem:[#allocation55_spill] sm:$0xff] }
 0x2d3   : > { %v1662_v0 = vpop.permute.xlu0 %1661  ;;  %v1841_v5 = vpack.c.bf16 %v1829_v27, %v1828_v60  ;;  %v1403_v51 = vadd.f32 %v5453_v31, %v1323_v53 }
 0x2d4   : > { %v1359_v61 = vpop.permute.xlu1 %1358  ;;  %v1701_v30 = vadd.f32 %v1658_v62, %v1601_v1  ;;  %v1703_v34 = vadd.f32 %v1662_v0, %v1603_v45 }
 0x2d5   : > { %1861 = vst.msk [vmem:[#allocation3 + $0x70] sm:$0xff] %vm458_vm1, %v1841_v5  ;;  %v1401_v10 = vadd.f32 %v1359_v61, %v1321_v52  ;;  %v1604_v15 = vadd.f32 %v4431_v21, %v1403_v51  ;;  %v3409_v21 = vmov (!%p3149_p13), 0  }
 0x2d6   : > { %1868 = vst.msk [vmem:[#allocation3] sm:$0xff] (!%p3149_p13), %vm458_vm1, %v3409_v21  ;;  %1869 = vst.msk [vmem:[#allocation3 + $0x8] sm:$0xff] (!%p3149_p13), %vm458_vm1, %v3409_v21 }
 0x2d7   : > { %v1740_v44 = vpop.permute.xlu0 %1739  ;;  %v1602_v2 = vadd.f32 %v4391_v14, %v1401_v10 }
 0x2d8   : > { %v1783_v7 = vadd.f32 %v1740_v44, %v1701_v30  ;;  %v1664_v47 = vpop.permute.xlu1 %1663 }
 0x2d9   : > { %v1702_v40 = vadd.f32 %v1660_v36, %v1602_v2  ;;  %v1704_v57 = vadd.f32 %v1664_v47, %v1604_v15 }
 0x2da   : > { %v1810_v11 = vadd.f32 %v4441_v56, %v1783_v7 }
 0x2db   : > { %v1744_v3 = vpop.permute.xlu0 %1743 }
 0x2dc   : > { %v1785_v59 = vadd.f32 %v1744_v3, %v1703_v34  ;;  %v1742_v38 = vpop.permute.xlu1 %1741  ;;  %v1830_v43 = vmax.f32 %v1810_v11, 0.0 }
 0x2dd   : > { %v1784_v58 = vadd.f32 %v1742_v38, %v1702_v40 }
 0x2de   : > { %v1812_v25 = vadd.f32 %v4441_v56, %v1785_v59 }
 0x2df   : > { %v1811_v14 = vadd.f32 %v4441_v56, %v1784_v58 }
 0x2e0   : > { %v1746_v29 = vpop.permute.xlu1 %1745  ;;  %v1832_v32 = vmax.f32 %v1812_v25, 0.0 }
 0x2e1   : > { %v1831_v4 = vmax.f32 %v1811_v14, 0.0  ;;  %v1786_v6 = vadd.f32 %v1746_v29, %v1704_v57 }
 0x2e3   : > { %v1842_v24 = vpack.c.bf16 %v1831_v4, %v1830_v43  ;;  %v1813_v39 = vadd.f32 %v4441_v56, %v1786_v6  ;;  %1867 = sbr.rel (%p3149_p13) target bundleno = 746 (0x2ea), region = 52 }
 0x2e5   : > { %1862 = vst.msk [vmem:[#allocation3 + $0x80] sm:$0xff] %vm458_vm1, %v1842_v24  ;;  %v1833_v62 = vmax.f32 %v1813_v39, 0.0 }
 0x2e7   : > { %v1843_v50 = vpack.c.bf16 %v1833_v62, %v1832_v32 }
 0x2e9   : > { %1863 = vst.msk [vmem:[#allocation3 + $0x90] sm:$0xff] %vm458_vm1, %v1843_v50 }
 0x2ea PF: > { %p3150_p0 = scmp.ne.s32.totalorder %s3386_s24, 1 }
 0x2eb   : > { %v3410_v23 = vmov (!%p3150_p0), 0  }
 0x2ec   : > { %1873 = sbr.rel (%p3150_p0) target bundleno = 755 (0x2f3), region = 56  ;;  %1875 = vst.msk [vmem:[#allocation3 + $0x90] sm:$0xff] (!%p3150_p0), %vm458_vm1, %v3410_v23  ;;  %1876 = vst.msk [vmem:[#allocation3 + $0x98] sm:$0xff] (!%p3150_p0), %vm458_vm1, %v3410_v23 }
 0x2f3 PF: > { %v1897_v56 = vld [vmem:[%s5294_s5] sm:$0xf]  ;;  %v1878_v26 = vld [vmem:[#allocation3 + $0x8] sm:$0xff]  ;;  %v1879_v12 = vld [vmem:[#allocation3 + $0x10] sm:$0xff] }
 0x2f4   : > { %v1877_v20 = vld [vmem:[#allocation3] sm:$0xff]  ;;  %3316 = vmatprep.subr.msk.bf16.mxu1 %vm658_vm0, %v1897_v56  ;;  %v1959_v18 = vsel %vm658_vm0, %v1897_v56, 0  ;;  %v1880_v48 = vld [vmem:[#allocation3 + $0x18] sm:$0xff]  ;;  %v1882_v36 = vld [vmem:[#allocation3 + $0x28] sm:$0xff] }
 0x2f5   : > { %3272 = vmatprep.mubr.msk.bf16.mxu1 %vm458_vm1, %v1877_v20  ;;  %3271 = vmatpush3.bf16.msra.mxu1 %v1959_v18  ;;  %v1881_v22 = vld [vmem:[#allocation3 + $0x20] sm:$0xff]  ;;  %v1883_v55 = vld [vmem:[#allocation3 + $0x30] sm:$0xff]  ;;  %v1884_v54 = vld [vmem:[#allocation3 + $0x38] sm:$0xff] }
 0x2f6   : > { %v1885_v16 = vld [vmem:[#allocation3 + $0x40] sm:$0xff]  ;;  %v1886_v17 = vld [vmem:[#allocation3 + $0x48] sm:$0xff]  ;;  %v1887_v13 = vld [vmem:[#allocation3 + $0x50] sm:$0xff] }
 0x2f7   : > { %v1888_v9 = vld [vmem:[#allocation3 + $0x58] sm:$0xff]  ;;  %v1889_v46 = vld [vmem:[#allocation3 + $0x60] sm:$0xff]  ;;  %v1890_v19 = vld [vmem:[#allocation3 + $0x68] sm:$0xff] }
 0x2f8   : > { %3273 = vmatmul.mubr.msk.bf16.vlgmr.msra.gmra.mrb[4].mxu1 %vm458_vm1, %v1878_v26  ;;  %v1891_v8 = vld [vmem:[#allocation3 + $0x70] sm:$0xff]  ;;  %v1892_v37 = vld [vmem:[#allocation3 + $0x78] sm:$0xff]  ;;  %v1893_v60 = vld [vmem:[#allocation3 + $0x80] sm:$0xff] }
 0x2f9   : > { %3276 = vmatprep.mubr.msk.bf16.mxu1 %vm458_vm1, %v1879_v12  ;;  %v1894_v33 = vld [vmem:[#allocation3 + $0x88] sm:$0xff]  ;;  %v1895_v49 = vld [vmem:[#allocation3 + $0x90] sm:$0xff]  ;;  %v1896_v63 = vld [vmem:[#allocation3 + $0x98] sm:$0xff] }
 0x300   : > { %3277 = vmatmul.mubr.msk.bf16.gmra.mrb[8].mxu1 %vm458_vm1, %v1880_v48 }
 0x301   : > { %3280 = vmatprep.mubr.msk.bf16.mxu1 %vm458_vm1, %v1881_v22 }
 0x308   : > { %3281 = vmatmul.mubr.msk.bf16.gmra.mrb[12].mxu1 %vm458_vm1, %v1882_v36 }
 0x309   : > { %3284 = vmatprep.mubr.msk.bf16.mxu1 %vm458_vm1, %v1883_v55 }
 0x310   : > { %3285 = vmatmul.mubr.msk.bf16.gmra.mrb[16].mxu1 %vm458_vm1, %v1884_v54 }
 0x311   : > { %3288 = vmatprep.mubr.msk.bf16.mxu1 %vm458_vm1, %v1885_v16 }
 0x318   : > { %3289 = vmatmul.mubr.msk.bf16.gmra.mrb[20].mxu1 %vm458_vm1, %v1886_v17 }
 0x319   : > { %3292 = vmatprep.mubr.msk.bf16.mxu1 %vm458_vm1, %v1887_v13 }
 0x320   : > { %3293 = vmatmul.mubr.msk.bf16.gmra.mrb[24].mxu1 %vm458_vm1, %v1888_v9 }
 0x321   : > { %3296 = vmatprep.mubr.msk.bf16.mxu1 %vm458_vm1, %v1889_v46 }
 0x328   : > { %3297 = vmatmul.mubr.msk.bf16.gmra.mrb[28].mxu1 %vm458_vm1, %v1890_v19 }
 0x329   : > { %3300 = vmatprep.mubr.msk.bf16.mxu1 %vm458_vm1, %v1891_v8 }
 0x330   : > { %3301 = vmatmul.mubr.msk.bf16.gmra.mrb[32].mxu1 %vm458_vm1, %v1892_v37 }
 0x331   : > { %3304 = vmatprep.mubr.msk.bf16.mxu1 %vm458_vm1, %v1893_v60 }
 0x338   : > { %3305 = vmatmul.mubr.msk.bf16.gmra.mrb[36].mxu1 %vm458_vm1, %v1894_v33 }
 0x339   : > { %3308 = vmatprep.mubr.msk.bf16.mxu1 %vm458_vm1, %v1895_v49 }
 0x340   : > { %3309 = vmatmul.mubr.msk.bf16.gmra.mrb[40].mxu1 %vm458_vm1, %v1896_v63 }
 0x3cb   : > { %v3274_v42 = vpop.f32.mrb[4].mxu1 }
 0x3cc   : > { %2584 = vrot.lane.b32.xlu1 %v3274_v42, %s3405_s13  ;;  %v4615_v28 = vpop.f32.mrb[5].mxu1 }
 0x3cd   : > { %2370 = vrot.lane.b32.xlu0 %v4615_v28, %s3406_s11  ;;  %v3275_v27 = vpop.f32.mrb[6].mxu1  ;;  %v2154_v0 = vrot.slane %v4615_v28, 7 }
 0x3ce   : > { %v1998_v1 = vpop.f32.mrb[7].mxu1  ;;  %v2156_v53 = vrot.slane %v3275_v27, 7 }
 0x3cf   : > { %v2155_v52 = vrot.slane %v1998_v1, 7 }
 0x3d0   : > { %2580 = vrot.lane.b32.xlu1 %v4615_v28, %s3405_s13 }
 0x3d1   : > { %2582 = vrot.lane.b32.xlu0 %v1998_v1, %s3405_s13  ;;  %v4627_v5 = vsel %vm925_vm4, %v2154_v0, %v2155_v52 }
 0x3d3   : > { %v3278_v41 = vpop.f32.mrb[8].mxu1 }
 0x3d4   : > { %2372 = vrot.lane.b32.xlu1 %v1998_v1, %s3406_s11  ;;  %v2011_v61 = vpop.f32.mrb[9].mxu1 }
 0x3d5   : > { %2374 = vrot.lane.b32.xlu0 %v2011_v61, %s3406_s11  ;;  %v3279_v10 = vpop.f32.mrb[10].mxu1  ;;  %v2157_v30 = vrot.slane %v2011_v61, 7 }
 0x3d6   : > { %v2014_v44 = vpop.f32.mrb[11].mxu1  ;;  %v2159_v51 = vrot.slane %v3279_v10, 7 }
 0x3d7   : > { %v4633_v2 = vsel %vm925_vm4, %v2156_v53, %v2157_v30  ;;  %v2158_v45 = vrot.slane %v2014_v44, 7 }
 0x3d8   : > { %2590 = vrot.lane.b32.xlu1 %v3278_v41, %s3405_s13 }
 0x3d9   : > { %2588 = vrot.lane.b32.xlu0 %v2014_v44, %s3405_s13  ;;  %v4639_v7 = vsel %vm925_vm4, %v2157_v30, %v2158_v45 }
 0x3db   : > { %v3282_v47 = vpop.f32.mrb[12].mxu1 }
 0x3dc   : > { %2586 = vrot.lane.b32.xlu1 %v2011_v61, %s3405_s13  ;;  %v2027_v31 = vpop.f32.mrb[13].mxu1 }
 0x3dd   : > { %v2160_v34 = vrot.slane %v2027_v31, 7  ;;  %2220 = vrot.lane.b32.xlu0 %v4633_v2, %s3408_s14  ;;  %v3283_v3 = vpop.f32.mrb[14].mxu1 }
 0x3de   : > { %v2030_v11 = vpop.f32.mrb[15].mxu1  ;;  %v2162_v57 = vrot.slane %v3283_v3, 7 }
 0x3df   : > { %v2161_v40 = vrot.slane %v2030_v11, 7  ;;  %v4646_v59 = vsel %vm925_vm4, %v2159_v51, %v2160_v34 }
 0x3e0   : > { %2376 = vrot.lane.b32.xlu1 %v2014_v44, %s3406_s11 }
 0x3e1   : > { %2222 = vrot.lane.b32.xlu0 %v4639_v7, %s3408_s14  ;;  %v4653_v38 = vsel %vm925_vm4, %v2160_v34, %v2161_v40 }
 0x3e3   : > { %v3286_v15 = vpop.f32.mrb[16].mxu1 }
 0x3e4   : > { %2380 = vrot.lane.b32.xlu1 %v2030_v11, %s3406_s11  ;;  %v2043_v58 = vpop.f32.mrb[17].mxu1 }
 0x3e5   : > { %v2163_v43 = vrot.slane %v2043_v58, 7  ;;  %2596 = vrot.lane.b32.xlu0 %v3282_v47, %s3405_s13  ;;  %v3287_v14 = vpop.f32.mrb[18].mxu1 }
 0x3e6   : > { %v2046_v25 = vpop.f32.mrb[19].mxu1  ;;  %v2165_v24 = vrot.slane %v3287_v14, 7 }
 0x3e7   : > { %v2164_v29 = vrot.slane %v2046_v25, 7  ;;  %v4659_v4 = vsel %vm925_vm4, %v2162_v57, %v2163_v43 }
 0x3e8   : > { %2594 = vrot.lane.b32.xlu1 %v2030_v11, %s3405_s13 }
 0x3e9   : > { %2378 = vrot.lane.b32.xlu0 %v2027_v31, %s3406_s11  ;;  %v4665_v6 = vsel %vm925_vm4, %v2163_v43, %v2164_v29 }
 0x3ea   : > { %5454 = vst [vmem:[#allocation23_spill] sm:$0xff] %v4665_v6 }
 0x3eb   : > { %v3290_v32 = vpop.f32.mrb[20].mxu1 }
 0x3ec   : > { %2224 = vrot.lane.b32.xlu1 %v4646_v59, %s3408_s14  ;;  %v2059_v39 = vpop.f32.mrb[21].mxu1 }
 0x3ed   : > { %2592 = vrot.lane.b32.xlu0 %v2027_v31, %s3405_s13  ;;  %v2166_v62 = vrot.slane %v2059_v39, 7  ;;  %v3291_v50 = vpop.f32.mrb[22].mxu1 }
 0x3ee   : > { %v2062_v21 = vpop.f32.mrb[23].mxu1  ;;  %v2168_v18 = vrot.slane %v3291_v50, 7 }
 0x3ef   : > { %v2167_v23 = vrot.slane %v2062_v21, 7  ;;  %v4672_v56 = vsel %vm925_vm4, %v2165_v24, %v2166_v62 }
 0x3f0   : > { %5455 = vst [vmem:[#allocation4_spill] sm:$0xff] %v4672_v56  ;;  %2226 = vrot.lane.b32.xlu1 %v4653_v38, %s3408_s14 }
 0x3f1   : > { %2286 = vrot.lane.b32.xlu0 %v4646_v59, %s3407_s12  ;;  %v4680_v20 = vsel %vm925_vm4, %v2166_v62, %v2167_v23 }
 0x3f2   : > { %5456 = vst [vmem:[#allocation17_spill] sm:$0xff] %v4680_v20 }
 0x3f3   : > { %v4682_v26 = vpop.f32.mrb[24].mxu1 }
 0x3f4   : > { %2288 = vrot.lane.b32.xlu1 %v4653_v38, %s3407_s12  ;;  %v4686_v12 = vpop.f32.mrb[25].mxu1 }
 0x3f5   : > { %2382 = vrot.lane.b32.xlu0 %v2043_v58, %s3406_s11  ;;  %v2169_v48 = vrot.slane %v4686_v12, 7  ;;  %v3295_v22 = vpop.f32.mrb[26].mxu1 }
 0x3f6   : > { %v4690_v36 = vpop.f32.mrb[27].mxu1  ;;  %v2171_v17 = vrot.slane %v3295_v22, 7 }
 0x3f7   : > { %v2170_v55 = vrot.slane %v4690_v36, 7  ;;  %v4695_v54 = vsel %vm925_vm4, %v2168_v18, %v2169_v48 }
 0x3f8   : > { %2602 = vrot.lane.b32.xlu1 %v3286_v15, %s3405_s13 }
 0x3f9   : > { %2600 = vrot.lane.b32.xlu0 %v2046_v25, %s3405_s13  ;;  %v4701_v16 = vsel %vm925_vm4, %v2169_v48, %v2170_v55 }
 0x3fb   : > { %v3298_v13 = vpop.f32.mrb[28].mxu1 }
 0x3fc   : > { %2598 = vrot.lane.b32.xlu1 %v2043_v58, %s3405_s13  ;;  %v2091_v9 = vpop.f32.mrb[29].mxu1 }
 0x3fd   : > { %2228 = vrot.lane.b32.xlu0 %v4659_v4, %s3408_s14  ;;  %v2172_v46 = vrot.slane %v2091_v9, 7  ;;  %v3299_v19 = vpop.f32.mrb[30].mxu1 }
 0x3fe   : > { %v2094_v8 = vpop.f32.mrb[31].mxu1  ;;  %v2174_v49 = vrot.slane %v3299_v19, 7 }
 0x3ff   : > { %v2173_v37 = vrot.slane %v2094_v8, 7  ;;  %v4708_v60 = vsel %vm925_vm4, %v2171_v17, %v2172_v46 }
 0x400   : > { %2384 = vrot.lane.b32.xlu1 %v2046_v25, %s3406_s11 }
 0x401   : > { %2290 = vrot.lane.b32.xlu0 %v4659_v4, %s3407_s12  ;;  %v4715_v33 = vsel %vm925_vm4, %v2172_v46, %v2173_v37 }
 0x403   : > { %v3302_v63 = vpop.f32.mrb[32].mxu1 }
 0x404   : > { %2230 = vrot.lane.b32.xlu1 %v4665_v6, %s3408_s14  ;;  %v2107_v42 = vpop.f32.mrb[33].mxu1 }
 0x405   : > { %2608 = vrot.lane.b32.xlu0 %v3290_v32, %s3405_s13  ;;  %v2175_v27 = vrot.slane %v2107_v42, 7  ;;  %v3303_v1 = vpop.f32.mrb[34].mxu1 }
 0x406   : > { %v2110_v52 = vpop.f32.mrb[35].mxu1  ;;  %v2177_v10 = vrot.slane %v3303_v1, 7 }
 0x407   : > { %v2176_v41 = vrot.slane %v2110_v52, 7  ;;  %v4722_v61 = vsel %vm925_vm4, %v2174_v49, %v2175_v27 }
 0x408   : > { %2292 = vrot.lane.b32.xlu1 %v4665_v6, %s3407_s12 }
 0x409   : > { %2386 = vrot.lane.b32.xlu0 %v2059_v39, %s3406_s11  ;;  %v4729_v53 = vsel %vm925_vm4, %v2175_v27, %v2176_v41 }
 0x40b   : > { %v3306_v30 = vpop.f32.mrb[36].mxu1 }
 0x40c   : > { %2388 = vrot.lane.b32.xlu1 %v2062_v21, %s3406_s11  ;;  %v4732_v44 = vpop.f32.mrb[37].mxu1 }
 0x40d   : > { %2604 = vrot.lane.b32.xlu0 %v2059_v39, %s3405_s13  ;;  %v3307_v45 = vpop.f32.mrb[38].mxu1  ;;  %v2178_v47 = vrot.slane %v4732_v44, 7 }
 0x40e   : > { %v4736_v31 = vpop.f32.mrb[39].mxu1  ;;  %v2180_v11 = vrot.slane %v3307_v45, 7 }
 0x40f   : > { %v4740_v51 = vsel %vm925_vm4, %v2177_v10, %v2178_v47  ;;  %v2179_v34 = vrot.slane %v4736_v31, 7 }
 0x410   : > { %2606 = vrot.lane.b32.xlu1 %v2062_v21, %s3405_s13 }
 0x411   : > { %2232 = vrot.lane.b32.xlu0 %v4672_v56, %s3408_s14  ;;  %v4748_v3 = vsel %vm925_vm4, %v2178_v47, %v2179_v34 }
 0x413   : > { %v4750_v40 = vpop.f32.mrb[40].mxu1 }
 0x414   : > { %2234 = vrot.lane.b32.xlu1 %v4680_v20, %s3408_s14  ;;  %v4754_v15 = vpop.f32.mrb[41].mxu1 }
 0x415   : > { %2294 = vrot.lane.b32.xlu0 %v4672_v56, %s3407_s12  ;;  %v3311_v58 = vpop.f32.mrb[42].mxu1  ;;  %v2181_v57 = vrot.slane %v4754_v15, 7 }
 0x416   : > { %v2183_v43 = vrot.slane %v3311_v58, 7  ;;  %v4759_v14 = vpop.f32.mrb[43].mxu1 }
 0x417   : > { %v2182_v25 = vrot.slane %v4759_v14, 7  ;;  %v4764_v29 = vsel %vm925_vm4, %v2180_v11, %v2181_v57 }
 0x418   : > { %v4770_v24 = vsel %vm925_vm4, %v2183_v43, %v2154_v0  ;;  %2296 = vrot.lane.b32.xlu1 %v4680_v20, %s3407_s12 }
 0x419   : > { %2390 = vrot.lane.b32.xlu0 %v4686_v12, %s3406_s11  ;;  %v4778_v32 = vsel %vm925_vm4, %v2181_v57, %v2182_v25 }
 0x41c   : > { %2614 = vrot.lane.b32.xlu1 %v4682_v26, %s3405_s13 }
 0x41d   : > { %2612 = vrot.lane.b32.xlu0 %v4690_v36, %s3405_s13 }
 0x420   : > { %2610 = vrot.lane.b32.xlu1 %v4686_v12, %s3405_s13 }
 0x421   : > { %2236 = vrot.lane.b32.xlu0 %v4695_v54, %s3408_s14 }
 0x424   : > { %2392 = vrot.lane.b32.xlu1 %v4690_v36, %s3406_s11 }
 0x425   : > { %2298 = vrot.lane.b32.xlu0 %v4695_v54, %s3407_s12 }
 0x428   : > { %2238 = vrot.lane.b32.xlu1 %v4701_v16, %s3408_s14 }
 0x429   : > { %2620 = vrot.lane.b32.xlu0 %v3298_v13, %s3405_s13 }
 0x42c   : > { %2300 = vrot.lane.b32.xlu1 %v4701_v16, %s3407_s12 }
 0x42d   : > { %2394 = vrot.lane.b32.xlu0 %v2091_v9, %s3406_s11 }
 0x430   : > { %2396 = vrot.lane.b32.xlu1 %v2094_v8, %s3406_s11 }
 0x431   : > { %2616 = vrot.lane.b32.xlu0 %v2091_v9, %s3405_s13 }
 0x434   : > { %2618 = vrot.lane.b32.xlu1 %v2094_v8, %s3405_s13 }
 0x435   : > { %2240 = vrot.lane.b32.xlu0 %v4708_v60, %s3408_s14 }
 0x438   : > { %2242 = vrot.lane.b32.xlu1 %v4715_v33, %s3408_s14 }
 0x439   : > { %2302 = vrot.lane.b32.xlu0 %v4708_v60, %s3407_s12 }
 0x43c   : > { %2304 = vrot.lane.b32.xlu1 %v4715_v33, %s3407_s12 }
 0x43d   : > { %2398 = vrot.lane.b32.xlu0 %v2107_v42, %s3406_s11 }
 0x43e   : > { %v4810_v28 = vpop.permute.xlu1 %2584 }
 0x43f   : > { %v4812_v0 = vpop.permute.xlu0 %2370 }
 0x440   : > { %2626 = vrot.lane.b32.xlu1 %v3302_v63, %s3405_s13 }
 0x441   : > { %2624 = vrot.lane.b32.xlu0 %v2110_v52, %s3405_s13 }
 0x442   : > { %v4816_v39 = vpop.permute.xlu1 %2580 }
 0x443   : > { %v4818_v62 = vpop.permute.xlu0 %2582 }
 0x444   : > { %2622 = vrot.lane.b32.xlu1 %v2107_v42, %s3405_s13 }
 0x445   : > { %2244 = vrot.lane.b32.xlu0 %v4722_v61, %s3408_s14 }
 0x446   : > { %v4823_v50 = vpop.permute.xlu1 %2372 }
 0x447   : > { %v4825_v21 = vpop.permute.xlu0 %2374 }
 0x448   : > { %2400 = vrot.lane.b32.xlu1 %v2110_v52, %s3406_s11 }
 0x449   : > { %2306 = vrot.lane.b32.xlu0 %v4722_v61, %s3407_s12 }
 0x44a   : > { %v2591_v23 = vpop.permute.xlu1 %2590 }
 0x44b   : > { %v2589_v18 = vpop.permute.xlu0 %2588 }
 0x44c   : > { %2246 = vrot.lane.b32.xlu1 %v4729_v53, %s3408_s14  ;;  %v2674_v1 = vrot.slane %v2589_v18, 1 }
 0x44d   : > { %2632 = vrot.lane.b32.xlu0 %v3306_v30, %s3405_s13 }
 0x44e   : > { %v2587_v26 = vpop.permute.xlu1 %2586 }
 0x44f   : > { %v4833_v12 = vpop.permute.xlu0 %2220  ;;  %v2673_v27 = vrot.slane %v2587_v26, 1 }
 0x450   : > { %2308 = vrot.lane.b32.xlu1 %v4729_v53, %s3407_s12 }
 0x451   : > { %2402 = vrot.lane.b32.xlu0 %v4732_v44, %s3406_s11  ;;  %v4891_v10 = vsel %vm1560_vm5, %v2673_v27, %v2674_v1 }
 0x452   : > { %v4839_v48 = vpop.permute.xlu1 %2376 }
 0x453   : > { %v4841_v22 = vpop.permute.xlu0 %2222 }
 0x454   : > { %2404 = vrot.lane.b32.xlu1 %v4736_v31, %s3406_s11 }
 0x455   : > { %2628 = vrot.lane.b32.xlu0 %v4732_v44, %s3405_s13  ;;  %v2675_v44 = vrot.slane %v2591_v23, 1 }
 0x456   : > { %v4847_v36 = vpop.permute.xlu1 %2380 }
 0x457   : > { %v2597_v55 = vpop.permute.xlu0 %2596 }
 0x458   : > { %2630 = vrot.lane.b32.xlu1 %v4736_v31, %s3405_s13  ;;  %v2678_v43 = vrot.slane %v2597_v55, 1 }
 0x459   : > { %2248 = vrot.lane.b32.xlu0 %v4740_v51, %s3408_s14 }
 0x45a   : > { %v2595_v17 = vpop.permute.xlu1 %2594 }
 0x45b   : > { %v4853_v13 = vpop.permute.xlu0 %2378 }
 0x45c   : > { %2250 = vrot.lane.b32.xlu1 %v4748_v3, %s3408_s14 }
 0x45d   : > { %2310 = vrot.lane.b32.xlu0 %v4740_v51, %s3407_s12  ;;  %v4907_v51 = vsel %vm1560_vm5, %v2674_v1, %v2675_v44 }
 0x45e   : > { %v4859_v9 = vpop.permute.xlu1 %2224 }
 0x45f   : > { %v2593_v46 = vpop.permute.xlu0 %2592 }
 0x460   : > { %2312 = vrot.lane.b32.xlu1 %v4748_v3, %s3407_s12  ;;  %v2676_v34 = vrot.slane %v2593_v46, 1  ;;  %v2677_v3 = vrot.slane %v2595_v17, 1 }
 0x461   : > { %2406 = vrot.lane.b32.xlu0 %v4754_v15, %s3406_s11 }
 0x462   : > { %v4865_v19 = vpop.permute.xlu1 %2226 }
 0x463   : > { %v4867_v8 = vpop.permute.xlu0 %2286 }
 0x464   : > { %2638 = vrot.lane.b32.xlu1 %v4750_v40, %s3405_s13 }
 0x465   : > { %2636 = vrot.lane.b32.xlu0 %v4759_v14, %s3405_s13 }
 0x466   : > { %v4873_v37 = vpop.permute.xlu1 %2288 }
 0x467   : > { %v4875_v49 = vpop.permute.xlu0 %2382 }
 0x468   : > { %5457 = vst [vmem:[#allocation22_spill] sm:$0xff] %v4875_v49  ;;  %2634 = vrot.lane.b32.xlu1 %v4754_v15, %s3405_s13  ;;  %v4921_v15 = vsel %vm1560_vm5, %v2676_v34, %v2677_v3 }
 0x469   : > { %2314 = vrot.lane.b32.xlu0 %v4764_v29, %s3407_s12  ;;  %v4935_v29 = vsel %vm1560_vm5, %v2677_v3, %v2678_v43 }
 0x46a   : > { %v2603_v63 = vpop.permute.xlu1 %2602 }
 0x46b   : > { %v2601_v42 = vpop.permute.xlu0 %2600  ;;  %v2681_v1 = vrot.slane %v2603_v63, 1 }
 0x46c   : > { %2408 = vrot.lane.b32.xlu1 %v4759_v14, %s3406_s11  ;;  %v2680_v26 = vrot.slane %v2601_v42, 1 }
 0x46d   : > { %2442 = vrot.lane.b32.xlu0 %v4825_v21, %s3408_s14 }
 0x46e   : > { %v2599_v52 = vpop.permute.xlu1 %2598  ;;  %v4969_v34 = vsel %vm1560_vm5, %v2680_v26, %v2681_v1 }
 0x46f   : > { %v4885_v41 = vpop.permute.xlu0 %2228  ;;  %v2679_v18 = vrot.slane %v2599_v52, 1  ;;  %5465 = vst [vmem:[#allocation6_spill] sm:$0xff] %v4969_v34 }
 0x470   : > { %2316 = vrot.lane.b32.xlu1 %v4778_v32, %s3407_s12 }
 0x471   : > { %2752 = vrot.lane.b32.xlu0 %v4891_v10, %s3408_s14  ;;  %v4957_v46 = vsel %vm1560_vm5, %v2679_v18, %v2680_v26 }
 0x472   : > { %v4895_v30 = vpop.permute.xlu1 %2384  ;;  %5463 = vst [vmem:[#allocation15_spill] sm:$0xff] %v4957_v46 }
 0x473   : > { %5458 = vst [vmem:[#allocation27_spill] sm:$0xff] %v4895_v30  ;;  %v4897_v45 = vpop.permute.xlu0 %2290 }
 0x474   : > { %2444 = vrot.lane.b32.xlu1 %v4839_v48, %s3408_s14 }
 0x475   : > { %2446 = vrot.lane.b32.xlu0 %v4853_v13, %s3408_s14 }
 0x476   : > { %v4903_v47 = vpop.permute.xlu1 %2230 }
 0x477   : > { %v2609_v31 = vpop.permute.xlu0 %2608 }
 0x478   : > { %2754 = vrot.lane.b32.xlu1 %v4907_v51, %s3408_s14 }
 0x479   : > { %2506 = vrot.lane.b32.xlu0 %v4853_v13, %s3407_s12 }
 0x47a   : > { %v4913_v11 = vpop.permute.xlu1 %2292 }
 0x47b   : > { %v4915_v40 = vpop.permute.xlu0 %2386 }
 0x47c   : > { %5459 = vst [vmem:[#allocation5_spill] sm:$0xff] %v4915_v40  ;;  %2448 = vrot.lane.b32.xlu1 %v4847_v36, %s3408_s14 }
 0x47d   : > { %2756 = vrot.lane.b32.xlu0 %v4921_v15, %s3408_s14 }
 0x47e   : > { %v4925_v58 = vpop.permute.xlu1 %2388 }
 0x47f   : > { %5460 = vst [vmem:[#allocation20_spill] sm:$0xff] %v4925_v58  ;;  %v2605_v57 = vpop.permute.xlu0 %2604 }
 0x480   : > { %2508 = vrot.lane.b32.xlu1 %v4847_v36, %s3407_s12  ;;  %v2682_v18 = vrot.slane %v2605_v57, 1  ;;  %v2684_v57 = vrot.slane %v2609_v31, 1 }
 0x481   : > { %2818 = vrot.lane.b32.xlu0 %v4921_v15, %s3407_s12 }
 0x482   : > { %v2607_v14 = vpop.permute.xlu1 %2606 }
 0x483   : > { %v4931_v25 = vpop.permute.xlu0 %2232  ;;  %v2683_v43 = vrot.slane %v2607_v14, 1 }
 0x484   : > { %2758 = vrot.lane.b32.xlu1 %v4935_v29, %s3408_s14 }
 0x485   : > { %2450 = vrot.lane.b32.xlu0 %v4875_v49, %s3408_s14  ;;  %v4989_v20 = vsel %vm1560_vm5, %v2682_v18, %v2683_v43  ;;  %v5005_v18 = vsel %vm1560_vm5, %v2683_v43, %v2684_v57 }
 0x486   : > { %v4941_v32 = vpop.permute.xlu1 %2234  ;;  %5468 = vst [vmem:[#allocation35_spill] sm:$0xff] %v4989_v20  ;;  %5470 = vst [vmem:[#allocation26_spill] sm:$0xff] %v5005_v18 }
 0x487   : > { %5461 = vst [vmem:[#allocation14_spill] sm:$0xff] %v4941_v32  ;;  %v4943_v23 = vpop.permute.xlu0 %2294 }
 0x488   : > { %2820 = vrot.lane.b32.xlu1 %v4935_v29, %s3407_s12 }
 0x489   : > { %2510 = vrot.lane.b32.xlu0 %v4875_v49, %s3407_s12 }
 0x48a   : > { %v4949_v55 = vpop.permute.xlu1 %2296 }
 0x48b   : > { %v4951_v17 = vpop.permute.xlu0 %2390 }
 0x48c   : > { %5462 = vst [vmem:[#allocation28_spill] sm:$0xff] %v4951_v17  ;;  %2452 = vrot.lane.b32.xlu1 %v4895_v30, %s3408_s14 }
 0x48d   : > { %2760 = vrot.lane.b32.xlu0 %v4957_v46, %s3408_s14 }
 0x48e   : > { %v2615_v27 = vpop.permute.xlu1 %2614 }
 0x48f   : > { %v2613_v52 = vpop.permute.xlu0 %2612  ;;  %v2687_v57 = vrot.slane %v2615_v27, 1 }
 0x490   : > { %2512 = vrot.lane.b32.xlu1 %v4895_v30, %s3407_s12  ;;  %v2686_v31 = vrot.slane %v2613_v52, 1 }
 0x491   : > { %2822 = vrot.lane.b32.xlu0 %v4957_v46, %s3407_s12 }
 0x492   : > { %v2611_v42 = vpop.permute.xlu1 %2610 }
 0x493   : > { %v4965_v44 = vpop.permute.xlu0 %2236 }
 0x494   : > { %5464 = vst [vmem:[#allocation32_spill] sm:$0xff] %v4965_v44  ;;  %2762 = vrot.lane.b32.xlu1 %v4969_v34, %s3408_s14 }
 0x495   : > { %2454 = vrot.lane.b32.xlu0 %v4915_v40, %s3408_s14 }
 0x496   : > { %v4975_v63 = vpop.permute.xlu1 %2392 }
 0x497   : > { %5466 = vst [vmem:[#allocation21_spill] sm:$0xff] %v4975_v63  ;;  %v4977_v3 = vpop.permute.xlu0 %2298 }
 0x498   : > { %2824 = vrot.lane.b32.xlu1 %v4969_v34, %s3407_s12 }
 0x499   : > { %2514 = vrot.lane.b32.xlu0 %v4915_v40, %s3407_s12 }
 0x49a   : > { %v4983_v26 = vpop.permute.xlu1 %2238 }
 0x49b   : > { %5467 = vst [vmem:[#allocation31_spill] sm:$0xff] %v4983_v26  ;;  %v2621_v1 = vpop.permute.xlu0 %2620 }
 0x49c   : > { %2456 = vrot.lane.b32.xlu1 %v4925_v58, %s3408_s14 }
 0x49d   : > { %2764 = vrot.lane.b32.xlu0 %v4989_v20, %s3408_s14 }
 0x49e   : > { %v4993_v14 = vpop.permute.xlu1 %2300 }
 0x49f   : > { %5469 = vst [vmem:[#allocation7_spill] sm:$0xff] %v4993_v14  ;;  %v4995_v34 = vpop.permute.xlu0 %2394 }
 0x4a0   : > { %2516 = vrot.lane.b32.xlu1 %v4925_v58, %s3407_s12  ;;  %v2685_v58 = vrot.slane %v2611_v42, 1 }
 0x4a1   : > { %2826 = vrot.lane.b32.xlu0 %v4989_v20, %s3407_s12 }
 0x4a2   : > { %v5001_v26 = vpop.permute.xlu1 %2396  ;;  %v5021_v43 = vsel %vm1560_vm5, %v2685_v58, %v2686_v31  ;;  %v5035_v58 = vsel %vm1560_vm5, %v2686_v31, %v2687_v57 }
 0x4a3   : > { %v2617_v40 = vpop.permute.xlu0 %2616  ;;  %5472 = vst [vmem:[#allocation36_spill] sm:$0xff] %v5021_v43  ;;  %5474 = vst [vmem:[#allocation39_spill] sm:$0xff] %v5035_v58 }
 0x4a4   : > { %2766 = vrot.lane.b32.xlu1 %v5005_v18, %s3408_s14 }
 0x4a5   : > { %2458 = vrot.lane.b32.xlu0 %v4951_v17, %s3408_s14 }
 0x4a6   : > { %v2619_v44 = vpop.permute.xlu1 %2618 }
 0x4a7   : > { %v2241_v56 = vpop.permute.xlu0 %2240 }
 0x4a8   : > { %2828 = vrot.lane.b32.xlu1 %v5005_v18, %s3407_s12 }
 0x4a9   : > { %2518 = vrot.lane.b32.xlu0 %v4951_v17, %s3407_s12 }
 0x4aa   : > { %v2243_v20 = vpop.permute.xlu1 %2242 }
 0x4ab   : > { %v5015_v30 = vpop.permute.xlu0 %2302 }
 0x4ac   : > { %5471 = vst [vmem:[#allocation16_spill] sm:$0xff] %v5015_v30  ;;  %2460 = vrot.lane.b32.xlu1 %v4975_v63, %s3408_s14  ;;  %v2689_v30 = vrot.slane %v2619_v44, 1 }
 0x4ad   : > { %2768 = vrot.lane.b32.xlu0 %v5021_v43, %s3408_s14 }
 0x4ae   : > { %v5025_v42 = vpop.permute.xlu1 %2304 }
 0x4af   : > { %5473 = vst [vmem:[#allocation18_spill] sm:$0xff] %v5025_v42  ;;  %v5027_v18 = vpop.permute.xlu0 %2398 }
 0x4b0   : > { %2520 = vrot.lane.b32.xlu1 %v4975_v63, %s3407_s12  ;;  %v2688_v63 = vrot.slane %v2617_v40, 1 }
 0x4b1   : > { %2830 = vrot.lane.b32.xlu0 %v5021_v43, %s3407_s12  ;;  %v2278_v43 = vadd.f32 %v2241_v56, %v4695_v54  ;;  %v2690_v56 = vrot.slane %v2621_v1, 1  ;;  %v2279_v54 = vadd.f32 %v2243_v20, %v4701_v16 }
 0x4b2   : > { %v2627_v52 = vpop.permute.xlu1 %2626  ;;  %v5054_v44 = vsel %vm1560_vm5, %v2688_v63, %v2689_v30 }
 0x4b3   : > { %v2625_v17 = vpop.permute.xlu0 %2624  ;;  %5476 = vst [vmem:[#allocation29_spill] sm:$0xff] %v5054_v44 }
 0x4b4   : > { %2770 = vrot.lane.b32.xlu1 %v5035_v58, %s3408_s14  ;;  %v2692_v16 = vrot.slane %v2625_v17, 1 }
 0x4b5   : > { %2462 = vrot.lane.b32.xlu0 %v4995_v34, %s3408_s14 }
 0x4b6   : > { %v2623_v27 = vpop.permute.xlu1 %2622 }
 0x4b7   : > { %v2245_v42 = vpop.permute.xlu0 %2244  ;;  %v2691_v20 = vrot.slane %v2623_v27, 1 }
 0x4b8   : > { %2832 = vrot.lane.b32.xlu1 %v5035_v58, %s3407_s12  ;;  %v2280_v27 = vadd.f32 %v2245_v42, %v4708_v60 }
 0x4b9   : > { %2522 = vrot.lane.b32.xlu0 %v4995_v34, %s3407_s12 }
 0x4ba   : > { %v5046_v31 = vpop.permute.xlu1 %2400 }
 0x4bb   : > { %v2307_v57 = vpop.permute.xlu0 %2306 }
 0x4bc   : > { %v5048_v46 = vadd.f32 %v2307_v57, %v2278_v43  ;;  %2464 = vrot.lane.b32.xlu1 %v5001_v26, %s3408_s14  ;;  %v5069_v57 = vsel %vm1560_vm5, %v2689_v30, %v2690_v56  ;;  %v5083_v30 = vsel %vm1560_vm5, %v2691_v20, %v2692_v16 }
 0x4bd   : > { %2772 = vrot.lane.b32.xlu0 %v5054_v44, %s3408_s14  ;;  %5478 = vst [vmem:[#allocation41_spill] sm:$0xff] %v5069_v57 }
 0x4be   : > { %5475 = vst [vmem:[#allocation8_spill] sm:$0xff] %v5048_v46  ;;  %v2247_v58 = vpop.permute.xlu1 %2246 }
 0x4bf   : > { %v5058_v14 = vpop.permute.xlu0 %2632  ;;  %v2281_v17 = vadd.f32 %v2247_v58, %v4715_v33 }
 0x4c0   : > { %2524 = vrot.lane.b32.xlu1 %v5001_v26, %s3407_s12 }
 0x4c1   : > { %2834 = vrot.lane.b32.xlu0 %v5054_v44, %s3407_s12  ;;  %v2693_v44 = vrot.slane %v2627_v52, 1 }
 0x4c2   : > { %v2309_v40 = vpop.permute.xlu1 %2308 }
 0x4c3   : > { %v5065_v43 = vadd.f32 %v2309_v40, %v2279_v54  ;;  %v2403_v63 = vpop.permute.xlu0 %2402  ;;  %v5098_v60 = vsel %vm1560_vm5, %v2692_v16, %v2693_v44 }
 0x4c4   : > { %2774 = vrot.lane.b32.xlu1 %v5069_v57, %s3408_s14 }
 0x4c5   : > { %5477 = vst [vmem:[#allocation38_spill] sm:$0xff] %v5065_v43  ;;  %2466 = vrot.lane.b32.xlu0 %v5027_v18, %s3408_s14 }
 0x4c6   : > { %v2405_v1 = vpop.permute.xlu1 %2404 }
 0x4c7   : > { %v2629_v46 = vpop.permute.xlu0 %2628 }
 0x4c8   : > { %2836 = vrot.lane.b32.xlu1 %v5069_v57, %s3407_s12 }
 0x4c9   : > { %2526 = vrot.lane.b32.xlu0 %v5027_v18, %s3407_s12 }
 0x4ca   : > { %v2631_v54 = vpop.permute.xlu1 %2630 }
 0x4cb   : > { %v2249_v40 = vpop.permute.xlu0 %2248  ;;  %v2695_v58 = vrot.slane %v2631_v54, 1 }
 0x4cc   : > { %2468 = vrot.lane.b32.xlu1 %v5046_v31, %s3408_s14 }
 0x4cd   : > { %2776 = vrot.lane.b32.xlu0 %v5083_v30, %s3408_s14 }
 0x4ce   : > { %v2251_v56 = vpop.permute.xlu1 %2250 }
 0x4cf   : > { %v2311_v57 = vpop.permute.xlu0 %2310 }
 0x4d0   : > { %v2346_v43 = vadd.f32 %v2311_v57, %v2280_v27  ;;  %2528 = vrot.lane.b32.xlu1 %v5046_v31, %s3407_s12 }
 0x4d1   : > { %2838 = vrot.lane.b32.xlu0 %v5083_v30, %s3407_s12 }
 0x4d2   : > { %v2313_v32 = vpop.permute.xlu1 %2312  ;;  %v5094_v20 = vadd.f32 %v4995_v34, %v2346_v43  ;;  %v2282_v34 = vadd.f32 %v2249_v40, %v4722_v61  ;;  %v2283_v61 = vadd.f32 %v2251_v56, %v4729_v53 }
 0x4d3   : > { %v2347_v6 = vadd.f32 %v2313_v32, %v2281_v17  ;;  %v2407_v49 = vpop.permute.xlu0 %2406  ;;  %v2694_v32 = vrot.slane %v2629_v46, 1  ;;  %v2696_v46 = vrot.slane %v5058_v14, 1 }
 0x4d4   : > { %2778 = vrot.lane.b32.xlu1 %v5098_v60, %s3408_s14 }
 0x4d5   : > { %2470 = vrot.lane.b32.xlu0 %v2403_v63, %s3408_s14  ;;  %v5104_v33 = vadd.f32 %v5001_v26, %v2347_v6  ;;  %v2703_v6 = vsel %vm1560_vm5, %v2694_v32, %v2695_v58  ;;  %v2702_v32 = vsel %vm1560_vm5, %v2695_v58, %v2696_v46  ;;  %v2670_v58 = vrot.slane %v4816_v39, 1 }
 0x4d6   : > { %v2639_v42 = vpop.permute.xlu1 %2638 }
 0x4d7   : > { %v2637_v52 = vpop.permute.xlu0 %2636 }
 0x4d8   : > { %2840 = vrot.lane.b32.xlu1 %v5098_v60, %s3407_s12 }
 0x4d9   : > { %2530 = vrot.lane.b32.xlu0 %v2403_v63, %s3407_s12  ;;  %v2268_v63 = vadd.f32 %v4833_v12, %v4770_v24 }
 0x4da   : > { %v2635_v44 = vpop.permute.xlu1 %2634 }
 0x4db   : > { %v2315_v43 = vpop.permute.xlu0 %2314  ;;  %v2697_v24 = vrot.slane %v2635_v44, 1 }
 0x4dc   : > { %v2348_v57 = vadd.f32 %v2315_v43, %v2282_v34  ;;  %2472 = vrot.lane.b32.xlu1 %v2405_v1, %s3408_s14  ;;  %v2269_v34 = vadd.f32 %v4841_v22, %v4627_v5 }
 0x4dd   : > { %2780 = vrot.lane.b32.xlu0 %v2703_v6, %s3408_s14 }
 0x4de   : > { %v2409_v26 = vpop.permute.xlu1 %2408  ;;  %v5115_v16 = vadd.f32 %v5027_v18, %v2348_v57  ;;  %v2334_v18 = vadd.f32 %v4867_v8, %v2268_v63  ;;  %v2671_v8 = vrot.slane %v4818_v62, 1 }
 0x4df   : > { %v2443_v54 = vpop.permute.xlu0 %2442 }
 0x4e0   : > { %2532 = vrot.lane.b32.xlu1 %v2405_v1, %s3407_s12  ;;  %v2698_v1 = vrot.slane %v2637_v52, 1  ;;  %v2426_v12 = vadd.f32 %v4812_v0, %v2334_v18  ;;  %v2719_v62 = vsel %vm1560_vm5, %v2670_v58, %v2671_v8 }
 0x4e1   : > { %2534 = vrot.lane.b32.xlu0 %v2407_v49, %s3407_s12  ;;  %v2699_v49 = vrot.slane %v2639_v42, 1  ;;  %v2335_v42 = vadd.f32 %v4873_v37, %v2269_v34 }
 0x4e2   : > { %v2317_v40 = vpop.permute.xlu1 %2316  ;;  %v2701_v39 = vsel %vm1560_vm5, %v2697_v24, %v2698_v1  ;;  %v2271_v24 = vadd.f32 %v4865_v19, %v4639_v7 }
 0x4e3   : > { %v2349_v27 = vadd.f32 %v2317_v40, %v2283_v61  ;;  %v2753_v17 = vpop.permute.xlu0 %2752  ;;  %v2700_v44 = vsel %vm1560_vm5, %v2698_v1, %v2699_v49  ;;  %v2427_v37 = vadd.f32 %v4823_v50, %v2335_v42  ;;  %v5154_v40 = vld [vmem:[%s5295_s6] ss:$0 sm:$0xff] }
 0x4e4   : > { %2782 = vrot.lane.b32.xlu1 %v2702_v32, %s3408_s14  ;;  %v2337_v58 = vadd.f32 %v4913_v11, %v2271_v24  ;;  %v2272_v11 = vadd.f32 %v4885_v41, %v4646_v59  ;;  %v2273_v59 = vadd.f32 %v4903_v47, %v4653_v38 }
 0x4e5   : > { %2536 = vrot.lane.b32.xlu0 %v2409_v26, %s3407_s12  ;;  %v5129_v14 = vadd.f32 %v5046_v31, %v2349_v27  ;;  %v2490_v31 = vadd.f32 %v2443_v54, %v2426_v12  ;;  %v2672_v26 = vrot.slane %v4810_v28, 1  ;;  %v2270_v54 = vadd.f32 %v4859_v9, %v4633_v2 }
 0x4e6   : > { %v2445_v53 = vpop.permute.xlu1 %2444  ;;  %v2429_v7 = vadd.f32 %v4839_v48, %v2337_v58  ;;  %v2907_v48 = vld [vmem:[%s3534_s21 + $0x10] sm:$0xff] }
 0x4e7   : > { %v2447_v56 = vpop.permute.xlu0 %2446  ;;  %v2718_v50 = vsel %vm1560_vm5, %v2671_v8, %v2672_v26 }
 0x4e8   : > { %2844 = vrot.lane.b32.xlu1 %v2702_v32, %s3407_s12  ;;  %v2336_v32 = vadd.f32 %v4897_v45, %v2270_v54 }
 0x4e9   : > { %2842 = vrot.lane.b32.xlu0 %v2703_v6, %s3407_s12  ;;  %v2491_v6 = vadd.f32 %v2445_v53, %v2427_v37  ;;  %v2905_v53 = vld [vmem:[%s3534_s21] sm:$0xff]  ;;  %v2338_v37 = vadd.f32 %v4943_v23, %v2272_v11 }
 0x4ea   : > { %v2755_v43 = vpop.permute.xlu1 %2754  ;;  %v2428_v49 = vadd.f32 %v4825_v21, %v2336_v32  ;;  %v2908_v32 = vld [vmem:[%s3534_s21 + $0x18] sm:$0xff] }
 0x4eb   : > { %v2507_v52 = vpop.permute.xlu0 %2506 }
 0x4ec   : > { %v2554_v0 = vadd.f32 %v2507_v52, %v2490_v31  ;;  %2848 = vrot.lane.b32.xlu1 %v2700_v44, %s3407_s12  ;;  %v2492_v45 = vadd.f32 %v2447_v56, %v2428_v49  ;;  %v2906_v31 = vld [vmem:[%s3534_s21 + $0x8] sm:$0xff] }
 0x4ed   : > { %2846 = vrot.lane.b32.xlu0 %v2701_v39, %s3407_s12 }
 0x4ee   : > { %v2720_v5 = vadd.f32 %v2719_v62, %v2554_v0  ;;  %v2449_v22 = vpop.permute.xlu1 %2448 }
 0x4ef   : > { %v2757_v57 = vpop.permute.xlu0 %2756  ;;  %v2493_v56 = vadd.f32 %v2449_v22, %v2429_v7 }
 0x4f0   : > { %v2800_v61 = vadd.f32 %v2753_v17, %v2720_v5 }
 0x4f2   : > { %v2509_v46 = vpop.permute.xlu1 %2508 }
 0x4f3   : > { %v2555_v63 = vadd.f32 %v2509_v46, %v2491_v6  ;;  %v2819_v27 = vpop.permute.xlu0 %2818  ;;  %v2430_v46 = vadd.f32 %v4853_v13, %v2338_v37 }
 0x4f4   : > { %v2866_v18 = vadd.f32 %v2819_v27, %v2800_v61 }
 0x4f5   : > { %v2721_v28 = vadd.f32 %v2718_v50, %v2555_v63  ;;  %v2339_v63 = vadd.f32 %v4949_v55, %v2273_v59  ;;  %v2274_v55 = vadd.f32 %v4931_v25, %v4659_v4  ;;  %v5480_v4 = vld [vmem:[#allocation23_spill] sm:$0xff]  ;;  %v5481_v25 = vld [vmem:[#allocation14_spill] sm:$0xff] }
 0x4f6   : > { %v2889_v2 = vadd.f32 %v5154_v40, %v2866_v18  ;;  %v2759_v9 = vpop.permute.xlu1 %2758 }
 0x4f7   : > { %v2451_v17 = vpop.permute.xlu0 %2450  ;;  %v2801_v12 = vadd.f32 %v2755_v43, %v2721_v28  ;;  %v2431_v38 = vadd.f32 %v4847_v36, %v2339_v63  ;;  %v2340_v24 = vadd.f32 %v4977_v3, %v2274_v55  ;;  %v2909_v36 = vld [vmem:[%s3534_s21 + $0x20] sm:$0xff]  ;;  %v5491_v55 = vld [vmem:[#allocation31_spill] sm:$0xff] }
 0x4f8   : > { %v2921_v1 = vadd.f32 %v2905_v53, %v2889_v2 }
 0x4fa   : > { %2937 = vst.msk [vmem:[%s3539_s25] sm:$0xff] %vm458_vm1, %v2921_v1  ;;  %v2821_v35 = vpop.permute.xlu1 %2820 }
 0x4fb   : > { %v2867_v8 = vadd.f32 %v2821_v35, %v2801_v12  ;;  %v2511_v34 = vpop.permute.xlu0 %2510 }
 0x4fc   : > { %v2556_v42 = vadd.f32 %v2511_v34, %v2492_v45 }
 0x4fd   : > { %v2890_v52 = vadd.f32 %v5154_v40, %v2867_v8  ;;  %v5479_v8 = vld [vmem:[#allocation22_spill] sm:$0xff] }
 0x4fe   : > { %v2722_v21 = vadd.f32 %v4891_v10, %v2556_v42  ;;  %v2453_v44 = vpop.permute.xlu1 %2452  ;;  %v2432_v34 = vadd.f32 %v5479_v8, %v2340_v24  ;;  %v2275_v42 = vadd.f32 %v5481_v25, %v5480_v4  ;;  %v5494_v25 = vld [vmem:[#allocation20_spill] sm:$0xff] }
 0x4ff   : > { %v2922_v19 = vadd.f32 %v2906_v31, %v2890_v52  ;;  %v2761_v43 = vpop.permute.xlu0 %2760  ;;  %v2495_v2 = vadd.f32 %v2453_v44, %v2431_v38  ;;  %v5482_v44 = vld [vmem:[#allocation7_spill] sm:$0xff] }
 0x500   : > { %v2802_v39 = vadd.f32 %v2757_v57, %v2722_v21  ;;  %v2494_v57 = vadd.f32 %v2451_v17, %v2430_v46  ;;  %v2341_v7 = vadd.f32 %v5482_v44, %v2275_v42 }
 0x501   : > { %2938 = vst.msk [vmem:[%s3539_s25 + $0x8] sm:$0xff] %vm458_vm1, %v2922_v19 }
 0x502   : > { %v2513_v0 = vpop.permute.xlu1 %2512 }
 0x503   : > { %v2557_v62 = vadd.f32 %v2513_v0, %v2493_v56  ;;  %v2823_v5 = vpop.permute.xlu0 %2822  ;;  %v5483_v0 = vld [vmem:[#allocation15_spill] sm:$0xff] }
 0x504   : > { %v2868_v6 = vadd.f32 %v2823_v5, %v2802_v39  ;;  %v5484_v5 = vld [vmem:[#allocation27_spill] sm:$0xff] }
 0x505   : > { %v2723_v10 = vadd.f32 %v4907_v51, %v2557_v62  ;;  %v2433_v37 = vadd.f32 %v5484_v5, %v2341_v7  ;;  %v5496_v5 = vld [vmem:[#allocation8_spill] sm:$0xff] }
 0x506   : > { %v2891_v26 = vadd.f32 %v5154_v40, %v2868_v6  ;;  %v2763_v22 = vpop.permute.xlu1 %2762 }
 0x507   : > { %v2455_v54 = vpop.permute.xlu0 %2454  ;;  %v2803_v41 = vadd.f32 %v2759_v9, %v2723_v10 }
 0x508   : > { %v2923_v61 = vadd.f32 %v2907_v48, %v2891_v26  ;;  %v2496_v21 = vadd.f32 %v2455_v54, %v2432_v34  ;;  %v5485_v26 = vld [vmem:[#allocation4_spill] sm:$0xff]  ;;  %v5493_v34 = vld [vmem:[#allocation35_spill] sm:$0xff] }
 0x50a   : > { %2939 = vst.msk [vmem:[%s3539_s25 + $0x10] sm:$0xff] %vm458_vm1, %v2923_v61  ;;  %v2825_v23 = vpop.permute.xlu1 %2824 }
 0x50b   : > { %v2869_v51 = vadd.f32 %v2825_v23, %v2803_v41  ;;  %v2515_v27 = vpop.permute.xlu0 %2514 }
 0x50c   : > { %v2558_v50 = vadd.f32 %v2515_v27, %v2494_v57  ;;  %v5487_v57 = vld [vmem:[#allocation16_spill] sm:$0xff] }
 0x50d   : > { %v2892_v18 = vadd.f32 %v5154_v40, %v2869_v51  ;;  %v5488_v51 = vld [vmem:[#allocation6_spill] sm:$0xff] }
 0x50e   : > { %v2724_v13 = vadd.f32 %v4921_v15, %v2558_v50  ;;  %v2457_v28 = vpop.permute.xlu1 %2456 }
 0x50f   : > { %v2924_v47 = vadd.f32 %v2908_v32, %v2892_v18  ;;  %v2765_v53 = vpop.permute.xlu0 %2764  ;;  %v2497_v48 = vadd.f32 %v2457_v28, %v2433_v37  ;;  %v2911_v32 = vld [vmem:[%s3534_s21 + $0x30] sm:$0xff]  ;;  %v5489_v28 = vld [vmem:[#allocation5_spill] sm:$0xff]  ;;  %v5497_v37 = vld [vmem:[#allocation28_spill] sm:$0xff] }
 0x510   : > { %v2804_v17 = vadd.f32 %v2761_v43, %v2724_v13  ;;  %v2910_v43 = vld [vmem:[%s3534_s21 + $0x28] sm:$0xff] }
 0x511   : > { %2940 = vst.msk [vmem:[%s3539_s25 + $0x18] sm:$0xff] %vm458_vm1, %v2924_v47 }
 0x512   : > { %v2517_v9 = vpop.permute.xlu1 %2516 }
 0x513   : > { %v2559_v49 = vadd.f32 %v2517_v9, %v2495_v2  ;;  %v2827_v1 = vpop.permute.xlu0 %2826  ;;  %v5490_v2 = vld [vmem:[#allocation17_spill] sm:$0xff] }
 0x514   : > { %v2870_v12 = vadd.f32 %v2827_v1, %v2804_v17  ;;  %v2277_v9 = vadd.f32 %v5491_v55, %v5490_v2  ;;  %v5492_v1 = vld [vmem:[#allocation18_spill] sm:$0xff]  ;;  %v5501_v55 = vld [vmem:[#allocation39_spill] sm:$0xff] }
 0x515   : > { %v2725_v15 = vadd.f32 %v4935_v29, %v2559_v49 }
 0x516   : > { %v2893_v45 = vadd.f32 %v5154_v40, %v2870_v12  ;;  %v2767_v35 = vpop.permute.xlu1 %2766  ;;  %v2343_v24 = vadd.f32 %v5492_v1, %v2277_v9 }
 0x517   : > { %v2459_v58 = vpop.permute.xlu0 %2458  ;;  %v2805_v52 = vadd.f32 %v2763_v22, %v2725_v15  ;;  %v5486_v22 = vld [vmem:[#allocation32_spill] sm:$0xff] }
 0x518   : > { %v2925_v31 = vadd.f32 %v2909_v36, %v2893_v45  ;;  %v2276_v54 = vadd.f32 %v5486_v22, %v5485_v26  ;;  %v2912_v36 = vld [vmem:[%s3534_s21 + $0x38] sm:$0xff]  ;;  %v2435_v42 = vadd.f32 %v5494_v25, %v2343_v24 }
 0x51a   : > { %2941 = vst.msk [vmem:[%s3539_s25 + $0x20] sm:$0xff] %vm458_vm1, %v2925_v31  ;;  %v2829_v3 = vpop.permute.xlu1 %2828  ;;  %v2342_v23 = vadd.f32 %v5487_v57, %v2276_v54 }
 0x51b   : > { %v2871_v29 = vadd.f32 %v2829_v3, %v2805_v52  ;;  %v2519_v19 = vpop.permute.xlu0 %2518 }
 0x51c   : > { %v2560_v56 = vadd.f32 %v2519_v19, %v2496_v21  ;;  %v2434_v38 = vadd.f32 %v5489_v28, %v2342_v23  ;;  %v5495_v19 = vld [vmem:[#allocation26_spill] sm:$0xff] }
 0x51d   : > { %v2894_v11 = vadd.f32 %v5154_v40, %v2871_v29 }
 0x51e   : > { %v2726_v39 = vadd.f32 %v5483_v0, %v2560_v56  ;;  %v2461_v62 = vpop.permute.xlu1 %2460  ;;  %v2498_v17 = vadd.f32 %v2459_v58, %v2434_v38  ;;  %v2913_v56 = vld [vmem:[%s3534_s21 + $0x40] sm:$0xff] }
 0x51f   : > { %v2926_v6 = vadd.f32 %v2910_v43, %v2894_v11  ;;  %v2769_v10 = vpop.permute.xlu0 %2768  ;;  %v2499_v58 = vadd.f32 %v2461_v62, %v2435_v42 }
 0x520   : > { %v2806_v61 = vadd.f32 %v2765_v53, %v2726_v39 }
 0x521   : > { %2942 = vst.msk [vmem:[%s3539_s25 + $0x28] sm:$0xff] %vm458_vm1, %v2926_v6  ;;  %v2436_v6 = vadd.f32 %v5497_v37, %v5496_v5 }
 0x522   : > { %v2521_v46 = vpop.permute.xlu1 %2520 }
 0x523   : > { %v2561_v59 = vadd.f32 %v2521_v46, %v2497_v48  ;;  %v2831_v41 = vpop.permute.xlu0 %2830  ;;  %v2914_v46 = vld [vmem:[%s3534_s21 + $0x48] sm:$0xff] }
 0x524   : > { %v2872_v63 = vadd.f32 %v2831_v41, %v2806_v61  ;;  %v5498_v41 = vld [vmem:[#allocation36_spill] sm:$0xff] }
 0x525   : > { %v2727_v27 = vadd.f32 %v5488_v51, %v2561_v59  ;;  %v5500_v51 = vld [vmem:[#allocation21_spill] sm:$0xff] }
 0x526   : > { %v2895_v50 = vadd.f32 %v5154_v40, %v2872_v63  ;;  %v2771_v18 = vpop.permute.xlu1 %2770  ;;  %v5499_v63 = vld [vmem:[#allocation38_spill] sm:$0xff] }
 0x527   : > { %v2463_v13 = vpop.permute.xlu0 %2462  ;;  %v2807_v53 = vadd.f32 %v2767_v35, %v2727_v27  ;;  %v2437_v27 = vadd.f32 %v5500_v51, %v5499_v63 }
 0x528   : > { %v2927_v47 = vadd.f32 %v2911_v32, %v2895_v50  ;;  %v2500_v26 = vadd.f32 %v2463_v13, %v2436_v6 }
 0x52a   : > { %2943 = vst.msk [vmem:[%s3539_s25 + $0x30] sm:$0xff] %vm458_vm1, %v2927_v47  ;;  %v2833_v49 = vpop.permute.xlu1 %2832 }
 0x52b   : > { %v2873_v12 = vadd.f32 %v2833_v49, %v2807_v53  ;;  %v2523_v15 = vpop.permute.xlu0 %2522  ;;  %v2915_v53 = vld [vmem:[%s3534_s21 + $0x50] sm:$0xff] }
 0x52c   : > { %v2562_v45 = vadd.f32 %v2523_v15, %v2498_v17 }
 0x52d   : > { %v2896_v8 = vadd.f32 %v5154_v40, %v2873_v12 }
 0x52e   : > { %v2728_v31 = vadd.f32 %v5493_v34, %v2562_v45  ;;  %v2465_v4 = vpop.permute.xlu1 %2464 }
 0x52f   : > { %v2928_v35 = vadd.f32 %v2912_v36, %v2896_v8  ;;  %v2773_v52 = vpop.permute.xlu0 %2772  ;;  %v2916_v8 = vld [vmem:[%s3534_s21 + $0x58] sm:$0xff] }
 0x530   : > { %v2808_v3 = vadd.f32 %v2769_v10, %v2728_v31 }
 0x531   : > { %2944 = vst.msk [vmem:[%s3539_s25 + $0x38] sm:$0xff] %vm458_vm1, %v2928_v35 }
 0x532   : > { %v2525_v21 = vpop.permute.xlu1 %2524 }
 0x533   : > { %v2563_v44 = vadd.f32 %v2525_v21, %v2499_v58  ;;  %v2835_v7 = vpop.permute.xlu0 %2834 }
 0x534   : > { %v2874_v29 = vadd.f32 %v2835_v7, %v2808_v3  ;;  %v5502_v7 = vld [vmem:[#allocation41_spill] sm:$0xff] }
 0x535   : > { %v2729_v43 = vadd.f32 %v5495_v19, %v2563_v44  ;;  %v5503_v19 = vld [vmem:[#allocation29_spill] sm:$0xff] }
 0x536   : > { %v2897_v11 = vadd.f32 %v5154_v40, %v2874_v29  ;;  %v2775_v0 = vpop.permute.xlu1 %2774 }
 0x537   : > { %v2467_v39 = vpop.permute.xlu0 %2466  ;;  %v2809_v48 = vadd.f32 %v2771_v18, %v2729_v43  ;;  %v2501_v18 = vadd.f32 %v2465_v4, %v2437_v27  ;;  %v2919_v27 = vld [vmem:[%s3534_s21 + $0x70] sm:$0xff] }
 0x538   : > { %v2929_v62 = vadd.f32 %v2913_v56, %v2897_v11  ;;  %v2502_v42 = vadd.f32 %v2467_v39, %v5094_v20 }
 0x53a   : > { %2945 = vst.msk [vmem:[%s3539_s25 + $0x40] sm:$0xff] %vm458_vm1, %v2929_v62  ;;  %v2837_v10 = vpop.permute.xlu1 %2836 }
 0x53b   : > { %v2875_v22 = vadd.f32 %v2837_v10, %v2809_v48  ;;  %v2527_v54 = vpop.permute.xlu0 %2526 }
 0x53c   : > { %v2564_v61 = vadd.f32 %v2527_v54, %v2500_v26  ;;  %v2918_v26 = vld [vmem:[%s3534_s21 + $0x68] sm:$0xff]  ;;  %v2917_v54 = vld [vmem:[%s3534_s21 + $0x60] sm:$0xff] }
 0x53d   : > { %v2898_v59 = vadd.f32 %v5154_v40, %v2875_v22 }
 0x53e   : > { %v2730_v57 = vadd.f32 %v5498_v41, %v2564_v61  ;;  %v2469_v23 = vpop.permute.xlu1 %2468 }
 0x53f   : > { %v2930_v32 = vadd.f32 %v2914_v46, %v2898_v59  ;;  %v2777_v50 = vpop.permute.xlu0 %2776  ;;  %v2503_v35 = vadd.f32 %v2469_v23, %v5104_v33  ;;  %v2920_v23 = vld [vmem:[%s3534_s21 + $0x78] sm:$0xff] }
 0x540   : > { %v2810_v28 = vadd.f32 %v2773_v52, %v2730_v57 }
 0x541   : > { %2946 = vst.msk [vmem:[%s3539_s25 + $0x48] sm:$0xff] %vm458_vm1, %v2930_v32 }
 0x542   : > { %v2529_v13 = vpop.permute.xlu1 %2528 }
 0x543   : > { %v2565_v38 = vadd.f32 %v2529_v13, %v2501_v18  ;;  %v2839_v47 = vpop.permute.xlu0 %2838 }
 0x544   : > { %v2876_v2 = vadd.f32 %v2839_v47, %v2810_v28 }
 0x545   : > { %v2731_v9 = vadd.f32 %v5501_v55, %v2565_v38 }
 0x546   : > { %v2899_v17 = vadd.f32 %v5154_v40, %v2876_v2  ;;  %v2779_v49 = vpop.permute.xlu1 %2778 }
 0x547   : > { %v2471_v1 = vpop.permute.xlu0 %2470  ;;  %v2811_v12 = vadd.f32 %v2775_v0, %v2731_v9 }
 0x548   : > { %v2931_v24 = vadd.f32 %v2915_v53, %v2899_v17  ;;  %v2504_v44 = vadd.f32 %v2471_v1, %v5115_v16 }
 0x54a   : > { %2947 = vst.msk [vmem:[%s3539_s25 + $0x50] sm:$0xff] %vm458_vm1, %v2931_v24  ;;  %v2841_v15 = vpop.permute.xlu1 %2840 }
 0x54b   : > { %v2877_v36 = vadd.f32 %v2841_v15, %v2811_v12  ;;  %v2531_v45 = vpop.permute.xlu0 %2530 }
 0x54c   : > { %v2566_v52 = vadd.f32 %v2531_v45, %v2502_v42 }
 0x54d   : > { %v2900_v34 = vadd.f32 %v5154_v40, %v2877_v36 }
 0x54e   : > { %v2473_v31 = vpop.permute.xlu1 %2472  ;;  %v2732_v43 = vadd.f32 %v5503_v19, %v2566_v52 }
 0x54f   : > { %v2932_v4 = vadd.f32 %v2916_v8, %v2900_v34  ;;  %v2781_v25 = vpop.permute.xlu0 %2780  ;;  %v2505_v56 = vadd.f32 %v2473_v31, %v5129_v14 }
 0x550   : > { %v2812_v62 = vadd.f32 %v2777_v50, %v2732_v43 }
 0x551   : > { %2948 = vst.msk [vmem:[%s3539_s25 + $0x58] sm:$0xff] %vm458_vm1, %v2932_v4 }
 0x552   : > { %v2533_v58 = vpop.permute.xlu1 %2532 }
 0x553   : > { %v2567_v21 = vadd.f32 %v2533_v58, %v2503_v35  ;;  %v2535_v3 = vpop.permute.xlu0 %2534 }
 0x554   : > { %v2568_v11 = vadd.f32 %v2535_v3, %v2504_v44 }
 0x555   : > { %v2733_v29 = vadd.f32 %v5502_v7, %v2567_v21 }
 0x556   : > { %v2783_v20 = vpop.permute.xlu1 %2782  ;;  %v2734_v5 = vadd.f32 %v5083_v30, %v2568_v11 }
 0x557   : > { %v2537_v0 = vpop.permute.xlu0 %2536  ;;  %v2813_v39 = vadd.f32 %v2779_v49, %v2733_v29 }
 0x558   : > { %v2569_v33 = vadd.f32 %v2537_v0, %v2505_v56 }
 0x55a   : > { %v2735_v37 = vadd.f32 %v5098_v60, %v2569_v33  ;;  %v2845_v6 = vpop.permute.xlu1 %2844  ;;  %v2814_v60 = vadd.f32 %v2781_v25, %v2734_v5 }
 0x55b   : > { %v2879_v16 = vadd.f32 %v2845_v6, %v2813_v39  ;;  %v2843_v48 = vpop.permute.xlu0 %2842 }
 0x55c   : > { %v2878_v10 = vadd.f32 %v2843_v48, %v2812_v62  ;;  %v2815_v14 = vadd.f32 %v2783_v20, %v2735_v37 }
 0x55d   : > { %v2902_v22 = vadd.f32 %v5154_v40, %v2879_v16 }
 0x55e   : > { %v2901_v46 = vadd.f32 %v5154_v40, %v2878_v10  ;;  %v2849_v30 = vpop.permute.xlu1 %2848 }
 0x55f   : > { %v2934_v61 = vadd.f32 %v2918_v26, %v2902_v22  ;;  %v2881_v59 = vadd.f32 %v2849_v30, %v2815_v14  ;;  %v2847_v41 = vpop.permute.xlu0 %2846 }
 0x560   : > { %v2933_v57 = vadd.f32 %v2917_v54, %v2901_v46  ;;  %v2880_v63 = vadd.f32 %v2847_v41, %v2814_v60 }
 0x561   : > { %2950 = vst.msk [vmem:[%s3539_s25 + $0x68] sm:$0xff] %vm458_vm1, %v2934_v61  ;;  %v2904_v51 = vadd.f32 %v5154_v40, %v2881_v59 }
 0x562   : > { %2949 = vst.msk [vmem:[%s3539_s25 + $0x60] sm:$0xff] %vm458_vm1, %v2933_v57  ;;  %v2903_v32 = vadd.f32 %v5154_v40, %v2880_v63 }
 0x563   : > { %v2936_v50 = vadd.f32 %v2920_v23, %v2904_v51 }
 0x564   : > { %v2935_v18 = vadd.f32 %v2919_v27, %v2903_v32 }
 0x565   : > { %2952 = vst.msk [vmem:[%s3539_s25 + $0x78] sm:$0xff] %vm458_vm1, %v2936_v50 }
 0x566   : > { %2951 = vst.msk [vmem:[%s3539_s25 + $0x70] sm:$0xff] %vm458_vm1, %v2935_v18 }
 0x567 PF: > { %s17_s28 = sadd.s32 1, %s3402_s28   ;;  %s5504_s24 = smov %s3394_s26 }
 0x568   : > { %p14_p1 = scmp.ge.s32.totalorder %s17_s28, 6   ;;  %s5505_s25 = smov %s3398_s27 }
 0x569   : > { %s5506_s26 = smov %s5509_s29  ;;  %s5507_s27 = smov %s5513_s30 }
 0x56a   :  { %16 = sbr.rel (!%p14_p1) target bundleno = 3 (0x3), region = 95 }

</bundles_post_ra>
